<compile_context>
chip_gen: v5e
topology: v5e:2x2
jax: 0.10.0
libtpu: 0.0.40
codegen_flags: <defaults>
</compile_context>

<pallas_src>
import jax
import jax.numpy as jnp
from jax.experimental import pallas as pl
from jax.experimental.pallas import tpu as pltpu

# ----- small synthetic config (stand-in for hidden_dim=1024 pretrained model) -----
B, S, D = 2, 8, 32          # batch, seq, hidden (orig hidden_dim = 1024)
H = D // 2                  # LSTM hidden      (d_model // 2)
F = 4 * D                   # FFN width        (d_model * 4)
C = 17                      # num_classes
CPAD = 128                  # lane-dense padded classifier width
V = 50                      # synthetic vocab size
L = 2                       # synthetic backbone depth (real model: 24 layers)
EPS = 1e-5                  # nn.LayerNorm default eps
SCALE = 1.0 / (D ** 0.5)


def _layernorm(x, gamma, beta):
    mu = jnp.mean(x, axis=-1, keepdims=True)
    var = jnp.mean((x - mu) ** 2, axis=-1, keepdims=True)
    return (x - mu) * jax.lax.rsqrt(var + EPS) * gamma + beta


# ---------------------------------------------------------------------------
# Kernel A: stacked synthetic transformer-encoder layers == the "backbone".
# grid = (L,): the layer axis is the only ("arbitrary") grid axis, so layer l+1
# weights are DMA-pipelined behind layer l compute, each layer's weights are
# fetched from HBM exactly once (amortized over the whole batch), and the
# [B, S, D] activation lives in VMEM scratch for the entire stack.
# TODO(synk): the real module runs a 24-layer pretrained HF backbone; the
#             checkpoint cannot be reproduced in-script, so L=2 deterministic
#             single-head encoder layers stand in for it.  (odd_layer_freeze
#             only toggles requires_grad -> no forward effect; self.bilstm /
#             self.dropout are defined but never used in forward.)
# TODO(synk): at real D=1024/F=4096 add a batch-tile grid axis (B_blk rows per
#             block), K-tile the FFN over F on v7x (64 MiB VMEM) with a pl.when
#             init/finalize accumulator, and raise vmem_limit_bytes to
#             ~48-56 MiB (v7x) / ~64-100 MiB (v5e/v6e); MXU tiles 256-multiples
#             on v6e/v7x vs 128 on v5e.
# ---------------------------------------------------------------------------
def encoder_stack_kernel(maskb_ref, x_ref,
                         wq_ref, bq_ref, wk_ref, bk_ref, wv_ref, bv_ref,
                         wo_ref, bo_ref, g1_ref, be1_ref,
                         w1_ref, b1_ref, w2_ref, b2_ref, g2_ref, be2_ref,
                         out_ref, x_sc):
    l = pl.program_id(0)

    @pl.when(l == 0)
    def _():
        x_sc[...] = x_ref[...]                       # load activation once

    x = x_sc[...]                                    # [B, S, D] f32, VMEM-resident
    x2 = x.reshape(B * S, D)                         # leading-dim merge (S = sublane tile)
    xb = x2.astype(jnp.bfloat16)

    # scale on q ([.,D]) instead of on scores ([.,S])
    q = (jnp.dot(xb, wq_ref[0], preferred_element_type=jnp.float32) + bq_ref[0]) * SCALE
    k = jnp.dot(xb, wk_ref[0], preferred_element_type=jnp.float32) + bk_ref[0]
    v = jnp.dot(xb, wv_ref[0], preferred_element_type=jnp.float32) + bv_ref[0]

    q3 = q.reshape(B, S, D).astype(jnp.bfloat16)
    k3 = k.reshape(B, S, D).astype(jnp.bfloat16)
    v3 = v.reshape(B, S, D).astype(jnp.bfloat16)

    scores = jnp.einsum('bqd,bkd->bqk', q3, k3,
                        preferred_element_type=jnp.float32)             # [B, S, S]
    scores = scores + maskb_ref[...]                 # precomputed additive mask bias
    m = jnp.max(scores, axis=-1, keepdims=True)
    e = jnp.exp(scores - m)
    p = e * pl.reciprocal(jnp.sum(e, axis=-1, keepdims=True), approx=True)

    attn = jnp.einsum('bqk,bkd->bqd', p.astype(jnp.bfloat16), v3,
                      preferred_element_type=jnp.float32)               # [B, S, D]
    attn2 = jnp.dot(attn.reshape(B * S, D).astype(jnp.bfloat16), wo_ref[0],
                    preferred_element_type=jnp.float32) + bo_ref[0]
    h = _layernorm(x2 + attn2, g1_ref[0], be1_ref[0])

    f = jnp.maximum(jnp.dot(h.astype(jnp.bfloat16), w1_ref[0],
                            preferred_element_type=jnp.float32) + b1_ref[0], 0.0)
    f = jnp.dot(f.astype(jnp.bfloat16), w2_ref[0],
                preferred_element_type=jnp.float32) + b2_ref[0]
    y = _layernorm(h + f, g2_ref[0], be2_ref[0]).reshape(B, S, D)

    x_sc[...] = y                                    # stays in VMEM for layer l+1

    @pl.when(l == pl.num_programs(0) - 1)
    def _():
        out_ref[...] = y                             # single writeback


def backbone_forward(x, mask_bias, p):
    # per-layer weight block: leading L axis indexed by the layer grid dim
    Lw = lambda shape: pl.BlockSpec((1,) + shape,
                                    lambda l: (l,) + (0,) * len(shape))
    in_specs = [
        pl.BlockSpec((B, 1, S), lambda l: (0, 0, 0)),    # additive mask bias [B,1,S]
        pl.BlockSpec((B, S, D), lambda l: (0, 0, 0)),    # hidden states, whole batch
        Lw((D, D)), Lw((1, D)), Lw((D, D)), Lw((1, D)),
        Lw((D, D)), Lw((1, D)), Lw((D, D)), Lw((1, D)),
        Lw((1, D)), Lw((1, D)),
        Lw((D, F)), Lw((1, F)), Lw((F, D)), Lw((1, D)),
        Lw((1, D)), Lw((1, D)),
    ]
    return pl.pallas_call(
        encoder_stack_kernel,
        out_shape=jax.ShapeDtypeStruct((B, S, D), jnp.float32),
        grid=(L,),
        in_specs=in_specs,
        out_specs=pl.BlockSpec((B, S, D), lambda l: (0, 0, 0)),
        scratch_shapes=[pltpu.VMEM((B, S, D), jnp.float32)],
        compiler_params=pltpu.CompilerParams(
            dimension_semantics=("arbitrary",),
            vmem_limit_bytes=32 * 1024 * 1024),
    )(mask_bias, x,
      p['wq'], p['bq'], p['wk'], p['bk'], p['wv'], p['bv'],
      p['wo'], p['bo'], p['ln1_g'], p['ln1_b'],
      p['w1'], p['b1'], p['w2'], p['b2'], p['ln2_g'], p['ln2_b'])


# ---------------------------------------------------------------------------
# Kernel B: ResidualLSTM (downsample -> 2-layer LSTM -> LN -> FFN -> residual
# -> LN) fused with the classification head.  grid=(B,), one batch row per grid
# step, dimension_semantics ("parallel",) -> independent rows use both
# TensorCores on v7x.  Input stays [B, S, D] (no HBM transpose); the explicit
# seq recurrence matches permute(1,0,2) -> nn.LSTM -> permute(1,0,2).
# ---------------------------------------------------------------------------
def residual_lstm_head_kernel(x_ref, wd_ref, bd_ref,
                              wih1_ref, whh1_ref, bg1_ref,
                              w2cat_ref, bg2_ref,
                              g1_ref, be1_ref, w1_ref, b1_ref, w2_ref, b2_ref,
                              g2_ref, be2_ref, wc_ref, bc_ref,
                              out_ref, h2_sc):
    x = x_ref[0]                                     # [S, D] f32, this batch row
    xb16 = x.astype(jnp.bfloat16)

    # --- hoisted out of the recurrence: downsample + layer-1 input-gate terms ---
    xd = jnp.dot(xb16, wd_ref[...], preferred_element_type=jnp.float32) + bd_ref[...]
    xg1 = jnp.dot(xd.astype(jnp.bfloat16), wih1_ref[...],
                  preferred_element_type=jnp.float32) + bg1_ref[...]     # [S, 4H]

    def cell(gates, c):                              # PyTorch gate order: i, f, g, o
        i = jax.nn.sigmoid(gates[:, 0 * H:1 * H])
        f = jax.nn.sigmoid(gates[:, 1 * H:2 * H])
        g = jnp.tanh(gates[:, 2 * H:3 * H])
        o = jax.nn.sigmoid(gates[:, 3 * H:4 * H])
        c_new = f * c + i * g
        return o * jnp.tanh(c_new), c_new

    h1 = jnp.zeros((1, H), jnp.float32); c1 = jnp.zeros((1, H), jnp.float32)
    h2 = jnp.zeros((1, H), jnp.float32); c2 = jnp.zeros((1, H), jnp.float32)

    # Only the recurrent matmuls stay inside the time loop; the two layer-2 dots
    # are fused as [h1;h2] @ [[wih2];[whh2]] (weight concatenated once at init).
    # TODO(synk): at real S switch to lax.fori_loop(..., unroll=4-8) with h/c in
    #             VMEM scratch; S=8 here so the static unroll is equivalent.
    for t in range(S):
        g1 = xg1[t:t + 1, :] + jnp.dot(h1.astype(jnp.bfloat16), whh1_ref[...],
                                       preferred_element_type=jnp.float32)
        h1, c1 = cell(g1, c1)
        hcat = jnp.concatenate([h1, h2], axis=-1).astype(jnp.bfloat16)   # [1, 2H]
        g2 = jnp.dot(hcat, w2cat_ref[...],
                     preferred_element_type=jnp.float32) + bg2_ref[...]
        h2, c2 = cell(g2, c2)
        h2_sc[pl.ds(t, 1), :] = h2                   # stash hidden state for the head

    # --- hoisted head: one slab over all timesteps of this row ---
    y = _layernorm(h2_sc[...], g1_ref[...], be1_ref[...])                # norm1
    y = jnp.maximum(jnp.dot(y.astype(jnp.bfloat16), w1_ref[...],
                            preferred_element_type=jnp.float32) + b1_ref[...], 0.0)
    y = jnp.dot(y.astype(jnp.bfloat16), w2_ref[...],
                preferred_element_type=jnp.float32) + b2_ref[...]
    y = _layernorm(x + y, g2_ref[...], be2_ref[...])                     # residual+norm2
    # lane-dense classifier (C padded to CPAD=128), single unmasked slab store
    out_ref[0] = jnp.dot(y.astype(jnp.bfloat16), wc_ref[...],
                         preferred_element_type=jnp.float32) + bc_ref[...]


def residual_lstm_head(x_bsd, p):
    args = (x_bsd,
            p['wd'], p['bd'],
            p['wih1'], p['whh1'], p['bg1'],
            p['w2cat'], p['bg2'],
            p['ln1_g'], p['ln1_b'], p['w1'], p['b1'], p['w2'], p['b2'],
            p['ln2_g'], p['ln2_b'], p['wc_pad'], p['bc_pad'])
    full = lambda a: pl.BlockSpec(a.shape, lambda b: (0,) * a.ndim)   # fetched once
    in_specs = [pl.BlockSpec((1, S, D), lambda b: (b, 0, 0))] + [full(a) for a in args[1:]]
    return pl.pallas_call(
        residual_lstm_head_kernel,
        out_shape=jax.ShapeDtypeStruct((B, S, CPAD), jnp.float32),
        grid=(B,),
        in_specs=in_specs,
        out_specs=pl.BlockSpec((1, S, CPAD), lambda b: (b, 0, 0)),
        scratch_shapes=[pltpu.VMEM((S, H), jnp.float32)],
        compiler_params=pltpu.CompilerParams(
            dimension_semantics=("parallel",),
            vmem_limit_bytes=32 * 1024 * 1024),
    )(*args)


# ---------------------------------------------------------------------------
# Deterministic parameter init (synthetic; shapes follow the module __init__).
# Matmul weights stored bf16 once; fused LSTM biases / padded classifier / fused
# layer-2 LSTM weight all precomputed here (not per forward call).
# ---------------------------------------------------------------------------
def init_params(key):
    keys = iter(jax.random.split(key, 64))
    w = lambda shape, s=0.05: jax.random.normal(next(keys), shape, jnp.float32) * s
    wb = lambda shape, s=0.05: w(shape, s).astype(jnp.bfloat16)
    zl = lambda n: jnp.zeros((L, 1, n), jnp.float32)
    ol = lambda n: jnp.ones((L, 1, n), jnp.float32)
    z2 = lambda n: jnp.zeros((1, n), jnp.float32)
    backbone = dict(
        emb=w((V, D), 0.1), pos=w((S, D), 0.02),
        wq=wb((L, D, D)), bq=zl(D), wk=wb((L, D, D)), bk=zl(D),
        wv=wb((L, D, D)), bv=zl(D), wo=wb((L, D, D)), bo=zl(D),
        ln1_g=ol(D), ln1_b=zl(D),
        w1=wb((L, D, F)), b1=zl(F), w2=wb((L, F, D)), b2=zl(D),
        ln2_g=ol(D), ln2_b=zl(D),
    )
    wih2, whh2 = wb((H, 4 * H)), wb((H, 4 * H))
    wc = wb((D, C))
    head = dict(
        wd=wb((D, H)), bd=z2(H),                                     # downsample
        wih1=wb((H, 4 * H)), whh1=wb((H, 4 * H)),
        bg1=z2(4 * H),                                               # bih1 + bhh1
        w2cat=jnp.concatenate([wih2, whh2], axis=0),                 # [wih2; whh2] fused
        bg2=z2(4 * H),                                               # bih2 + bhh2
        ln1_g=jnp.ones((1, H), jnp.float32), ln1_b=jnp.zeros((1, H), jnp.float32),
        w1=wb((H, F)), b1=z2(F),                                     # linear1
        w2=wb((F, D)), b2=z2(D),                                     # linear2
        ln2_g=jnp.ones((1, D), jnp.float32), ln2_b=jnp.zeros((1, D), jnp.float32),
        wc_pad=jnp.zeros((D, CPAD), jnp.bfloat16).at[:, :C].set(wc), # classification_head
        bc_pad=jnp.zeros((1, CPAD), jnp.float32),                    # (zero bias, padded)
    )
    return dict(backbone=backbone, head=head)


@jax.jit
def transformer_model_forward(params, input_ids, attention_mask):
    bp, hp = params['backbone'], params['head']
    # glue: synthetic embedding lookup (gather) + learned positions
    x = bp['emb'][input_ids] + bp['pos'][None, :, :]                 # [B, S, D]
    # additive attention-mask bias, precomputed once in f32
    mask_bias = ((1.0 - attention_mask.astype(jnp.float32)) * -1e9)[:, None, :]  # [B,1,S]
    x = backbone_forward(x, mask_bias, bp)                           # [B, S, D]
    logits = residual_lstm_head(x, hp)                               # [B, S, CPAD]
    return logits[:, :, :C]                                          # [B, S, C]


if __name__ == "__main__":
    key = jax.random.PRNGKey(0)
    pkey, ikey = jax.random.split(key)
    params = init_params(pkey)
    input_ids = jax.random.randint(ikey, (B, S), 0, V, dtype=jnp.int32)
    attention_mask = jnp.ones((B, S), jnp.int32).at[:, S - 2:].set(0)  # last 2 tokens padded
    out = transformer_model_forward(params, input_ids, attention_mask)
    jax.block_until_ready(out)
    assert out.shape == (B, S, C) and out.dtype == jnp.float32
    print("KERNEL_OK")
</pallas_src>

<mosaic_0001>
module attributes {stable_mosaic.version = 11 : i64} {
  func.func @encoder_stack_kernel(%arg0: i32, %arg1: memref<2x1x8xf32, #tpu.memory_space<vmem>>, %arg2: memref<2x8x32xf32, #tpu.memory_space<vmem>>, %arg3: memref<1x32x32xbf16, #tpu.memory_space<vmem>>, %arg4: memref<1x1x32xf32, #tpu.memory_space<vmem>>, %arg5: memref<1x32x32xbf16, #tpu.memory_space<vmem>>, %arg6: memref<1x1x32xf32, #tpu.memory_space<vmem>>, %arg7: memref<1x32x32xbf16, #tpu.memory_space<vmem>>, %arg8: memref<1x1x32xf32, #tpu.memory_space<vmem>>, %arg9: memref<1x32x32xbf16, #tpu.memory_space<vmem>>, %arg10: memref<1x1x32xf32, #tpu.memory_space<vmem>>, %arg11: memref<1x1x32xf32, #tpu.memory_space<vmem>>, %arg12: memref<1x1x32xf32, #tpu.memory_space<vmem>>, %arg13: memref<1x32x128xbf16, #tpu.memory_space<vmem>>, %arg14: memref<1x1x128xf32, #tpu.memory_space<vmem>>, %arg15: memref<1x128x32xbf16, #tpu.memory_space<vmem>>, %arg16: memref<1x1x32xf32, #tpu.memory_space<vmem>>, %arg17: memref<1x1x32xf32, #tpu.memory_space<vmem>>, %arg18: memref<1x1x32xf32, #tpu.memory_space<vmem>>, %arg19: memref<2x8x32xf32, #tpu.memory_space<vmem>>, %arg20: memref<2x8x32xf32, #tpu.memory_space<vmem>>) attributes {dimension_semantics = [#tpu.dimension_semantics<arbitrary>], iteration_bounds = array<i64: 2>, scalar_prefetch = 0 : i64, scratch_operands = 1 : i64, tpu.core_type = #tpu.core_type<tc>, window_params = [{pipeline_mode = #tpu.pipeline_mode<synchronous>, transform_indices = @transform_0, window_bounds = array<i64: 2, 1, 8>}, {pipeline_mode = #tpu.pipeline_mode<synchronous>, transform_indices = @transform_1, window_bounds = array<i64: 2, 8, 32>}, {transform_indices = @transform_2, window_bounds = array<i64: 1, 32, 32>}, {transform_indices = @transform_3, window_bounds = array<i64: 1, 1, 32>}, {transform_indices = @transform_4, window_bounds = array<i64: 1, 32, 32>}, {transform_indices = @transform_5, window_bounds = array<i64: 1, 1, 32>}, {transform_indices = @transform_6, window_bounds = array<i64: 1, 32, 32>}, {transform_indices = @transform_7, window_bounds = array<i64: 1, 1, 32>}, {transform_indices = @transform_8, window_bounds = array<i64: 1, 32, 32>}, {transform_indices = @transform_9, window_bounds = array<i64: 1, 1, 32>}, {transform_indices = @transform_10, window_bounds = array<i64: 1, 1, 32>}, {transform_indices = @transform_11, window_bounds = array<i64: 1, 1, 32>}, {transform_indices = @transform_12, window_bounds = array<i64: 1, 32, 128>}, {transform_indices = @transform_13, window_bounds = array<i64: 1, 1, 128>}, {transform_indices = @transform_14, window_bounds = array<i64: 1, 128, 32>}, {transform_indices = @transform_15, window_bounds = array<i64: 1, 1, 32>}, {transform_indices = @transform_16, window_bounds = array<i64: 1, 1, 32>}, {transform_indices = @transform_17, window_bounds = array<i64: 1, 1, 32>}, {pipeline_mode = #tpu.pipeline_mode<synchronous>, transform_indices = @transform_18, window_bounds = array<i64: 2, 8, 32>}]} {
    %c0_i32 = arith.constant 0 : i32
    %0 = arith.cmpi eq, %arg0, %c0_i32 : i32
    %1 = arith.extui %0 : i1 to i32
    %c0_i32_0 = arith.constant 0 : i32
    %2 = arith.cmpi ne, %1, %c0_i32_0 : i32
    scf.if %2 {
      %c0_79 = arith.constant 0 : index
      %c0_80 = arith.constant 0 : index
      %c0_81 = arith.constant 0 : index
      %137 = vector.load %arg2[%c0_79, %c0_80, %c0_81] : memref<2x8x32xf32, #tpu.memory_space<vmem>>, vector<2x8x32xf32>
      %c0_82 = arith.constant 0 : index
      %c0_83 = arith.constant 0 : index
      %c0_84 = arith.constant 0 : index
      %138 = vector.load %arg20[%c0_82, %c0_83, %c0_84] : memref<2x8x32xf32, #tpu.memory_space<vmem>>, vector<2x8x32xf32>
      tpu.vector_store %arg20[%c0_82, %c0_83, %c0_84], %137 {strides = array<i32>} : memref<2x8x32xf32, #tpu.memory_space<vmem>>, vector<2x8x32xf32>,
    } else {
    }
    %c0 = arith.constant 0 : index
    %c0_1 = arith.constant 0 : index
    %c0_2 = arith.constant 0 : index
    %3 = vector.load %arg20[%c0, %c0_1, %c0_2] : memref<2x8x32xf32, #tpu.memory_space<vmem>>, vector<2x8x32xf32>
    %4 = vector.shape_cast %3 : vector<2x8x32xf32> to vector<16x32xf32>
    %5 = arith.truncf %4 : vector<16x32xf32> to vector<16x32xbf16>
    %c0_3 = arith.constant 0 : index
    %c0_4 = arith.constant 0 : index
    %c0_5 = arith.constant 0 : index
    %6 = vector.load %arg3[%c0_3, %c0_4, %c0_5] : memref<1x32x32xbf16, #tpu.memory_space<vmem>>, vector<1x32x32xbf16>
    %7 = vector.shape_cast %6 : vector<1x32x32xbf16> to vector<32x32xbf16>
    %cst = arith.constant dense<0.000000e+00> : vector<16x32xf32>
    %8 = tpu.matmul %5, %7, %cst {dimension_numbers = #tpu.dot_dimension_numbers<[1], [0], [0], [1], [0, 0, 1, 1], [], []>} : vector<16x32xbf16>, vector<32x32xbf16>, vector<16x32xf32> -> vector<16x32xf32>
    %c0_6 = arith.constant 0 : index
    %c0_7 = arith.constant 0 : index
    %c0_8 = arith.constant 0 : index
    %9 = vector.load %arg4[%c0_6, %c0_7, %c0_8] : memref<1x1x32xf32, #tpu.memory_space<vmem>>, vector<1x1x32xf32>
    %10 = vector.shape_cast %9 : vector<1x1x32xf32> to vector<1x32xf32>
    %11 = vector.broadcast %10 : vector<1x32xf32> to vector<16x32xf32>
    %12 = arith.addf %8, %11 : vector<16x32xf32>
    %cst_9 = arith.constant 0.176776692 : f32
    %13 = vector.broadcast %cst_9 : f32 to vector<16x32xf32>
    %14 = arith.mulf %12, %13 : vector<16x32xf32>
    %c0_10 = arith.constant 0 : index
    %c0_11 = arith.constant 0 : index
    %c0_12 = arith.constant 0 : index
    %15 = vector.load %arg5[%c0_10, %c0_11, %c0_12] : memref<1x32x32xbf16, #tpu.memory_space<vmem>>, vector<1x32x32xbf16>
    %16 = vector.shape_cast %15 : vector<1x32x32xbf16> to vector<32x32xbf16>
    %cst_13 = arith.constant dense<0.000000e+00> : vector<16x32xf32>
    %17 = tpu.matmul %5, %16, %cst_13 {dimension_numbers = #tpu.dot_dimension_numbers<[1], [0], [0], [1], [0, 0, 1, 1], [], []>} : vector<16x32xbf16>, vector<32x32xbf16>, vector<16x32xf32> -> vector<16x32xf32>
    %c0_14 = arith.constant 0 : index
    %c0_15 = arith.constant 0 : index
    %c0_16 = arith.constant 0 : index
    %18 = vector.load %arg6[%c0_14, %c0_15, %c0_16] : memref<1x1x32xf32, #tpu.memory_space<vmem>>, vector<1x1x32xf32>
    %19 = vector.shape_cast %18 : vector<1x1x32xf32> to vector<1x32xf32>
    %20 = vector.broadcast %19 : vector<1x32xf32> to vector<16x32xf32>
    %21 = arith.addf %17, %20 : vector<16x32xf32>
    %c0_17 = arith.constant 0 : index
    %c0_18 = arith.constant 0 : index
    %c0_19 = arith.constant 0 : index
    %22 = vector.load %arg7[%c0_17, %c0_18, %c0_19] : memref<1x32x32xbf16, #tpu.memory_space<vmem>>, vector<1x32x32xbf16>
    %23 = vector.shape_cast %22 : vector<1x32x32xbf16> to vector<32x32xbf16>
    %cst_20 = arith.constant dense<0.000000e+00> : vector<16x32xf32>
    %24 = tpu.matmul %5, %23, %cst_20 {dimension_numbers = #tpu.dot_dimension_numbers<[1], [0], [0], [1], [0, 0, 1, 1], [], []>} : vector<16x32xbf16>, vector<32x32xbf16>, vector<16x32xf32> -> vector<16x32xf32>
    %c0_21 = arith.constant 0 : index
    %c0_22 = arith.constant 0 : index
    %c0_23 = arith.constant 0 : index
    %25 = vector.load %arg8[%c0_21, %c0_22, %c0_23] : memref<1x1x32xf32, #tpu.memory_space<vmem>>, vector<1x1x32xf32>
    %26 = vector.shape_cast %25 : vector<1x1x32xf32> to vector<1x32xf32>
    %27 = vector.broadcast %26 : vector<1x32xf32> to vector<16x32xf32>
    %28 = arith.addf %24, %27 : vector<16x32xf32>
    %29 = vector.shape_cast %14 : vector<16x32xf32> to vector<2x8x32xf32>
    %30 = arith.truncf %29 : vector<2x8x32xf32> to vector<2x8x32xbf16>
    %31 = vector.shape_cast %21 : vector<16x32xf32> to vector<2x8x32xf32>
    %32 = arith.truncf %31 : vector<2x8x32xf32> to vector<2x8x32xbf16>
    %33 = vector.shape_cast %28 : vector<16x32xf32> to vector<2x8x32xf32>
    %34 = arith.truncf %33 : vector<2x8x32xf32> to vector<2x8x32xbf16>
    "tpu.trace_start"() <{level = 10 : i32, message = "bqd,bkd->bqk"}> : () -> ()
    %cst_24 = arith.constant dense<0.000000e+00> : vector<2x8x8xf32>
    %35 = tpu.matmul %30, %32, %cst_24 {dimension_numbers = #tpu.dot_dimension_numbers<[2], [2], [1], [1], [0, 0, 0, 1, 1, 1], [0], [0]>} : vector<2x8x32xbf16>, vector<2x8x32xbf16>, vector<2x8x8xf32> -> vector<2x8x8xf32>
    "tpu.trace_stop"() : () -> ()
    %c0_25 = arith.constant 0 : index
    %c0_26 = arith.constant 0 : index
    %c0_27 = arith.constant 0 : index
    %36 = vector.load %arg1[%c0_25, %c0_26, %c0_27] : memref<2x1x8xf32, #tpu.memory_space<vmem>>, vector<2x1x8xf32>
    %37 = vector.broadcast %36 : vector<2x1x8xf32> to vector<2x8x8xf32>
    %38 = arith.addf %35, %37 : vector<2x8x8xf32>
    %cst_28 = arith.constant dense<0xFF800000> : vector<2x8xf32>
    %39 = vector.multi_reduction <maximumf>, %38, %cst_28 [2] : vector<2x8x8xf32> to vector<2x8xf32>
    %40 = vector.shape_cast %39 : vector<2x8xf32> to vector<2x8x1xf32>
    %41 = vector.broadcast %40 : vector<2x8x1xf32> to vector<2x8x8xf32>
    %42 = arith.subf %38, %41 : vector<2x8x8xf32>
    %43 = math.exp %42 : vector<2x8x8xf32>
    %cst_29 = arith.constant dense<0.000000e+00> : vector<2x8xf32>
    %44 = vector.multi_reduction <add>, %43, %cst_29 [2] : vector<2x8x8xf32> to vector<2x8xf32>
    %45 = vector.shape_cast %44 : vector<2x8xf32> to vector<2x8x1xf32>
    %46 = tpu.reciprocal %45 {approx = true} : vector<2x8x1xf32> -> vector<2x8x1xf32>
    %47 = vector.broadcast %46 : vector<2x8x1xf32> to vector<2x8x8xf32>
    %48 = arith.mulf %43, %47 : vector<2x8x8xf32>
    %49 = arith.truncf %48 : vector<2x8x8xf32> to vector<2x8x8xbf16>
    "tpu.trace_start"() <{level = 10 : i32, message = "bqk,bkd->bqd"}> : () -> ()
    %cst_30 = arith.constant dense<0.000000e+00> : vector<2x8x32xf32>
    %50 = tpu.matmul %49, %34, %cst_30 {dimension_numbers = #tpu.dot_dimension_numbers<[2], [1], [1], [2], [0, 0, 0, 1, 1, 2], [0], [0]>} : vector<2x8x8xbf16>, vector<2x8x32xbf16>, vector<2x8x32xf32> -> vector<2x8x32xf32>
    "tpu.trace_stop"() : () -> ()
    %51 = vector.shape_cast %50 : vector<2x8x32xf32> to vector<16x32xf32>
    %52 = arith.truncf %51 : vector<16x32xf32> to vector<16x32xbf16>
    %c0_31 = arith.constant 0 : index
    %c0_32 = arith.constant 0 : index
    %c0_33 = arith.constant 0 : index
    %53 = vector.load %arg9[%c0_31, %c0_32, %c0_33] : memref<1x32x32xbf16, #tpu.memory_space<vmem>>, vector<1x32x32xbf16>
    %54 = vector.shape_cast %53 : vector<1x32x32xbf16> to vector<32x32xbf16>
    %cst_34 = arith.constant dense<0.000000e+00> : vector<16x32xf32>
    %55 = tpu.matmul %52, %54, %cst_34 {dimension_numbers = #tpu.dot_dimension_numbers<[1], [0], [0], [1], [0, 0, 1, 1], [], []>} : vector<16x32xbf16>, vector<32x32xbf16>, vector<16x32xf32> -> vector<16x32xf32>
    %c0_35 = arith.constant 0 : index
    %c0_36 = arith.constant 0 : index
    %c0_37 = arith.constant 0 : index
    %56 = vector.load %arg10[%c0_35, %c0_36, %c0_37] : memref<1x1x32xf32, #tpu.memory_space<vmem>>, vector<1x1x32xf32>
    %57 = vector.shape_cast %56 : vector<1x1x32xf32> to vector<1x32xf32>
    %58 = vector.broadcast %57 : vector<1x32xf32> to vector<16x32xf32>
    %59 = arith.addf %55, %58 : vector<16x32xf32>
    %60 = arith.addf %4, %59 : vector<16x32xf32>
    %c0_38 = arith.constant 0 : index
    %c0_39 = arith.constant 0 : index
    %c0_40 = arith.constant 0 : index
    %61 = vector.load %arg11[%c0_38, %c0_39, %c0_40] : memref<1x1x32xf32, #tpu.memory_space<vmem>>, vector<1x1x32xf32>
    %62 = vector.shape_cast %61 : vector<1x1x32xf32> to vector<1x32xf32>
    %c0_41 = arith.constant 0 : index
    %c0_42 = arith.constant 0 : index
    %c0_43 = arith.constant 0 : index
    %63 = vector.load %arg12[%c0_41, %c0_42, %c0_43] : memref<1x1x32xf32, #tpu.memory_space<vmem>>, vector<1x1x32xf32>
    %64 = vector.shape_cast %63 : vector<1x1x32xf32> to vector<1x32xf32>
    %cst_44 = arith.constant dense<0.000000e+00> : vector<16xf32>
    %65 = vector.multi_reduction <add>, %60, %cst_44 [1] : vector<16x32xf32> to vector<16xf32>
    %66 = vector.shape_cast %65 : vector<16xf32> to vector<16x1xf32>
    %cst_45 = arith.constant 3.200000e+01 : f32
    %67 = vector.broadcast %cst_45 : f32 to vector<16x1xf32>
    %68 = arith.divf %66, %67 : vector<16x1xf32>
    %69 = vector.broadcast %68 : vector<16x1xf32> to vector<16x32xf32>
    %70 = arith.subf %60, %69 : vector<16x32xf32>
    %71 = arith.mulf %70, %70 : vector<16x32xf32>
    %cst_46 = arith.constant dense<0.000000e+00> : vector<16xf32>
    %72 = vector.multi_reduction <add>, %71, %cst_46 [1] : vector<16x32xf32> to vector<16xf32>
    %73 = vector.shape_cast %72 : vector<16xf32> to vector<16x1xf32>
    %cst_47 = arith.constant 3.200000e+01 : f32
    %74 = vector.broadcast %cst_47 : f32 to vector<16x1xf32>
    %75 = arith.divf %73, %74 : vector<16x1xf32>
    %76 = vector.broadcast %68 : vector<16x1xf32> to vector<16x32xf32>
    %77 = arith.subf %60, %76 : vector<16x32xf32>
    %cst_48 = arith.constant 9.99999974E-6 : f32
    %78 = vector.broadcast %cst_48 : f32 to vector<16x1xf32>
    %79 = arith.addf %75, %78 : vector<16x1xf32>
    %80 = math.rsqrt %79 : vector<16x1xf32>
    %81 = vector.broadcast %80 : vector<16x1xf32> to vector<16x32xf32>
    %82 = arith.mulf %77, %81 : vector<16x32xf32>
    %83 = vector.broadcast %62 : vector<1x32xf32> to vector<16x32xf32>
    %84 = arith.mulf %82, %83 : vector<16x32xf32>
    %85 = vector.broadcast %64 : vector<1x32xf32> to vector<16x32xf32>
    %86 = arith.addf %84, %85 : vector<16x32xf32>
    %87 = arith.truncf %86 : vector<16x32xf32> to vector<16x32xbf16>
    %c0_49 = arith.constant 0 : index
    %c0_50 = arith.constant 0 : index
    %c0_51 = arith.constant 0 : index
    %88 = vector.load %arg13[%c0_49, %c0_50, %c0_51] : memref<1x32x128xbf16, #tpu.memory_space<vmem>>, vector<1x32x128xbf16>
    %89 = vector.shape_cast %88 : vector<1x32x128xbf16> to vector<32x128xbf16>
    %cst_52 = arith.constant dense<0.000000e+00> : vector<16x128xf32>
    %90 = tpu.matmul %87, %89, %cst_52 {dimension_numbers = #tpu.dot_dimension_numbers<[1], [0], [0], [1], [0, 0, 1, 1], [], []>} : vector<16x32xbf16>, vector<32x128xbf16>, vector<16x128xf32> -> vector<16x128xf32>
    %c0_53 = arith.constant 0 : index
    %c0_54 = arith.constant 0 : index
    %c0_55 = arith.constant 0 : index
    %91 = vector.load %arg14[%c0_53, %c0_54, %c0_55] : memref<1x1x128xf32, #tpu.memory_space<vmem>>, vector<1x1x128xf32>
    %92 = vector.shape_cast %91 : vector<1x1x128xf32> to vector<1x128xf32>
    %93 = vector.broadcast %92 : vector<1x128xf32> to vector<16x128xf32>
    %94 = arith.addf %90, %93 : vector<16x128xf32>
    %cst_56 = arith.constant 0.000000e+00 : f32
    %95 = vector.broadcast %cst_56 : f32 to vector<16x128xf32>
    %96 = arith.maximumf %94, %95 : vector<16x128xf32>
    %97 = arith.truncf %96 : vector<16x128xf32> to vector<16x128xbf16>
    %c0_57 = arith.constant 0 : index
    %c0_58 = arith.constant 0 : index
    %c0_59 = arith.constant 0 : index
    %98 = vector.load %arg15[%c0_57, %c0_58, %c0_59] : memref<1x128x32xbf16, #tpu.memory_space<vmem>>, vector<1x128x32xbf16>
    %99 = vector.shape_cast %98 : vector<1x128x32xbf16> to vector<128x32xbf16>
    %cst_60 = arith.constant dense<0.000000e+00> : vector<16x32xf32>
    %100 = tpu.matmul %97, %99, %cst_60 {dimension_numbers = #tpu.dot_dimension_numbers<[1], [0], [0], [1], [0, 0, 1, 1], [], []>} : vector<16x128xbf16>, vector<128x32xbf16>, vector<16x32xf32> -> vector<16x32xf32>
    %c0_61 = arith.constant 0 : index
    %c0_62 = arith.constant 0 : index
    %c0_63 = arith.constant 0 : index
    %101 = vector.load %arg16[%c0_61, %c0_62, %c0_63] : memref<1x1x32xf32, #tpu.memory_space<vmem>>, vector<1x1x32xf32>
    %102 = vector.shape_cast %101 : vector<1x1x32xf32> to vector<1x32xf32>
    %103 = vector.broadcast %102 : vector<1x32xf32> to vector<16x32xf32>
    %104 = arith.addf %100, %103 : vector<16x32xf32>
    %105 = arith.addf %86, %104 : vector<16x32xf32>
    %c0_64 = arith.constant 0 : index
    %c0_65 = arith.constant 0 : index
    %c0_66 = arith.constant 0 : index
    %106 = vector.load %arg17[%c0_64, %c0_65, %c0_66] : memref<1x1x32xf32, #tpu.memory_space<vmem>>, vector<1x1x32xf32>
    %107 = vector.shape_cast %106 : vector<1x1x32xf32> to vector<1x32xf32>
    %c0_67 = arith.constant 0 : index
    %c0_68 = arith.constant 0 : index
    %c0_69 = arith.constant 0 : index
    %108 = vector.load %arg18[%c0_67, %c0_68, %c0_69] : memref<1x1x32xf32, #tpu.memory_space<vmem>>, vector<1x1x32xf32>
    %109 = vector.shape_cast %108 : vector<1x1x32xf32> to vector<1x32xf32>
    %cst_70 = arith.constant dense<0.000000e+00> : vector<16xf32>
    %110 = vector.multi_reduction <add>, %105, %cst_70 [1] : vector<16x32xf32> to vector<16xf32>
    %111 = vector.shape_cast %110 : vector<16xf32> to vector<16x1xf32>
    %cst_71 = arith.constant 3.200000e+01 : f32
    %112 = vector.broadcast %cst_71 : f32 to vector<16x1xf32>
    %113 = arith.divf %111, %112 : vector<16x1xf32>
    %114 = vector.broadcast %113 : vector<16x1xf32> to vector<16x32xf32>
    %115 = arith.subf %105, %114 : vector<16x32xf32>
    %116 = arith.mulf %115, %115 : vector<16x32xf32>
    %cst_72 = arith.constant dense<0.000000e+00> : vector<16xf32>
    %117 = vector.multi_reduction <add>, %116, %cst_72 [1] : vector<16x32xf32> to vector<16xf32>
    %118 = vector.shape_cast %117 : vector<16xf32> to vector<16x1xf32>
    %cst_73 = arith.constant 3.200000e+01 : f32
    %119 = vector.broadcast %cst_73 : f32 to vector<16x1xf32>
    %120 = arith.divf %118, %119 : vector<16x1xf32>
    %121 = vector.broadcast %113 : vector<16x1xf32> to vector<16x32xf32>
    %122 = arith.subf %105, %121 : vector<16x32xf32>
    %cst_74 = arith.constant 9.99999974E-6 : f32
    %123 = vector.broadcast %cst_74 : f32 to vector<16x1xf32>
    %124 = arith.addf %120, %123 : vector<16x1xf32>
    %125 = math.rsqrt %124 : vector<16x1xf32>
    %126 = vector.broadcast %125 : vector<16x1xf32> to vector<16x32xf32>
    %127 = arith.mulf %122, %126 : vector<16x32xf32>
    %128 = vector.broadcast %107 : vector<1x32xf32> to vector<16x32xf32>
    %129 = arith.mulf %127, %128 : vector<16x32xf32>
    %130 = vector.broadcast %109 : vector<1x32xf32> to vector<16x32xf32>
    %131 = arith.addf %129, %130 : vector<16x32xf32>
    %132 = vector.shape_cast %131 : vector<16x32xf32> to vector<2x8x32xf32>
    %c0_75 = arith.constant 0 : index
    %c0_76 = arith.constant 0 : index
    %c0_77 = arith.constant 0 : index
    %133 = vector.load %arg20[%c0_75, %c0_76, %c0_77] : memref<2x8x32xf32, #tpu.memory_space<vmem>>, vector<2x8x32xf32>
    tpu.vector_store %arg20[%c0_75, %c0_76, %c0_77], %132 {strides = array<i32>} : memref<2x8x32xf32, #tpu.memory_space<vmem>>, vector<2x8x32xf32>,
    %c1_i32 = arith.constant 1 : i32
    %134 = arith.cmpi eq, %arg0, %c1_i32 : i32
    %135 = arith.extui %134 : i1 to i32
    %c0_i32_78 = arith.constant 0 : i32
    %136 = arith.cmpi ne, %135, %c0_i32_78 : i32
    scf.if %136 {
      %c0_79 = arith.constant 0 : index
      %c0_80 = arith.constant 0 : index
      %c0_81 = arith.constant 0 : index
      %137 = vector.load %arg19[%c0_79, %c0_80, %c0_81] : memref<2x8x32xf32, #tpu.memory_space<vmem>>, vector<2x8x32xf32>
      tpu.vector_store %arg19[%c0_79, %c0_80, %c0_81], %132 {strides = array<i32>} : memref<2x8x32xf32, #tpu.memory_space<vmem>>, vector<2x8x32xf32>,
    } else {
    }
    return
  }
  func.func @transform_0(%arg0: i32) -> (i32, i32, i32) {
    %c0_i32 = arith.constant 0 : i32
    %c0_i32_0 = arith.constant 0 : i32
    %c0_i32_1 = arith.constant 0 : i32
    %c0_i32_2 = arith.constant 0 : i32
    return %c0_i32, %c0_i32_0, %c0_i32_1 : i32, i32, i32
  }
  func.func @transform_1(%arg0: i32) -> (i32, i32, i32) {
    %c0_i32 = arith.constant 0 : i32
    %c0_i32_0 = arith.constant 0 : i32
    %c0_i32_1 = arith.constant 0 : i32
    %c0_i32_2 = arith.constant 0 : i32
    return %c0_i32, %c0_i32_0, %c0_i32_1 : i32, i32, i32
  }
  func.func @transform_2(%arg0: i32) -> (i32, i32, i32) {
    %c0_i32 = arith.constant 0 : i32
    %c0_i32_0 = arith.constant 0 : i32
    %c0_i32_1 = arith.constant 0 : i32
    return %arg0, %c0_i32, %c0_i32_0 : i32, i32, i32
  }
  func.func @transform_3(%arg0: i32) -> (i32, i32, i32) {
    %c0_i32 = arith.constant 0 : i32
    %c0_i32_0 = arith.constant 0 : i32
    %c0_i32_1 = arith.constant 0 : i32
    return %arg0, %c0_i32, %c0_i32_0 : i32, i32, i32
  }
  func.func @transform_4(%arg0: i32) -> (i32, i32, i32) {
    %c0_i32 = arith.constant 0 : i32
    %c0_i32_0 = arith.constant 0 : i32
    %c0_i32_1 = arith.constant 0 : i32
    return %arg0, %c0_i32, %c0_i32_0 : i32, i32, i32
  }
  func.func @transform_5(%arg0: i32) -> (i32, i32, i32) {
    %c0_i32 = arith.constant 0 : i32
    %c0_i32_0 = arith.constant 0 : i32
    %c0_i32_1 = arith.constant 0 : i32
    return %arg0, %c0_i32, %c0_i32_0 : i32, i32, i32
  }
  func.func @transform_6(%arg0: i32) -> (i32, i32, i32) {
    %c0_i32 = arith.constant 0 : i32
    %c0_i32_0 = arith.constant 0 : i32
    %c0_i32_1 = arith.constant 0 : i32
    return %arg0, %c0_i32, %c0_i32_0 : i32, i32, i32
  }
  func.func @transform_7(%arg0: i32) -> (i32, i32, i32) {
    %c0_i32 = arith.constant 0 : i32
    %c0_i32_0 = arith.constant 0 : i32
    %c0_i32_1 = arith.constant 0 : i32
    return %arg0, %c0_i32, %c0_i32_0 : i32, i32, i32
  }
  func.func @transform_8(%arg0: i32) -> (i32, i32, i32) {
    %c0_i32 = arith.constant 0 : i32
    %c0_i32_0 = arith.constant 0 : i32
    %c0_i32_1 = arith.constant 0 : i32
    return %arg0, %c0_i32, %c0_i32_0 : i32, i32, i32
  }
  func.func @transform_9(%arg0: i32) -> (i32, i32, i32) {
    %c0_i32 = arith.constant 0 : i32
    %c0_i32_0 = arith.constant 0 : i32
    %c0_i32_1 = arith.constant 0 : i32
    return %arg0, %c0_i32, %c0_i32_0 : i32, i32, i32
  }
  func.func @transform_10(%arg0: i32) -> (i32, i32, i32) {
    %c0_i32 = arith.constant 0 : i32
    %c0_i32_0 = arith.constant 0 : i32
    %c0_i32_1 = arith.constant 0 : i32
    return %arg0, %c0_i32, %c0_i32_0 : i32, i32, i32
  }
  func.func @transform_11(%arg0: i32) -> (i32, i32, i32) {
    %c0_i32 = arith.constant 0 : i32
    %c0_i32_0 = arith.constant 0 : i32
    %c0_i32_1 = arith.constant 0 : i32
    return %arg0, %c0_i32, %c0_i32_0 : i32, i32, i32
  }
  func.func @transform_12(%arg0: i32) -> (i32, i32, i32) {
    %c0_i32 = arith.constant 0 : i32
    %c0_i32_0 = arith.constant 0 : i32
    %c0_i32_1 = arith.constant 0 : i32
    return %arg0, %c0_i32, %c0_i32_0 : i32, i32, i32
  }
  func.func @transform_13(%arg0: i32) -> (i32, i32, i32) {
    %c0_i32 = arith.constant 0 : i32
    %c0_i32_0 = arith.constant 0 : i32
    %c0_i32_1 = arith.constant 0 : i32
    return %arg0, %c0_i32, %c0_i32_0 : i32, i32, i32
  }
  func.func @transform_14(%arg0: i32) -> (i32, i32, i32) {
    %c0_i32 = arith.constant 0 : i32
    %c0_i32_0 = arith.constant 0 : i32
    %c0_i32_1 = arith.constant 0 : i32
    return %arg0, %c0_i32, %c0_i32_0 : i32, i32, i32
  }
  func.func @transform_15(%arg0: i32) -> (i32, i32, i32) {
    %c0_i32 = arith.constant 0 : i32
    %c0_i32_0 = arith.constant 0 : i32
    %c0_i32_1 = arith.constant 0 : i32
    return %arg0, %c0_i32, %c0_i32_0 : i32, i32, i32
  }
  func.func @transform_16(%arg0: i32) -> (i32, i32, i32) {
    %c0_i32 = arith.constant 0 : i32
    %c0_i32_0 = arith.constant 0 : i32
    %c0_i32_1 = arith.constant 0 : i32
    return %arg0, %c0_i32, %c0_i32_0 : i32, i32, i32
  }
  func.func @transform_17(%arg0: i32) -> (i32, i32, i32) {
    %c0_i32 = arith.constant 0 : i32
    %c0_i32_0 = arith.constant 0 : i32
    %c0_i32_1 = arith.constant 0 : i32
    return %arg0, %c0_i32, %c0_i32_0 : i32, i32, i32
  }
  func.func @transform_18(%arg0: i32) -> (i32, i32, i32) {
    %c0_i32 = arith.constant 0 : i32
    %c0_i32_0 = arith.constant 0 : i32
    %c0_i32_1 = arith.constant 0 : i32
    %c0_i32_2 = arith.constant 0 : i32
    return %c0_i32, %c0_i32_0, %c0_i32_1 : i32, i32, i32
  }
}

module attributes {stable_mosaic.version = 11 : i64} {
  func.func @residual_lstm_head_kernel(%arg0: i32, %arg1: memref<1x8x32xf32, #tpu.memory_space<vmem>>, %arg2: memref<32x16xbf16, #tpu.memory_space<vmem>>, %arg3: memref<1x16xf32, #tpu.memory_space<vmem>>, %arg4: memref<16x64xbf16, #tpu.memory_space<vmem>>, %arg5: memref<16x64xbf16, #tpu.memory_space<vmem>>, %arg6: memref<1x64xf32, #tpu.memory_space<vmem>>, %arg7: memref<32x64xbf16, #tpu.memory_space<vmem>>, %arg8: memref<1x64xf32, #tpu.memory_space<vmem>>, %arg9: memref<1x16xf32, #tpu.memory_space<vmem>>, %arg10: memref<1x16xf32, #tpu.memory_space<vmem>>, %arg11: memref<16x128xbf16, #tpu.memory_space<vmem>>, %arg12: memref<1x128xf32, #tpu.memory_space<vmem>>, %arg13: memref<128x32xbf16, #tpu.memory_space<vmem>>, %arg14: memref<1x32xf32, #tpu.memory_space<vmem>>, %arg15: memref<1x32xf32, #tpu.memory_space<vmem>>, %arg16: memref<1x32xf32, #tpu.memory_space<vmem>>, %arg17: memref<32x128xbf16, #tpu.memory_space<vmem>>, %arg18: memref<1x128xf32, #tpu.memory_space<vmem>>, %arg19: memref<1x8x128xf32, #tpu.memory_space<vmem>>, %arg20: memref<8x16xf32, #tpu.memory_space<vmem>>) attributes {dimension_semantics = [#tpu.dimension_semantics<parallel>], iteration_bounds = array<i64: 2>, scalar_prefetch = 0 : i64, scratch_operands = 1 : i64, tpu.core_type = #tpu.core_type<tc>, window_params = [{transform_indices = @transform_0, window_bounds = array<i64: 1, 8, 32>}, {pipeline_mode = #tpu.pipeline_mode<synchronous>, transform_indices = @transform_1, window_bounds = array<i64: 32, 16>}, {pipeline_mode = #tpu.pipeline_mode<synchronous>, transform_indices = @transform_2, window_bounds = array<i64: 1, 16>}, {pipeline_mode = #tpu.pipeline_mode<synchronous>, transform_indices = @transform_3, window_bounds = array<i64: 16, 64>}, {pipeline_mode = #tpu.pipeline_mode<synchronous>, transform_indices = @transform_4, window_bounds = array<i64: 16, 64>}, {pipeline_mode = #tpu.pipeline_mode<synchronous>, transform_indices = @transform_5, window_bounds = array<i64: 1, 64>}, {pipeline_mode = #tpu.pipeline_mode<synchronous>, transform_indices = @transform_6, window_bounds = array<i64: 32, 64>}, {pipeline_mode = #tpu.pipeline_mode<synchronous>, transform_indices = @transform_7, window_bounds = array<i64: 1, 64>}, {pipeline_mode = #tpu.pipeline_mode<synchronous>, transform_indices = @transform_8, window_bounds = array<i64: 1, 16>}, {pipeline_mode = #tpu.pipeline_mode<synchronous>, transform_indices = @transform_9, window_bounds = array<i64: 1, 16>}, {pipeline_mode = #tpu.pipeline_mode<synchronous>, transform_indices = @transform_10, window_bounds = array<i64: 16, 128>}, {pipeline_mode = #tpu.pipeline_mode<synchronous>, transform_indices = @transform_11, window_bounds = array<i64: 1, 128>}, {pipeline_mode = #tpu.pipeline_mode<synchronous>, transform_indices = @transform_12, window_bounds = array<i64: 128, 32>}, {pipeline_mode = #tpu.pipeline_mode<synchronous>, transform_indices = @transform_13, window_bounds = array<i64: 1, 32>}, {pipeline_mode = #tpu.pipeline_mode<synchronous>, transform_indices = @transform_14, window_bounds = array<i64: 1, 32>}, {pipeline_mode = #tpu.pipeline_mode<synchronous>, transform_indices = @transform_15, window_bounds = array<i64: 1, 32>}, {pipeline_mode = #tpu.pipeline_mode<synchronous>, transform_indices = @transform_16, window_bounds = array<i64: 32, 128>}, {pipeline_mode = #tpu.pipeline_mode<synchronous>, transform_indices = @transform_17, window_bounds = array<i64: 1, 128>}, {transform_indices = @transform_18, window_bounds = array<i64: 1, 8, 128>}]} {
    %c0 = arith.constant 0 : index
    %c0_0 = arith.constant 0 : index
    %c0_1 = arith.constant 0 : index
    %0 = vector.load %arg1[%c0, %c0_0, %c0_1] : memref<1x8x32xf32, #tpu.memory_space<vmem>>, vector<1x8x32xf32>
    %1 = vector.shape_cast %0 : vector<1x8x32xf32> to vector<8x32xf32>
    %2 = arith.truncf %1 : vector<8x32xf32> to vector<8x32xbf16>
    %c0_2 = arith.constant 0 : index
    %c0_3 = arith.constant 0 : index
    %3 = vector.load %arg2[%c0_2, %c0_3] : memref<32x16xbf16, #tpu.memory_space<vmem>>, vector<32x16xbf16>
    %cst = arith.constant dense<0.000000e+00> : vector<8x16xf32>
    %4 = tpu.matmul %2, %3, %cst {dimension_numbers = #tpu.dot_dimension_numbers<[1], [0], [0], [1], [0, 0, 1, 1], [], []>} : vector<8x32xbf16>, vector<32x16xbf16>, vector<8x16xf32> -> vector<8x16xf32>
    %c0_4 = arith.constant 0 : index
    %c0_5 = arith.constant 0 : index
    %5 = vector.load %arg3[%c0_4, %c0_5] : memref<1x16xf32, #tpu.memory_space<vmem>>, vector<1x16xf32>
    %6 = vector.broadcast %5 : vector<1x16xf32> to vector<8x16xf32>
    %7 = arith.addf %4, %6 : vector<8x16xf32>
    %8 = arith.truncf %7 : vector<8x16xf32> to vector<8x16xbf16>
    %c0_6 = arith.constant 0 : index
    %c0_7 = arith.constant 0 : index
    %9 = vector.load %arg4[%c0_6, %c0_7] : memref<16x64xbf16, #tpu.memory_space<vmem>>, vector<16x64xbf16>
    %cst_8 = arith.constant dense<0.000000e+00> : vector<8x64xf32>
    %10 = tpu.matmul %8, %9, %cst_8 {dimension_numbers = #tpu.dot_dimension_numbers<[1], [0], [0], [1], [0, 0, 1, 1], [], []>} : vector<8x16xbf16>, vector<16x64xbf16>, vector<8x64xf32> -> vector<8x64xf32>
    %c0_9 = arith.constant 0 : index
    %c0_10 = arith.constant 0 : index
    %11 = vector.load %arg6[%c0_9, %c0_10] : memref<1x64xf32, #tpu.memory_space<vmem>>, vector<1x64xf32>
    %12 = vector.broadcast %11 : vector<1x64xf32> to vector<8x64xf32>
    %13 = arith.addf %10, %12 : vector<8x64xf32>
    %cst_11 = arith.constant 0.000000e+00 : f32
    %14 = vector.broadcast %cst_11 : f32 to vector<1x16xf32>
    %cst_12 = arith.constant 0.000000e+00 : f32
    %15 = vector.broadcast %cst_12 : f32 to vector<1x16xf32>
    %cst_13 = arith.constant 0.000000e+00 : f32
    %16 = vector.broadcast %cst_13 : f32 to vector<1x16xf32>
    %cst_14 = arith.constant 0.000000e+00 : f32
    %17 = vector.broadcast %cst_14 : f32 to vector<1x16xf32>
    %18 = vector.extract_strided_slice %13 {offsets = [0, 0], sizes = [1, 64], strides = [1, 1]} : vector<8x64xf32> to vector<1x64xf32>
    %19 = arith.truncf %14 : vector<1x16xf32> to vector<1x16xbf16>
    %c0_15 = arith.constant 0 : index
    %c0_16 = arith.constant 0 : index
    %20 = vector.load %arg5[%c0_15, %c0_16] : memref<16x64xbf16, #tpu.memory_space<vmem>>, vector<16x64xbf16>
    %cst_17 = arith.constant dense<0.000000e+00> : vector<1x64xf32>
    %21 = tpu.matmul %19, %20, %cst_17 {dimension_numbers = #tpu.dot_dimension_numbers<[1], [0], [0], [1], [0, 0, 1, 1], [], []>} : vector<1x16xbf16>, vector<16x64xbf16>, vector<1x64xf32> -> vector<1x64xf32>
    %22 = arith.addf %18, %21 : vector<1x64xf32>
    %23 = vector.extract_strided_slice %22 {offsets = [0, 0], sizes = [1, 16], strides = [1, 1]} : vector<1x64xf32> to vector<1x16xf32>
    %24 = arith.negf %23 : vector<1x16xf32>
    %25 = math.exp %24 : vector<1x16xf32>
    %cst_18 = arith.constant 1.000000e+00 : f32
    %26 = vector.broadcast %cst_18 : f32 to vector<1x16xf32>
    %27 = arith.addf %26, %25 : vector<1x16xf32>
    %28 = arith.divf %26, %27 : vector<1x16xf32>
    %29 = vector.extract_strided_slice %22 {offsets = [0, 16], sizes = [1, 16], strides = [1, 1]} : vector<1x64xf32> to vector<1x16xf32>
    %30 = arith.negf %29 : vector<1x16xf32>
    %31 = math.exp %30 : vector<1x16xf32>
    %cst_19 = arith.constant 1.000000e+00 : f32
    %32 = vector.broadcast %cst_19 : f32 to vector<1x16xf32>
    %33 = arith.addf %32, %31 : vector<1x16xf32>
    %34 = arith.divf %32, %33 : vector<1x16xf32>
    %35 = vector.extract_strided_slice %22 {offsets = [0, 32], sizes = [1, 16], strides = [1, 1]} : vector<1x64xf32> to vector<1x16xf32>
    %36 = math.tanh %35 : vector<1x16xf32>
    %37 = vector.extract_strided_slice %22 {offsets = [0, 48], sizes = [1, 16], strides = [1, 1]} : vector<1x64xf32> to vector<1x16xf32>
    %38 = arith.negf %37 : vector<1x16xf32>
    %39 = math.exp %38 : vector<1x16xf32>
    %cst_20 = arith.constant 1.000000e+00 : f32
    %40 = vector.broadcast %cst_20 : f32 to vector<1x16xf32>
    %41 = arith.addf %40, %39 : vector<1x16xf32>
    %42 = arith.divf %40, %41 : vector<1x16xf32>
    %43 = arith.mulf %34, %15 : vector<1x16xf32>
    %44 = arith.mulf %28, %36 : vector<1x16xf32>
    %45 = arith.addf %43, %44 : vector<1x16xf32>
    %46 = math.tanh %45 : vector<1x16xf32>
    %47 = arith.mulf %42, %46 : vector<1x16xf32>
    %48 = tpu.concatenate %47, %16 in 1 : vector<1x16xf32>, vector<1x16xf32> -> vector<1x32xf32>
    %49 = arith.truncf %48 : vector<1x32xf32> to vector<1x32xbf16>
    %c0_21 = arith.constant 0 : index
    %c0_22 = arith.constant 0 : index
    %50 = vector.load %arg7[%c0_21, %c0_22] : memref<32x64xbf16, #tpu.memory_space<vmem>>, vector<32x64xbf16>
    %cst_23 = arith.constant dense<0.000000e+00> : vector<1x64xf32>
    %51 = tpu.matmul %49, %50, %cst_23 {dimension_numbers = #tpu.dot_dimension_numbers<[1], [0], [0], [1], [0, 0, 1, 1], [], []>} : vector<1x32xbf16>, vector<32x64xbf16>, vector<1x64xf32> -> vector<1x64xf32>
    %c0_24 = arith.constant 0 : index
    %c0_25 = arith.constant 0 : index
    %52 = vector.load %arg8[%c0_24, %c0_25] : memref<1x64xf32, #tpu.memory_space<vmem>>, vector<1x64xf32>
    %53 = arith.addf %51, %52 : vector<1x64xf32>
    %54 = vector.extract_strided_slice %53 {offsets = [0, 0], sizes = [1, 16], strides = [1, 1]} : vector<1x64xf32> to vector<1x16xf32>
    %55 = arith.negf %54 : vector<1x16xf32>
    %56 = math.exp %55 : vector<1x16xf32>
    %cst_26 = arith.constant 1.000000e+00 : f32
    %57 = vector.broadcast %cst_26 : f32 to vector<1x16xf32>
    %58 = arith.addf %57, %56 : vector<1x16xf32>
    %59 = arith.divf %57, %58 : vector<1x16xf32>
    %60 = vector.extract_strided_slice %53 {offsets = [0, 16], sizes = [1, 16], strides = [1, 1]} : vector<1x64xf32> to vector<1x16xf32>
    %61 = arith.negf %60 : vector<1x16xf32>
    %62 = math.exp %61 : vector<1x16xf32>
    %cst_27 = arith.constant 1.000000e+00 : f32
    %63 = vector.broadcast %cst_27 : f32 to vector<1x16xf32>
    %64 = arith.addf %63, %62 : vector<1x16xf32>
    %65 = arith.divf %63, %64 : vector<1x16xf32>
    %66 = vector.extract_strided_slice %53 {offsets = [0, 32], sizes = [1, 16], strides = [1, 1]} : vector<1x64xf32> to vector<1x16xf32>
    %67 = math.tanh %66 : vector<1x16xf32>
    %68 = vector.extract_strided_slice %53 {offsets = [0, 48], sizes = [1, 16], strides = [1, 1]} : vector<1x64xf32> to vector<1x16xf32>
    %69 = arith.negf %68 : vector<1x16xf32>
    %70 = math.exp %69 : vector<1x16xf32>
    %cst_28 = arith.constant 1.000000e+00 : f32
    %71 = vector.broadcast %cst_28 : f32 to vector<1x16xf32>
    %72 = arith.addf %71, %70 : vector<1x16xf32>
    %73 = arith.divf %71, %72 : vector<1x16xf32>
    %74 = arith.mulf %65, %17 : vector<1x16xf32>
    %75 = arith.mulf %59, %67 : vector<1x16xf32>
    %76 = arith.addf %74, %75 : vector<1x16xf32>
    %77 = math.tanh %76 : vector<1x16xf32>
    %78 = arith.mulf %73, %77 : vector<1x16xf32>
    %c0_29 = arith.constant 0 : index
    %c0_30 = arith.constant 0 : index
    %79 = vector.load %arg20[%c0_29, %c0_30] : memref<8x16xf32, #tpu.memory_space<vmem>>, vector<1x16xf32>
    tpu.vector_store %arg20[%c0_29, %c0_30], %78 {strides = array<i32>} : memref<8x16xf32, #tpu.memory_space<vmem>>, vector<1x16xf32>,
    %80 = vector.extract_strided_slice %13 {offsets = [1, 0], sizes = [1, 64], strides = [1, 1]} : vector<8x64xf32> to vector<1x64xf32>
    %81 = arith.truncf %47 : vector<1x16xf32> to vector<1x16xbf16>
    %c0_31 = arith.constant 0 : index
    %c0_32 = arith.constant 0 : index
    %82 = vector.load %arg5[%c0_31, %c0_32] : memref<16x64xbf16, #tpu.memory_space<vmem>>, vector<16x64xbf16>
    %cst_33 = arith.constant dense<0.000000e+00> : vector<1x64xf32>
    %83 = tpu.matmul %81, %82, %cst_33 {dimension_numbers = #tpu.dot_dimension_numbers<[1], [0], [0], [1], [0, 0, 1, 1], [], []>} : vector<1x16xbf16>, vector<16x64xbf16>, vector<1x64xf32> -> vector<1x64xf32>
    %84 = arith.addf %80, %83 : vector<1x64xf32>
    %85 = vector.extract_strided_slice %84 {offsets = [0, 0], sizes = [1, 16], strides = [1, 1]} : vector<1x64xf32> to vector<1x16xf32>
    %86 = arith.negf %85 : vector<1x16xf32>
    %87 = math.exp %86 : vector<1x16xf32>
    %cst_34 = arith.constant 1.000000e+00 : f32
    %88 = vector.broadcast %cst_34 : f32 to vector<1x16xf32>
    %89 = arith.addf %88, %87 : vector<1x16xf32>
    %90 = arith.divf %88, %89 : vector<1x16xf32>
    %91 = vector.extract_strided_slice %84 {offsets = [0, 16], sizes = [1, 16], strides = [1, 1]} : vector<1x64xf32> to vector<1x16xf32>
    %92 = arith.negf %91 : vector<1x16xf32>
    %93 = math.exp %92 : vector<1x16xf32>
    %cst_35 = arith.constant 1.000000e+00 : f32
    %94 = vector.broadcast %cst_35 : f32 to vector<1x16xf32>
    %95 = arith.addf %94, %93 : vector<1x16xf32>
    %96 = arith.divf %94, %95 : vector<1x16xf32>
    %97 = vector.extract_strided_slice %84 {offsets = [0, 32], sizes = [1, 16], strides = [1, 1]} : vector<1x64xf32> to vector<1x16xf32>
    %98 = math.tanh %97 : vector<1x16xf32>
    %99 = vector.extract_strided_slice %84 {offsets = [0, 48], sizes = [1, 16], strides = [1, 1]} : vector<1x64xf32> to vector<1x16xf32>
    %100 = arith.negf %99 : vector<1x16xf32>
    %101 = math.exp %100 : vector<1x16xf32>
    %cst_36 = arith.constant 1.000000e+00 : f32
    %102 = vector.broadcast %cst_36 : f32 to vector<1x16xf32>
    %103 = arith.addf %102, %101 : vector<1x16xf32>
    %104 = arith.divf %102, %103 : vector<1x16xf32>
    %105 = arith.mulf %96, %45 : vector<1x16xf32>
    %106 = arith.mulf %90, %98 : vector<1x16xf32>
    %107 = arith.addf %105, %106 : vector<1x16xf32>
    %108 = math.tanh %107 : vector<1x16xf32>
    %109 = arith.mulf %104, %108 : vector<1x16xf32>
    %110 = tpu.concatenate %109, %78 in 1 : vector<1x16xf32>, vector<1x16xf32> -> vector<1x32xf32>
    %111 = arith.truncf %110 : vector<1x32xf32> to vector<1x32xbf16>
    %c0_37 = arith.constant 0 : index
    %c0_38 = arith.constant 0 : index
    %112 = vector.load %arg7[%c0_37, %c0_38] : memref<32x64xbf16, #tpu.memory_space<vmem>>, vector<32x64xbf16>
    %cst_39 = arith.constant dense<0.000000e+00> : vector<1x64xf32>
    %113 = tpu.matmul %111, %112, %cst_39 {dimension_numbers = #tpu.dot_dimension_numbers<[1], [0], [0], [1], [0, 0, 1, 1], [], []>} : vector<1x32xbf16>, vector<32x64xbf16>, vector<1x64xf32> -> vector<1x64xf32>
    %c0_40 = arith.constant 0 : index
    %c0_41 = arith.constant 0 : index
    %114 = vector.load %arg8[%c0_40, %c0_41] : memref<1x64xf32, #tpu.memory_space<vmem>>, vector<1x64xf32>
    %115 = arith.addf %113, %114 : vector<1x64xf32>
    %116 = vector.extract_strided_slice %115 {offsets = [0, 0], sizes = [1, 16], strides = [1, 1]} : vector<1x64xf32> to vector<1x16xf32>
    %117 = arith.negf %116 : vector<1x16xf32>
    %118 = math.exp %117 : vector<1x16xf32>
    %cst_42 = arith.constant 1.000000e+00 : f32
    %119 = vector.broadcast %cst_42 : f32 to vector<1x16xf32>
    %120 = arith.addf %119, %118 : vector<1x16xf32>
    %121 = arith.divf %119, %120 : vector<1x16xf32>
    %122 = vector.extract_strided_slice %115 {offsets = [0, 16], sizes = [1, 16], strides = [1, 1]} : vector<1x64xf32> to vector<1x16xf32>
    %123 = arith.negf %122 : vector<1x16xf32>
    %124 = math.exp %123 : vector<1x16xf32>
    %cst_43 = arith.constant 1.000000e+00 : f32
    %125 = vector.broadcast %cst_43 : f32 to vector<1x16xf32>
    %126 = arith.addf %125, %124 : vector<1x16xf32>
    %127 = arith.divf %125, %126 : vector<1x16xf32>
    %128 = vector.extract_strided_slice %115 {offsets = [0, 32], sizes = [1, 16], strides = [1, 1]} : vector<1x64xf32> to vector<1x16xf32>
    %129 = math.tanh %128 : vector<1x16xf32>
    %130 = vector.extract_strided_slice %115 {offsets = [0, 48], sizes = [1, 16], strides = [1, 1]} : vector<1x64xf32> to vector<1x16xf32>
    %131 = arith.negf %130 : vector<1x16xf32>
    %132 = math.exp %131 : vector<1x16xf32>
    %cst_44 = arith.constant 1.000000e+00 : f32
    %133 = vector.broadcast %cst_44 : f32 to vector<1x16xf32>
    %134 = arith.addf %133, %132 : vector<1x16xf32>
    %135 = arith.divf %133, %134 : vector<1x16xf32>
    %136 = arith.mulf %127, %76 : vector<1x16xf32>
    %137 = arith.mulf %121, %129 : vector<1x16xf32>
    %138 = arith.addf %136, %137 : vector<1x16xf32>
    %139 = math.tanh %138 : vector<1x16xf32>
    %140 = arith.mulf %135, %139 : vector<1x16xf32>
    %c1 = arith.constant 1 : index
    %c0_45 = arith.constant 0 : index
    %141 = vector.load %arg20[%c1, %c0_45] : memref<8x16xf32, #tpu.memory_space<vmem>>, vector<1x16xf32>
    tpu.vector_store %arg20[%c1, %c0_45], %140 {strides = array<i32>} : memref<8x16xf32, #tpu.memory_space<vmem>>, vector<1x16xf32>,
    %142 = vector.extract_strided_slice %13 {offsets = [2, 0], sizes = [1, 64], strides = [1, 1]} : vector<8x64xf32> to vector<1x64xf32>
    %143 = arith.truncf %109 : vector<1x16xf32> to vector<1x16xbf16>
    %c0_46 = arith.constant 0 : index
    %c0_47 = arith.constant 0 : index
    %144 = vector.load %arg5[%c0_46, %c0_47] : memref<16x64xbf16, #tpu.memory_space<vmem>>, vector<16x64xbf16>
    %cst_48 = arith.constant dense<0.000000e+00> : vector<1x64xf32>
    %145 = tpu.matmul %143, %144, %cst_48 {dimension_numbers = #tpu.dot_dimension_numbers<[1], [0], [0], [1], [0, 0, 1, 1], [], []>} : vector<1x16xbf16>, vector<16x64xbf16>, vector<1x64xf32> -> vector<1x64xf32>
    %146 = arith.addf %142, %145 : vector<1x64xf32>
    %147 = vector.extract_strided_slice %146 {offsets = [0, 0], sizes = [1, 16], strides = [1, 1]} : vector<1x64xf32> to vector<1x16xf32>
    %148 = arith.negf %147 : vector<1x16xf32>
    %149 = math.exp %148 : vector<1x16xf32>
    %cst_49 = arith.constant 1.000000e+00 : f32
    %150 = vector.broadcast %cst_49 : f32 to vector<1x16xf32>
    %151 = arith.addf %150, %149 : vector<1x16xf32>
    %152 = arith.divf %150, %151 : vector<1x16xf32>
    %153 = vector.extract_strided_slice %146 {offsets = [0, 16], sizes = [1, 16], strides = [1, 1]} : vector<1x64xf32> to vector<1x16xf32>
    %154 = arith.negf %153 : vector<1x16xf32>
    %155 = math.exp %154 : vector<1x16xf32>
    %cst_50 = arith.constant 1.000000e+00 : f32
    %156 = vector.broadcast %cst_50 : f32 to vector<1x16xf32>
    %157 = arith.addf %156, %155 : vector<1x16xf32>
    %158 = arith.divf %156, %157 : vector<1x16xf32>
    %159 = vector.extract_strided_slice %146 {offsets = [0, 32], sizes = [1, 16], strides = [1, 1]} : vector<1x64xf32> to vector<1x16xf32>
    %160 = math.tanh %159 : vector<1x16xf32>
    %161 = vector.extract_strided_slice %146 {offsets = [0, 48], sizes = [1, 16], strides = [1, 1]} : vector<1x64xf32> to vector<1x16xf32>
    %162 = arith.negf %161 : vector<1x16xf32>
    %163 = math.exp %162 : vector<1x16xf32>
    %cst_51 = arith.constant 1.000000e+00 : f32
    %164 = vector.broadcast %cst_51 : f32 to vector<1x16xf32>
    %165 = arith.addf %164, %163 : vector<1x16xf32>
    %166 = arith.divf %164, %165 : vector<1x16xf32>
    %167 = arith.mulf %158, %107 : vector<1x16xf32>
    %168 = arith.mulf %152, %160 : vector<1x16xf32>
    %169 = arith.addf %167, %168 : vector<1x16xf32>
    %170 = math.tanh %169 : vector<1x16xf32>
    %171 = arith.mulf %166, %170 : vector<1x16xf32>
    %172 = tpu.concatenate %171, %140 in 1 : vector<1x16xf32>, vector<1x16xf32> -> vector<1x32xf32>
    %173 = arith.truncf %172 : vector<1x32xf32> to vector<1x32xbf16>
    %c0_52 = arith.constant 0 : index
    %c0_53 = arith.constant 0 : index
    %174 = vector.load %arg7[%c0_52, %c0_53] : memref<32x64xbf16, #tpu.memory_space<vmem>>, vector<32x64xbf16>
    %cst_54 = arith.constant dense<0.000000e+00> : vector<1x64xf32>
    %175 = tpu.matmul %173, %174, %cst_54 {dimension_numbers = #tpu.dot_dimension_numbers<[1], [0], [0], [1], [0, 0, 1, 1], [], []>} : vector<1x32xbf16>, vector<32x64xbf16>, vector<1x64xf32> -> vector<1x64xf32>
    %c0_55 = arith.constant 0 : index
    %c0_56 = arith.constant 0 : index
    %176 = vector.load %arg8[%c0_55, %c0_56] : memref<1x64xf32, #tpu.memory_space<vmem>>, vector<1x64xf32>
    %177 = arith.addf %175, %176 : vector<1x64xf32>
    %178 = vector.extract_strided_slice %177 {offsets = [0, 0], sizes = [1, 16], strides = [1, 1]} : vector<1x64xf32> to vector<1x16xf32>
    %179 = arith.negf %178 : vector<1x16xf32>
    %180 = math.exp %179 : vector<1x16xf32>
    %cst_57 = arith.constant 1.000000e+00 : f32
    %181 = vector.broadcast %cst_57 : f32 to vector<1x16xf32>
    %182 = arith.addf %181, %180 : vector<1x16xf32>
    %183 = arith.divf %181, %182 : vector<1x16xf32>
    %184 = vector.extract_strided_slice %177 {offsets = [0, 16], sizes = [1, 16], strides = [1, 1]} : vector<1x64xf32> to vector<1x16xf32>
    %185 = arith.negf %184 : vector<1x16xf32>
    %186 = math.exp %185 : vector<1x16xf32>
    %cst_58 = arith.constant 1.000000e+00 : f32
    %187 = vector.broadcast %cst_58 : f32 to vector<1x16xf32>
    %188 = arith.addf %187, %186 : vector<1x16xf32>
    %189 = arith.divf %187, %188 : vector<1x16xf32>
    %190 = vector.extract_strided_slice %177 {offsets = [0, 32], sizes = [1, 16], strides = [1, 1]} : vector<1x64xf32> to vector<1x16xf32>
    %191 = math.tanh %190 : vector<1x16xf32>
    %192 = vector.extract_strided_slice %177 {offsets = [0, 48], sizes = [1, 16], strides = [1, 1]} : vector<1x64xf32> to vector<1x16xf32>
    %193 = arith.negf %192 : vector<1x16xf32>
    %194 = math.exp %193 : vector<1x16xf32>
    %cst_59 = arith.constant 1.000000e+00 : f32
    %195 = vector.broadcast %cst_59 : f32 to vector<1x16xf32>
    %196 = arith.addf %195, %194 : vector<1x16xf32>
    %197 = arith.divf %195, %196 : vector<1x16xf32>
    %198 = arith.mulf %189, %138 : vector<1x16xf32>
    %199 = arith.mulf %183, %191 : vector<1x16xf32>
    %200 = arith.addf %198, %199 : vector<1x16xf32>
    %201 = math.tanh %200 : vector<1x16xf32>
    %202 = arith.mulf %197, %201 : vector<1x16xf32>
    %c2 = arith.constant 2 : index
    %c0_60 = arith.constant 0 : index
    %203 = vector.load %arg20[%c2, %c0_60] : memref<8x16xf32, #tpu.memory_space<vmem>>, vector<1x16xf32>
    tpu.vector_store %arg20[%c2, %c0_60], %202 {strides = array<i32>} : memref<8x16xf32, #tpu.memory_space<vmem>>, vector<1x16xf32>,
    %204 = vector.extract_strided_slice %13 {offsets = [3, 0], sizes = [1, 64], strides = [1, 1]} : vector<8x64xf32> to vector<1x64xf32>
    %205 = arith.truncf %171 : vector<1x16xf32> to vector<1x16xbf16>
    %c0_61 = arith.constant 0 : index
    %c0_62 = arith.constant 0 : index
    %206 = vector.load %arg5[%c0_61, %c0_62] : memref<16x64xbf16, #tpu.memory_space<vmem>>, vector<16x64xbf16>
    %cst_63 = arith.constant dense<0.000000e+00> : vector<1x64xf32>
    %207 = tpu.matmul %205, %206, %cst_63 {dimension_numbers = #tpu.dot_dimension_numbers<[1], [0], [0], [1], [0, 0, 1, 1], [], []>} : vector<1x16xbf16>, vector<16x64xbf16>, vector<1x64xf32> -> vector<1x64xf32>
    %208 = arith.addf %204, %207 : vector<1x64xf32>
    %209 = vector.extract_strided_slice %208 {offsets = [0, 0], sizes = [1, 16], strides = [1, 1]} : vector<1x64xf32> to vector<1x16xf32>
    %210 = arith.negf %209 : vector<1x16xf32>
    %211 = math.exp %210 : vector<1x16xf32>
    %cst_64 = arith.constant 1.000000e+00 : f32
    %212 = vector.broadcast %cst_64 : f32 to vector<1x16xf32>
    %213 = arith.addf %212, %211 : vector<1x16xf32>
    %214 = arith.divf %212, %213 : vector<1x16xf32>
    %215 = vector.extract_strided_slice %208 {offsets = [0, 16], sizes = [1, 16], strides = [1, 1]} : vector<1x64xf32> to vector<1x16xf32>
    %216 = arith.negf %215 : vector<1x16xf32>
    %217 = math.exp %216 : vector<1x16xf32>
    %cst_65 = arith.constant 1.000000e+00 : f32
    %218 = vector.broadcast %cst_65 : f32 to vector<1x16xf32>
    %219 = arith.addf %218, %217 : vector<1x16xf32>
    %220 = arith.divf %218, %219 : vector<1x16xf32>
    %221 = vector.extract_strided_slice %208 {offsets = [0, 32], sizes = [1, 16], strides = [1, 1]} : vector<1x64xf32> to vector<1x16xf32>
    %222 = math.tanh %221 : vector<1x16xf32>
    %223 = vector.extract_strided_slice %208 {offsets = [0, 48], sizes = [1, 16], strides = [1, 1]} : vector<1x64xf32> to vector<1x16xf32>
    %224 = arith.negf %223 : vector<1x16xf32>
    %225 = math.exp %224 : vector<1x16xf32>
    %cst_66 = arith.constant 1.000000e+00 : f32
    %226 = vector.broadcast %cst_66 : f32 to vector<1x16xf32>
    %227 = arith.addf %226, %225 : vector<1x16xf32>
    %228 = arith.divf %226, %227 : vector<1x16xf32>
    %229 = arith.mulf %220, %169 : vector<1x16xf32>
    %230 = arith.mulf %214, %222 : vector<1x16xf32>
    %231 = arith.addf %229, %230 : vector<1x16xf32>
    %232 = math.tanh %231 : vector<1x16xf32>
    %233 = arith.mulf %228, %232 : vector<1x16xf32>
    %234 = tpu.concatenate %233, %202 in 1 : vector<1x16xf32>, vector<1x16xf32> -> vector<1x32xf32>
    %235 = arith.truncf %234 : vector<1x32xf32> to vector<1x32xbf16>
    %c0_67 = arith.constant 0 : index
    %c0_68 = arith.constant 0 : index
    %236 = vector.load %arg7[%c0_67, %c0_68] : memref<32x64xbf16, #tpu.memory_space<vmem>>, vector<32x64xbf16>
    %cst_69 = arith.constant dense<0.000000e+00> : vector<1x64xf32>
    %237 = tpu.matmul %235, %236, %cst_69 {dimension_numbers = #tpu.dot_dimension_numbers<[1], [0], [0], [1], [0, 0, 1, 1], [], []>} : vector<1x32xbf16>, vector<32x64xbf16>, vector<1x64xf32> -> vector<1x64xf32>
    %c0_70 = arith.constant 0 : index
    %c0_71 = arith.constant 0 : index
    %238 = vector.load %arg8[%c0_70, %c0_71] : memref<1x64xf32, #tpu.memory_space<vmem>>, vector<1x64xf32>
    %239 = arith.addf %237, %238 : vector<1x64xf32>
    %240 = vector.extract_strided_slice %239 {offsets = [0, 0], sizes = [1, 16], strides = [1, 1]} : vector<1x64xf32> to vector<1x16xf32>
    %241 = arith.negf %240 : vector<1x16xf32>
    %242 = math.exp %241 : vector<1x16xf32>
    %cst_72 = arith.constant 1.000000e+00 : f32
    %243 = vector.broadcast %cst_72 : f32 to vector<1x16xf32>
    %244 = arith.addf %243, %242 : vector<1x16xf32>
    %245 = arith.divf %243, %244 : vector<1x16xf32>
    %246 = vector.extract_strided_slice %239 {offsets = [0, 16], sizes = [1, 16], strides = [1, 1]} : vector<1x64xf32> to vector<1x16xf32>
    %247 = arith.negf %246 : vector<1x16xf32>
    %248 = math.exp %247 : vector<1x16xf32>
    %cst_73 = arith.constant 1.000000e+00 : f32
    %249 = vector.broadcast %cst_73 : f32 to vector<1x16xf32>
    %250 = arith.addf %249, %248 : vector<1x16xf32>
    %251 = arith.divf %249, %250 : vector<1x16xf32>
    %252 = vector.extract_strided_slice %239 {offsets = [0, 32], sizes = [1, 16], strides = [1, 1]} : vector<1x64xf32> to vector<1x16xf32>
    %253 = math.tanh %252 : vector<1x16xf32>
    %254 = vector.extract_strided_slice %239 {offsets = [0, 48], sizes = [1, 16], strides = [1, 1]} : vector<1x64xf32> to vector<1x16xf32>
    %255 = arith.negf %254 : vector<1x16xf32>
    %256 = math.exp %255 : vector<1x16xf32>
    %cst_74 = arith.constant 1.000000e+00 : f32
    %257 = vector.broadcast %cst_74 : f32 to vector<1x16xf32>
    %258 = arith.addf %257, %256 : vector<1x16xf32>
    %259 = arith.divf %257, %258 : vector<1x16xf32>
    %260 = arith.mulf %251, %200 : vector<1x16xf32>
    %261 = arith.mulf %245, %253 : vector<1x16xf32>
    %262 = arith.addf %260, %261 : vector<1x16xf32>
    %263 = math.tanh %262 : vector<1x16xf32>
    %264 = arith.mulf %259, %263 : vector<1x16xf32>
    %c3 = arith.constant 3 : index
    %c0_75 = arith.constant 0 : index
    %265 = vector.load %arg20[%c3, %c0_75] : memref<8x16xf32, #tpu.memory_space<vmem>>, vector<1x16xf32>
    tpu.vector_store %arg20[%c3, %c0_75], %264 {strides = array<i32>} : memref<8x16xf32, #tpu.memory_space<vmem>>, vector<1x16xf32>,
    %266 = vector.extract_strided_slice %13 {offsets = [4, 0], sizes = [1, 64], strides = [1, 1]} : vector<8x64xf32> to vector<1x64xf32>
    %267 = arith.truncf %233 : vector<1x16xf32> to vector<1x16xbf16>
    %c0_76 = arith.constant 0 : index
    %c0_77 = arith.constant 0 : index
    %268 = vector.load %arg5[%c0_76, %c0_77] : memref<16x64xbf16, #tpu.memory_space<vmem>>, vector<16x64xbf16>
    %cst_78 = arith.constant dense<0.000000e+00> : vector<1x64xf32>
    %269 = tpu.matmul %267, %268, %cst_78 {dimension_numbers = #tpu.dot_dimension_numbers<[1], [0], [0], [1], [0, 0, 1, 1], [], []>} : vector<1x16xbf16>, vector<16x64xbf16>, vector<1x64xf32> -> vector<1x64xf32>
    %270 = arith.addf %266, %269 : vector<1x64xf32>
    %271 = vector.extract_strided_slice %270 {offsets = [0, 0], sizes = [1, 16], strides = [1, 1]} : vector<1x64xf32> to vector<1x16xf32>
    %272 = arith.negf %271 : vector<1x16xf32>
    %273 = math.exp %272 : vector<1x16xf32>
    %cst_79 = arith.constant 1.000000e+00 : f32
    %274 = vector.broadcast %cst_79 : f32 to vector<1x16xf32>
    %275 = arith.addf %274, %273 : vector<1x16xf32>
    %276 = arith.divf %274, %275 : vector<1x16xf32>
    %277 = vector.extract_strided_slice %270 {offsets = [0, 16], sizes = [1, 16], strides = [1, 1]} : vector<1x64xf32> to vector<1x16xf32>
    %278 = arith.negf %277 : vector<1x16xf32>
    %279 = math.exp %278 : vector<1x16xf32>
    %cst_80 = arith.constant 1.000000e+00 : f32
    %280 = vector.broadcast %cst_80 : f32 to vector<1x16xf32>
    %281 = arith.addf %280, %279 : vector<1x16xf32>
    %282 = arith.divf %280, %281 : vector<1x16xf32>
    %283 = vector.extract_strided_slice %270 {offsets = [0, 32], sizes = [1, 16], strides = [1, 1]} : vector<1x64xf32> to vector<1x16xf32>
    %284 = math.tanh %283 : vector<1x16xf32>
    %285 = vector.extract_strided_slice %270 {offsets = [0, 48], sizes = [1, 16], strides = [1, 1]} : vector<1x64xf32> to vector<1x16xf32>
    %286 = arith.negf %285 : vector<1x16xf32>
    %287 = math.exp %286 : vector<1x16xf32>
    %cst_81 = arith.constant 1.000000e+00 : f32
    %288 = vector.broadcast %cst_81 : f32 to vector<1x16xf32>
    %289 = arith.addf %288, %287 : vector<1x16xf32>
    %290 = arith.divf %288, %289 : vector<1x16xf32>
    %291 = arith.mulf %282, %231 : vector<1x16xf32>
    %292 = arith.mulf %276, %284 : vector<1x16xf32>
    %293 = arith.addf %291, %292 : vector<1x16xf32>
    %294 = math.tanh %293 : vector<1x16xf32>
    %295 = arith.mulf %290, %294 : vector<1x16xf32>
    %296 = tpu.concatenate %295, %264 in 1 : vector<1x16xf32>, vector<1x16xf32> -> vector<1x32xf32>
    %297 = arith.truncf %296 : vector<1x32xf32> to vector<1x32xbf16>
    %c0_82 = arith.constant 0 : index
    %c0_83 = arith.constant 0 : index
    %298 = vector.load %arg7[%c0_82, %c0_83] : memref<32x64xbf16, #tpu.memory_space<vmem>>, vector<32x64xbf16>
    %cst_84 = arith.constant dense<0.000000e+00> : vector<1x64xf32>
    %299 = tpu.matmul %297, %298, %cst_84 {dimension_numbers = #tpu.dot_dimension_numbers<[1], [0], [0], [1], [0, 0, 1, 1], [], []>} : vector<1x32xbf16>, vector<32x64xbf16>, vector<1x64xf32> -> vector<1x64xf32>
    %c0_85 = arith.constant 0 : index
    %c0_86 = arith.constant 0 : index
    %300 = vector.load %arg8[%c0_85, %c0_86] : memref<1x64xf32, #tpu.memory_space<vmem>>, vector<1x64xf32>
    %301 = arith.addf %299, %300 : vector<1x64xf32>
    %302 = vector.extract_strided_slice %301 {offsets = [0, 0], sizes = [1, 16], strides = [1, 1]} : vector<1x64xf32> to vector<1x16xf32>
    %303 = arith.negf %302 : vector<1x16xf32>
    %304 = math.exp %303 : vector<1x16xf32>
    %cst_87 = arith.constant 1.000000e+00 : f32
    %305 = vector.broadcast %cst_87 : f32 to vector<1x16xf32>
    %306 = arith.addf %305, %304 : vector<1x16xf32>
    %307 = arith.divf %305, %306 : vector<1x16xf32>
    %308 = vector.extract_strided_slice %301 {offsets = [0, 16], sizes = [1, 16], strides = [1, 1]} : vector<1x64xf32> to vector<1x16xf32>
    %309 = arith.negf %308 : vector<1x16xf32>
    %310 = math.exp %309 : vector<1x16xf32>
    %cst_88 = arith.constant 1.000000e+00 : f32
    %311 = vector.broadcast %cst_88 : f32 to vector<1x16xf32>
    %312 = arith.addf %311, %310 : vector<1x16xf32>
    %313 = arith.divf %311, %312 : vector<1x16xf32>
    %314 = vector.extract_strided_slice %301 {offsets = [0, 32], sizes = [1, 16], strides = [1, 1]} : vector<1x64xf32> to vector<1x16xf32>
    %315 = math.tanh %314 : vector<1x16xf32>
    %316 = vector.extract_strided_slice %301 {offsets = [0, 48], sizes = [1, 16], strides = [1, 1]} : vector<1x64xf32> to vector<1x16xf32>
    %317 = arith.negf %316 : vector<1x16xf32>
    %318 = math.exp %317 : vector<1x16xf32>
    %cst_89 = arith.constant 1.000000e+00 : f32
    %319 = vector.broadcast %cst_89 : f32 to vector<1x16xf32>
    %320 = arith.addf %319, %318 : vector<1x16xf32>
    %321 = arith.divf %319, %320 : vector<1x16xf32>
    %322 = arith.mulf %313, %262 : vector<1x16xf32>
    %323 = arith.mulf %307, %315 : vector<1x16xf32>
    %324 = arith.addf %322, %323 : vector<1x16xf32>
    %325 = math.tanh %324 : vector<1x16xf32>
    %326 = arith.mulf %321, %325 : vector<1x16xf32>
    %c4 = arith.constant 4 : index
    %c0_90 = arith.constant 0 : index
    %327 = vector.load %arg20[%c4, %c0_90] : memref<8x16xf32, #tpu.memory_space<vmem>>, vector<1x16xf32>
    tpu.vector_store %arg20[%c4, %c0_90], %326 {strides = array<i32>} : memref<8x16xf32, #tpu.memory_space<vmem>>, vector<1x16xf32>,
    %328 = vector.extract_strided_slice %13 {offsets = [5, 0], sizes = [1, 64], strides = [1, 1]} : vector<8x64xf32> to vector<1x64xf32>
    %329 = arith.truncf %295 : vector<1x16xf32> to vector<1x16xbf16>
    %c0_91 = arith.constant 0 : index
    %c0_92 = arith.constant 0 : index
    %330 = vector.load %arg5[%c0_91, %c0_92] : memref<16x64xbf16, #tpu.memory_space<vmem>>, vector<16x64xbf16>
    %cst_93 = arith.constant dense<0.000000e+00> : vector<1x64xf32>
    %331 = tpu.matmul %329, %330, %cst_93 {dimension_numbers = #tpu.dot_dimension_numbers<[1], [0], [0], [1], [0, 0, 1, 1], [], []>} : vector<1x16xbf16>, vector<16x64xbf16>, vector<1x64xf32> -> vector<1x64xf32>
    %332 = arith.addf %328, %331 : vector<1x64xf32>
    %333 = vector.extract_strided_slice %332 {offsets = [0, 0], sizes = [1, 16], strides = [1, 1]} : vector<1x64xf32> to vector<1x16xf32>
    %334 = arith.negf %333 : vector<1x16xf32>
    %335 = math.exp %334 : vector<1x16xf32>
    %cst_94 = arith.constant 1.000000e+00 : f32
    %336 = vector.broadcast %cst_94 : f32 to vector<1x16xf32>
    %337 = arith.addf %336, %335 : vector<1x16xf32>
    %338 = arith.divf %336, %337 : vector<1x16xf32>
    %339 = vector.extract_strided_slice %332 {offsets = [0, 16], sizes = [1, 16], strides = [1, 1]} : vector<1x64xf32> to vector<1x16xf32>
    %340 = arith.negf %339 : vector<1x16xf32>
    %341 = math.exp %340 : vector<1x16xf32>
    %cst_95 = arith.constant 1.000000e+00 : f32
    %342 = vector.broadcast %cst_95 : f32 to vector<1x16xf32>
    %343 = arith.addf %342, %341 : vector<1x16xf32>
    %344 = arith.divf %342, %343 : vector<1x16xf32>
    %345 = vector.extract_strided_slice %332 {offsets = [0, 32], sizes = [1, 16], strides = [1, 1]} : vector<1x64xf32> to vector<1x16xf32>
    %346 = math.tanh %345 : vector<1x16xf32>
    %347 = vector.extract_strided_slice %332 {offsets = [0, 48], sizes = [1, 16], strides = [1, 1]} : vector<1x64xf32> to vector<1x16xf32>
    %348 = arith.negf %347 : vector<1x16xf32>
    %349 = math.exp %348 : vector<1x16xf32>
    %cst_96 = arith.constant 1.000000e+00 : f32
    %350 = vector.broadcast %cst_96 : f32 to vector<1x16xf32>
    %351 = arith.addf %350, %349 : vector<1x16xf32>
    %352 = arith.divf %350, %351 : vector<1x16xf32>
    %353 = arith.mulf %344, %293 : vector<1x16xf32>
    %354 = arith.mulf %338, %346 : vector<1x16xf32>
    %355 = arith.addf %353, %354 : vector<1x16xf32>
    %356 = math.tanh %355 : vector<1x16xf32>
    %357 = arith.mulf %352, %356 : vector<1x16xf32>
    %358 = tpu.concatenate %357, %326 in 1 : vector<1x16xf32>, vector<1x16xf32> -> vector<1x32xf32>
    %359 = arith.truncf %358 : vector<1x32xf32> to vector<1x32xbf16>
    %c0_97 = arith.constant 0 : index
    %c0_98 = arith.constant 0 : index
    %360 = vector.load %arg7[%c0_97, %c0_98] : memref<32x64xbf16, #tpu.memory_space<vmem>>, vector<32x64xbf16>
    %cst_99 = arith.constant dense<0.000000e+00> : vector<1x64xf32>
    %361 = tpu.matmul %359, %360, %cst_99 {dimension_numbers = #tpu.dot_dimension_numbers<[1], [0], [0], [1], [0, 0, 1, 1], [], []>} : vector<1x32xbf16>, vector<32x64xbf16>, vector<1x64xf32> -> vector<1x64xf32>
    %c0_100 = arith.constant 0 : index
    %c0_101 = arith.constant 0 : index
    %362 = vector.load %arg8[%c0_100, %c0_101] : memref<1x64xf32, #tpu.memory_space<vmem>>, vector<1x64xf32>
    %363 = arith.addf %361, %362 : vector<1x64xf32>
    %364 = vector.extract_strided_slice %363 {offsets = [0, 0], sizes = [1, 16], strides = [1, 1]} : vector<1x64xf32> to vector<1x16xf32>
    %365 = arith.negf %364 : vector<1x16xf32>
    %366 = math.exp %365 : vector<1x16xf32>
    %cst_102 = arith.constant 1.000000e+00 : f32
    %367 = vector.broadcast %cst_102 : f32 to vector<1x16xf32>
    %368 = arith.addf %367, %366 : vector<1x16xf32>
    %369 = arith.divf %367, %368 : vector<1x16xf32>
    %370 = vector.extract_strided_slice %363 {offsets = [0, 16], sizes = [1, 16], strides = [1, 1]} : vector<1x64xf32> to vector<1x16xf32>
    %371 = arith.negf %370 : vector<1x16xf32>
    %372 = math.exp %371 : vector<1x16xf32>
    %cst_103 = arith.constant 1.000000e+00 : f32
    %373 = vector.broadcast %cst_103 : f32 to vector<1x16xf32>
    %374 = arith.addf %373, %372 : vector<1x16xf32>
    %375 = arith.divf %373, %374 : vector<1x16xf32>
    %376 = vector.extract_strided_slice %363 {offsets = [0, 32], sizes = [1, 16], strides = [1, 1]} : vector<1x64xf32> to vector<1x16xf32>
    %377 = math.tanh %376 : vector<1x16xf32>
    %378 = vector.extract_strided_slice %363 {offsets = [0, 48], sizes = [1, 16], strides = [1, 1]} : vector<1x64xf32> to vector<1x16xf32>
    %379 = arith.negf %378 : vector<1x16xf32>
    %380 = math.exp %379 : vector<1x16xf32>
    %cst_104 = arith.constant 1.000000e+00 : f32
    %381 = vector.broadcast %cst_104 : f32 to vector<1x16xf32>
    %382 = arith.addf %381, %380 : vector<1x16xf32>
    %383 = arith.divf %381, %382 : vector<1x16xf32>
    %384 = arith.mulf %375, %324 : vector<1x16xf32>
    %385 = arith.mulf %369, %377 : vector<1x16xf32>
    %386 = arith.addf %384, %385 : vector<1x16xf32>
    %387 = math.tanh %386 : vector<1x16xf32>
    %388 = arith.mulf %383, %387 : vector<1x16xf32>
    %c5 = arith.constant 5 : index
    %c0_105 = arith.constant 0 : index
    %389 = vector.load %arg20[%c5, %c0_105] : memref<8x16xf32, #tpu.memory_space<vmem>>, vector<1x16xf32>
    tpu.vector_store %arg20[%c5, %c0_105], %388 {strides = array<i32>} : memref<8x16xf32, #tpu.memory_space<vmem>>, vector<1x16xf32>,
    %390 = vector.extract_strided_slice %13 {offsets = [6, 0], sizes = [1, 64], strides = [1, 1]} : vector<8x64xf32> to vector<1x64xf32>
    %391 = arith.truncf %357 : vector<1x16xf32> to vector<1x16xbf16>
    %c0_106 = arith.constant 0 : index
    %c0_107 = arith.constant 0 : index
    %392 = vector.load %arg5[%c0_106, %c0_107] : memref<16x64xbf16, #tpu.memory_space<vmem>>, vector<16x64xbf16>
    %cst_108 = arith.constant dense<0.000000e+00> : vector<1x64xf32>
    %393 = tpu.matmul %391, %392, %cst_108 {dimension_numbers = #tpu.dot_dimension_numbers<[1], [0], [0], [1], [0, 0, 1, 1], [], []>} : vector<1x16xbf16>, vector<16x64xbf16>, vector<1x64xf32> -> vector<1x64xf32>
    %394 = arith.addf %390, %393 : vector<1x64xf32>
    %395 = vector.extract_strided_slice %394 {offsets = [0, 0], sizes = [1, 16], strides = [1, 1]} : vector<1x64xf32> to vector<1x16xf32>
    %396 = arith.negf %395 : vector<1x16xf32>
    %397 = math.exp %396 : vector<1x16xf32>
    %cst_109 = arith.constant 1.000000e+00 : f32
    %398 = vector.broadcast %cst_109 : f32 to vector<1x16xf32>
    %399 = arith.addf %398, %397 : vector<1x16xf32>
    %400 = arith.divf %398, %399 : vector<1x16xf32>
    %401 = vector.extract_strided_slice %394 {offsets = [0, 16], sizes = [1, 16], strides = [1, 1]} : vector<1x64xf32> to vector<1x16xf32>
    %402 = arith.negf %401 : vector<1x16xf32>
    %403 = math.exp %402 : vector<1x16xf32>
    %cst_110 = arith.constant 1.000000e+00 : f32
    %404 = vector.broadcast %cst_110 : f32 to vector<1x16xf32>
    %405 = arith.addf %404, %403 : vector<1x16xf32>
    %406 = arith.divf %404, %405 : vector<1x16xf32>
    %407 = vector.extract_strided_slice %394 {offsets = [0, 32], sizes = [1, 16], strides = [1, 1]} : vector<1x64xf32> to vector<1x16xf32>
    %408 = math.tanh %407 : vector<1x16xf32>
    %409 = vector.extract_strided_slice %394 {offsets = [0, 48], sizes = [1, 16], strides = [1, 1]} : vector<1x64xf32> to vector<1x16xf32>
    %410 = arith.negf %409 : vector<1x16xf32>
    %411 = math.exp %410 : vector<1x16xf32>
    %cst_111 = arith.constant 1.000000e+00 : f32
    %412 = vector.broadcast %cst_111 : f32 to vector<1x16xf32>
    %413 = arith.addf %412, %411 : vector<1x16xf32>
    %414 = arith.divf %412, %413 : vector<1x16xf32>
    %415 = arith.mulf %406, %355 : vector<1x16xf32>
    %416 = arith.mulf %400, %408 : vector<1x16xf32>
    %417 = arith.addf %415, %416 : vector<1x16xf32>
    %418 = math.tanh %417 : vector<1x16xf32>
    %419 = arith.mulf %414, %418 : vector<1x16xf32>
    %420 = tpu.concatenate %419, %388 in 1 : vector<1x16xf32>, vector<1x16xf32> -> vector<1x32xf32>
    %421 = arith.truncf %420 : vector<1x32xf32> to vector<1x32xbf16>
    %c0_112 = arith.constant 0 : index
    %c0_113 = arith.constant 0 : index
    %422 = vector.load %arg7[%c0_112, %c0_113] : memref<32x64xbf16, #tpu.memory_space<vmem>>, vector<32x64xbf16>
    %cst_114 = arith.constant dense<0.000000e+00> : vector<1x64xf32>
    %423 = tpu.matmul %421, %422, %cst_114 {dimension_numbers = #tpu.dot_dimension_numbers<[1], [0], [0], [1], [0, 0, 1, 1], [], []>} : vector<1x32xbf16>, vector<32x64xbf16>, vector<1x64xf32> -> vector<1x64xf32>
    %c0_115 = arith.constant 0 : index
    %c0_116 = arith.constant 0 : index
    %424 = vector.load %arg8[%c0_115, %c0_116] : memref<1x64xf32, #tpu.memory_space<vmem>>, vector<1x64xf32>
    %425 = arith.addf %423, %424 : vector<1x64xf32>
    %426 = vector.extract_strided_slice %425 {offsets = [0, 0], sizes = [1, 16], strides = [1, 1]} : vector<1x64xf32> to vector<1x16xf32>
    %427 = arith.negf %426 : vector<1x16xf32>
    %428 = math.exp %427 : vector<1x16xf32>
    %cst_117 = arith.constant 1.000000e+00 : f32
    %429 = vector.broadcast %cst_117 : f32 to vector<1x16xf32>
    %430 = arith.addf %429, %428 : vector<1x16xf32>
    %431 = arith.divf %429, %430 : vector<1x16xf32>
    %432 = vector.extract_strided_slice %425 {offsets = [0, 16], sizes = [1, 16], strides = [1, 1]} : vector<1x64xf32> to vector<1x16xf32>
    %433 = arith.negf %432 : vector<1x16xf32>
    %434 = math.exp %433 : vector<1x16xf32>
    %cst_118 = arith.constant 1.000000e+00 : f32
    %435 = vector.broadcast %cst_118 : f32 to vector<1x16xf32>
    %436 = arith.addf %435, %434 : vector<1x16xf32>
    %437 = arith.divf %435, %436 : vector<1x16xf32>
    %438 = vector.extract_strided_slice %425 {offsets = [0, 32], sizes = [1, 16], strides = [1, 1]} : vector<1x64xf32> to vector<1x16xf32>
    %439 = math.tanh %438 : vector<1x16xf32>
    %440 = vector.extract_strided_slice %425 {offsets = [0, 48], sizes = [1, 16], strides = [1, 1]} : vector<1x64xf32> to vector<1x16xf32>
    %441 = arith.negf %440 : vector<1x16xf32>
    %442 = math.exp %441 : vector<1x16xf32>
    %cst_119 = arith.constant 1.000000e+00 : f32
    %443 = vector.broadcast %cst_119 : f32 to vector<1x16xf32>
    %444 = arith.addf %443, %442 : vector<1x16xf32>
    %445 = arith.divf %443, %444 : vector<1x16xf32>
    %446 = arith.mulf %437, %386 : vector<1x16xf32>
    %447 = arith.mulf %431, %439 : vector<1x16xf32>
    %448 = arith.addf %446, %447 : vector<1x16xf32>
    %449 = math.tanh %448 : vector<1x16xf32>
    %450 = arith.mulf %445, %449 : vector<1x16xf32>
    %c6 = arith.constant 6 : index
    %c0_120 = arith.constant 0 : index
    %451 = vector.load %arg20[%c6, %c0_120] : memref<8x16xf32, #tpu.memory_space<vmem>>, vector<1x16xf32>
    tpu.vector_store %arg20[%c6, %c0_120], %450 {strides = array<i32>} : memref<8x16xf32, #tpu.memory_space<vmem>>, vector<1x16xf32>,
    %452 = vector.extract_strided_slice %13 {offsets = [7, 0], sizes = [1, 64], strides = [1, 1]} : vector<8x64xf32> to vector<1x64xf32>
    %453 = arith.truncf %419 : vector<1x16xf32> to vector<1x16xbf16>
    %c0_121 = arith.constant 0 : index
    %c0_122 = arith.constant 0 : index
    %454 = vector.load %arg5[%c0_121, %c0_122] : memref<16x64xbf16, #tpu.memory_space<vmem>>, vector<16x64xbf16>
    %cst_123 = arith.constant dense<0.000000e+00> : vector<1x64xf32>
    %455 = tpu.matmul %453, %454, %cst_123 {dimension_numbers = #tpu.dot_dimension_numbers<[1], [0], [0], [1], [0, 0, 1, 1], [], []>} : vector<1x16xbf16>, vector<16x64xbf16>, vector<1x64xf32> -> vector<1x64xf32>
    %456 = arith.addf %452, %455 : vector<1x64xf32>
    %457 = vector.extract_strided_slice %456 {offsets = [0, 0], sizes = [1, 16], strides = [1, 1]} : vector<1x64xf32> to vector<1x16xf32>
    %458 = arith.negf %457 : vector<1x16xf32>
    %459 = math.exp %458 : vector<1x16xf32>
    %cst_124 = arith.constant 1.000000e+00 : f32
    %460 = vector.broadcast %cst_124 : f32 to vector<1x16xf32>
    %461 = arith.addf %460, %459 : vector<1x16xf32>
    %462 = arith.divf %460, %461 : vector<1x16xf32>
    %463 = vector.extract_strided_slice %456 {offsets = [0, 16], sizes = [1, 16], strides = [1, 1]} : vector<1x64xf32> to vector<1x16xf32>
    %464 = arith.negf %463 : vector<1x16xf32>
    %465 = math.exp %464 : vector<1x16xf32>
    %cst_125 = arith.constant 1.000000e+00 : f32
    %466 = vector.broadcast %cst_125 : f32 to vector<1x16xf32>
    %467 = arith.addf %466, %465 : vector<1x16xf32>
    %468 = arith.divf %466, %467 : vector<1x16xf32>
    %469 = vector.extract_strided_slice %456 {offsets = [0, 32], sizes = [1, 16], strides = [1, 1]} : vector<1x64xf32> to vector<1x16xf32>
    %470 = math.tanh %469 : vector<1x16xf32>
    %471 = vector.extract_strided_slice %456 {offsets = [0, 48], sizes = [1, 16], strides = [1, 1]} : vector<1x64xf32> to vector<1x16xf32>
    %472 = arith.negf %471 : vector<1x16xf32>
    %473 = math.exp %472 : vector<1x16xf32>
    %cst_126 = arith.constant 1.000000e+00 : f32
    %474 = vector.broadcast %cst_126 : f32 to vector<1x16xf32>
    %475 = arith.addf %474, %473 : vector<1x16xf32>
    %476 = arith.divf %474, %475 : vector<1x16xf32>
    %477 = arith.mulf %468, %417 : vector<1x16xf32>
    %478 = arith.mulf %462, %470 : vector<1x16xf32>
    %479 = arith.addf %477, %478 : vector<1x16xf32>
    %480 = math.tanh %479 : vector<1x16xf32>
    %481 = arith.mulf %476, %480 : vector<1x16xf32>
    %482 = tpu.concatenate %481, %450 in 1 : vector<1x16xf32>, vector<1x16xf32> -> vector<1x32xf32>
    %483 = arith.truncf %482 : vector<1x32xf32> to vector<1x32xbf16>
    %c0_127 = arith.constant 0 : index
    %c0_128 = arith.constant 0 : index
    %484 = vector.load %arg7[%c0_127, %c0_128] : memref<32x64xbf16, #tpu.memory_space<vmem>>, vector<32x64xbf16>
    %cst_129 = arith.constant dense<0.000000e+00> : vector<1x64xf32>
    %485 = tpu.matmul %483, %484, %cst_129 {dimension_numbers = #tpu.dot_dimension_numbers<[1], [0], [0], [1], [0, 0, 1, 1], [], []>} : vector<1x32xbf16>, vector<32x64xbf16>, vector<1x64xf32> -> vector<1x64xf32>
    %c0_130 = arith.constant 0 : index
    %c0_131 = arith.constant 0 : index
    %486 = vector.load %arg8[%c0_130, %c0_131] : memref<1x64xf32, #tpu.memory_space<vmem>>, vector<1x64xf32>
    %487 = arith.addf %485, %486 : vector<1x64xf32>
    %488 = vector.extract_strided_slice %487 {offsets = [0, 0], sizes = [1, 16], strides = [1, 1]} : vector<1x64xf32> to vector<1x16xf32>
    %489 = arith.negf %488 : vector<1x16xf32>
    %490 = math.exp %489 : vector<1x16xf32>
    %cst_132 = arith.constant 1.000000e+00 : f32
    %491 = vector.broadcast %cst_132 : f32 to vector<1x16xf32>
    %492 = arith.addf %491, %490 : vector<1x16xf32>
    %493 = arith.divf %491, %492 : vector<1x16xf32>
    %494 = vector.extract_strided_slice %487 {offsets = [0, 16], sizes = [1, 16], strides = [1, 1]} : vector<1x64xf32> to vector<1x16xf32>
    %495 = arith.negf %494 : vector<1x16xf32>
    %496 = math.exp %495 : vector<1x16xf32>
    %cst_133 = arith.constant 1.000000e+00 : f32
    %497 = vector.broadcast %cst_133 : f32 to vector<1x16xf32>
    %498 = arith.addf %497, %496 : vector<1x16xf32>
    %499 = arith.divf %497, %498 : vector<1x16xf32>
    %500 = vector.extract_strided_slice %487 {offsets = [0, 32], sizes = [1, 16], strides = [1, 1]} : vector<1x64xf32> to vector<1x16xf32>
    %501 = math.tanh %500 : vector<1x16xf32>
    %502 = vector.extract_strided_slice %487 {offsets = [0, 48], sizes = [1, 16], strides = [1, 1]} : vector<1x64xf32> to vector<1x16xf32>
    %503 = arith.negf %502 : vector<1x16xf32>
    %504 = math.exp %503 : vector<1x16xf32>
    %cst_134 = arith.constant 1.000000e+00 : f32
    %505 = vector.broadcast %cst_134 : f32 to vector<1x16xf32>
    %506 = arith.addf %505, %504 : vector<1x16xf32>
    %507 = arith.divf %505, %506 : vector<1x16xf32>
    %508 = arith.mulf %499, %448 : vector<1x16xf32>
    %509 = arith.mulf %493, %501 : vector<1x16xf32>
    %510 = arith.addf %508, %509 : vector<1x16xf32>
    %511 = math.tanh %510 : vector<1x16xf32>
    %512 = arith.mulf %507, %511 : vector<1x16xf32>
    %c7 = arith.constant 7 : index
    %c0_135 = arith.constant 0 : index
    %513 = vector.load %arg20[%c7, %c0_135] : memref<8x16xf32, #tpu.memory_space<vmem>>, vector<1x16xf32>
    tpu.vector_store %arg20[%c7, %c0_135], %512 {strides = array<i32>} : memref<8x16xf32, #tpu.memory_space<vmem>>, vector<1x16xf32>,
    %c0_136 = arith.constant 0 : index
    %c0_137 = arith.constant 0 : index
    %514 = vector.load %arg20[%c0_136, %c0_137] : memref<8x16xf32, #tpu.memory_space<vmem>>, vector<8x16xf32>
    %c0_138 = arith.constant 0 : index
    %c0_139 = arith.constant 0 : index
    %515 = vector.load %arg9[%c0_138, %c0_139] : memref<1x16xf32, #tpu.memory_space<vmem>>, vector<1x16xf32>
    %c0_140 = arith.constant 0 : index
    %c0_141 = arith.constant 0 : index
    %516 = vector.load %arg10[%c0_140, %c0_141] : memref<1x16xf32, #tpu.memory_space<vmem>>, vector<1x16xf32>
    %cst_142 = arith.constant dense<0.000000e+00> : vector<8xf32>
    %517 = vector.multi_reduction <add>, %514, %cst_142 [1] : vector<8x16xf32> to vector<8xf32>
    %518 = vector.shape_cast %517 : vector<8xf32> to vector<8x1xf32>
    %cst_143 = arith.constant 1.600000e+01 : f32
    %519 = vector.broadcast %cst_143 : f32 to vector<8x1xf32>
    %520 = arith.divf %518, %519 : vector<8x1xf32>
    %521 = vector.broadcast %520 : vector<8x1xf32> to vector<8x16xf32>
    %522 = arith.subf %514, %521 : vector<8x16xf32>
    %523 = arith.mulf %522, %522 : vector<8x16xf32>
    %cst_144 = arith.constant dense<0.000000e+00> : vector<8xf32>
    %524 = vector.multi_reduction <add>, %523, %cst_144 [1] : vector<8x16xf32> to vector<8xf32>
    %525 = vector.shape_cast %524 : vector<8xf32> to vector<8x1xf32>
    %cst_145 = arith.constant 1.600000e+01 : f32
    %526 = vector.broadcast %cst_145 : f32 to vector<8x1xf32>
    %527 = arith.divf %525, %526 : vector<8x1xf32>
    %528 = vector.broadcast %520 : vector<8x1xf32> to vector<8x16xf32>
    %529 = arith.subf %514, %528 : vector<8x16xf32>
    %cst_146 = arith.constant 9.99999974E-6 : f32
    %530 = vector.broadcast %cst_146 : f32 to vector<8x1xf32>
    %531 = arith.addf %527, %530 : vector<8x1xf32>
    %532 = math.rsqrt %531 : vector<8x1xf32>
    %533 = vector.broadcast %532 : vector<8x1xf32> to vector<8x16xf32>
    %534 = arith.mulf %529, %533 : vector<8x16xf32>
    %535 = vector.broadcast %515 : vector<1x16xf32> to vector<8x16xf32>
    %536 = arith.mulf %534, %535 : vector<8x16xf32>
    %537 = vector.broadcast %516 : vector<1x16xf32> to vector<8x16xf32>
    %538 = arith.addf %536, %537 : vector<8x16xf32>
    %539 = arith.truncf %538 : vector<8x16xf32> to vector<8x16xbf16>
    %c0_147 = arith.constant 0 : index
    %c0_148 = arith.constant 0 : index
    %540 = vector.load %arg11[%c0_147, %c0_148] : memref<16x128xbf16, #tpu.memory_space<vmem>>, vector<16x128xbf16>
    %cst_149 = arith.constant dense<0.000000e+00> : vector<8x128xf32>
    %541 = tpu.matmul %539, %540, %cst_149 {dimension_numbers = #tpu.dot_dimension_numbers<[1], [0], [0], [1], [0, 0, 1, 1], [], []>} : vector<8x16xbf16>, vector<16x128xbf16>, vector<8x128xf32> -> vector<8x128xf32>
    %c0_150 = arith.constant 0 : index
    %c0_151 = arith.constant 0 : index
    %542 = vector.load %arg12[%c0_150, %c0_151] : memref<1x128xf32, #tpu.memory_space<vmem>>, vector<1x128xf32>
    %543 = vector.broadcast %542 : vector<1x128xf32> to vector<8x128xf32>
    %544 = arith.addf %541, %543 : vector<8x128xf32>
    %cst_152 = arith.constant 0.000000e+00 : f32
    %545 = vector.broadcast %cst_152 : f32 to vector<8x128xf32>
    %546 = arith.maximumf %544, %545 : vector<8x128xf32>
    %547 = arith.truncf %546 : vector<8x128xf32> to vector<8x128xbf16>
    %c0_153 = arith.constant 0 : index
    %c0_154 = arith.constant 0 : index
    %548 = vector.load %arg13[%c0_153, %c0_154] : memref<128x32xbf16, #tpu.memory_space<vmem>>, vector<128x32xbf16>
    %cst_155 = arith.constant dense<0.000000e+00> : vector<8x32xf32>
    %549 = tpu.matmul %547, %548, %cst_155 {dimension_numbers = #tpu.dot_dimension_numbers<[1], [0], [0], [1], [0, 0, 1, 1], [], []>} : vector<8x128xbf16>, vector<128x32xbf16>, vector<8x32xf32> -> vector<8x32xf32>
    %c0_156 = arith.constant 0 : index
    %c0_157 = arith.constant 0 : index
    %550 = vector.load %arg14[%c0_156, %c0_157] : memref<1x32xf32, #tpu.memory_space<vmem>>, vector<1x32xf32>
    %551 = vector.broadcast %550 : vector<1x32xf32> to vector<8x32xf32>
    %552 = arith.addf %549, %551 : vector<8x32xf32>
    %553 = arith.addf %1, %552 : vector<8x32xf32>
    %c0_158 = arith.constant 0 : index
    %c0_159 = arith.constant 0 : index
    %554 = vector.load %arg15[%c0_158, %c0_159] : memref<1x32xf32, #tpu.memory_space<vmem>>, vector<1x32xf32>
    %c0_160 = arith.constant 0 : index
    %c0_161 = arith.constant 0 : index
    %555 = vector.load %arg16[%c0_160, %c0_161] : memref<1x32xf32, #tpu.memory_space<vmem>>, vector<1x32xf32>
    %cst_162 = arith.constant dense<0.000000e+00> : vector<8xf32>
    %556 = vector.multi_reduction <add>, %553, %cst_162 [1] : vector<8x32xf32> to vector<8xf32>
    %557 = vector.shape_cast %556 : vector<8xf32> to vector<8x1xf32>
    %cst_163 = arith.constant 3.200000e+01 : f32
    %558 = vector.broadcast %cst_163 : f32 to vector<8x1xf32>
    %559 = arith.divf %557, %558 : vector<8x1xf32>
    %560 = vector.broadcast %559 : vector<8x1xf32> to vector<8x32xf32>
    %561 = arith.subf %553, %560 : vector<8x32xf32>
    %562 = arith.mulf %561, %561 : vector<8x32xf32>
    %cst_164 = arith.constant dense<0.000000e+00> : vector<8xf32>
    %563 = vector.multi_reduction <add>, %562, %cst_164 [1] : vector<8x32xf32> to vector<8xf32>
    %564 = vector.shape_cast %563 : vector<8xf32> to vector<8x1xf32>
    %cst_165 = arith.constant 3.200000e+01 : f32
    %565 = vector.broadcast %cst_165 : f32 to vector<8x1xf32>
    %566 = arith.divf %564, %565 : vector<8x1xf32>
    %567 = vector.broadcast %559 : vector<8x1xf32> to vector<8x32xf32>
    %568 = arith.subf %553, %567 : vector<8x32xf32>
    %cst_166 = arith.constant 9.99999974E-6 : f32
    %569 = vector.broadcast %cst_166 : f32 to vector<8x1xf32>
    %570 = arith.addf %566, %569 : vector<8x1xf32>
    %571 = math.rsqrt %570 : vector<8x1xf32>
    %572 = vector.broadcast %571 : vector<8x1xf32> to vector<8x32xf32>
    %573 = arith.mulf %568, %572 : vector<8x32xf32>
    %574 = vector.broadcast %554 : vector<1x32xf32> to vector<8x32xf32>
    %575 = arith.mulf %573, %574 : vector<8x32xf32>
    %576 = vector.broadcast %555 : vector<1x32xf32> to vector<8x32xf32>
    %577 = arith.addf %575, %576 : vector<8x32xf32>
    %578 = arith.truncf %577 : vector<8x32xf32> to vector<8x32xbf16>
    %c0_167 = arith.constant 0 : index
    %c0_168 = arith.constant 0 : index
    %579 = vector.load %arg17[%c0_167, %c0_168] : memref<32x128xbf16, #tpu.memory_space<vmem>>, vector<32x128xbf16>
    %cst_169 = arith.constant dense<0.000000e+00> : vector<8x128xf32>
    %580 = tpu.matmul %578, %579, %cst_169 {dimension_numbers = #tpu.dot_dimension_numbers<[1], [0], [0], [1], [0, 0, 1, 1], [], []>} : vector<8x32xbf16>, vector<32x128xbf16>, vector<8x128xf32> -> vector<8x128xf32>
    %c0_170 = arith.constant 0 : index
    %c0_171 = arith.constant 0 : index
    %581 = vector.load %arg18[%c0_170, %c0_171] : memref<1x128xf32, #tpu.memory_space<vmem>>, vector<1x128xf32>
    %582 = vector.broadcast %581 : vector<1x128xf32> to vector<8x128xf32>
    %583 = arith.addf %580, %582 : vector<8x128xf32>
    %c0_172 = arith.constant 0 : index
    %c0_173 = arith.constant 0 : index
    %c0_174 = arith.constant 0 : index
    %584 = vector.load %arg19[%c0_172, %c0_173, %c0_174] : memref<1x8x128xf32, #tpu.memory_space<vmem>>, vector<1x8x128xf32>
    %585 = vector.shape_cast %584 : vector<1x8x128xf32> to vector<8x128xf32>
    %586 = vector.shape_cast %583 : vector<8x128xf32> to vector<1x8x128xf32>
    tpu.vector_store %arg19[%c0_172, %c0_173, %c0_174], %586 {strides = array<i32>} : memref<1x8x128xf32, #tpu.memory_space<vmem>>, vector<1x8x128xf32>,
    return
  }
  func.func @transform_0(%arg0: i32) -> (i32, i32, i32) {
    %c0_i32 = arith.constant 0 : i32
    %c0_i32_0 = arith.constant 0 : i32
    %c0_i32_1 = arith.constant 0 : i32
    return %arg0, %c0_i32, %c0_i32_0 : i32, i32, i32
  }
  func.func @transform_1(%arg0: i32) -> (i32, i32) {
    %c0_i32 = arith.constant 0 : i32
    %c0_i32_0 = arith.constant 0 : i32
    %c0_i32_1 = arith.constant 0 : i32
    return %c0_i32, %c0_i32_0 : i32, i32
  }
  func.func @transform_2(%arg0: i32) -> (i32, i32) {
    %c0_i32 = arith.constant 0 : i32
    %c0_i32_0 = arith.constant 0 : i32
    %c0_i32_1 = arith.constant 0 : i32
    return %c0_i32, %c0_i32_0 : i32, i32
  }
  func.func @transform_3(%arg0: i32) -> (i32, i32) {
    %c0_i32 = arith.constant 0 : i32
    %c0_i32_0 = arith.constant 0 : i32
    %c0_i32_1 = arith.constant 0 : i32
    return %c0_i32, %c0_i32_0 : i32, i32
  }
  func.func @transform_4(%arg0: i32) -> (i32, i32) {
    %c0_i32 = arith.constant 0 : i32
    %c0_i32_0 = arith.constant 0 : i32
    %c0_i32_1 = arith.constant 0 : i32
    return %c0_i32, %c0_i32_0 : i32, i32
  }
  func.func @transform_5(%arg0: i32) -> (i32, i32) {
    %c0_i32 = arith.constant 0 : i32
    %c0_i32_0 = arith.constant 0 : i32
    %c0_i32_1 = arith.constant 0 : i32
    return %c0_i32, %c0_i32_0 : i32, i32
  }
  func.func @transform_6(%arg0: i32) -> (i32, i32) {
    %c0_i32 = arith.constant 0 : i32
    %c0_i32_0 = arith.constant 0 : i32
    %c0_i32_1 = arith.constant 0 : i32
    return %c0_i32, %c0_i32_0 : i32, i32
  }
  func.func @transform_7(%arg0: i32) -> (i32, i32) {
    %c0_i32 = arith.constant 0 : i32
    %c0_i32_0 = arith.constant 0 : i32
    %c0_i32_1 = arith.constant 0 : i32
    return %c0_i32, %c0_i32_0 : i32, i32
  }
  func.func @transform_8(%arg0: i32) -> (i32, i32) {
    %c0_i32 = arith.constant 0 : i32
    %c0_i32_0 = arith.constant 0 : i32
    %c0_i32_1 = arith.constant 0 : i32
    return %c0_i32, %c0_i32_0 : i32, i32
  }
  func.func @transform_9(%arg0: i32) -> (i32, i32) {
    %c0_i32 = arith.constant 0 : i32
    %c0_i32_0 = arith.constant 0 : i32
    %c0_i32_1 = arith.constant 0 : i32
    return %c0_i32, %c0_i32_0 : i32, i32
  }
  func.func @transform_10(%arg0: i32) -> (i32, i32) {
    %c0_i32 = arith.constant 0 : i32
    %c0_i32_0 = arith.constant 0 : i32
    %c0_i32_1 = arith.constant 0 : i32
    return %c0_i32, %c0_i32_0 : i32, i32
  }
  func.func @transform_11(%arg0: i32) -> (i32, i32) {
    %c0_i32 = arith.constant 0 : i32
    %c0_i32_0 = arith.constant 0 : i32
    %c0_i32_1 = arith.constant 0 : i32
    return %c0_i32, %c0_i32_0 : i32, i32
  }
  func.func @transform_12(%arg0: i32) -> (i32, i32) {
    %c0_i32 = arith.constant 0 : i32
    %c0_i32_0 = arith.constant 0 : i32
    %c0_i32_1 = arith.constant 0 : i32
    return %c0_i32, %c0_i32_0 : i32, i32
  }
  func.func @transform_13(%arg0: i32) -> (i32, i32) {
    %c0_i32 = arith.constant 0 : i32
    %c0_i32_0 = arith.constant 0 : i32
    %c0_i32_1 = arith.constant 0 : i32
    return %c0_i32, %c0_i32_0 : i32, i32
  }
  func.func @transform_14(%arg0: i32) -> (i32, i32) {
    %c0_i32 = arith.constant 0 : i32
    %c0_i32_0 = arith.constant 0 : i32
    %c0_i32_1 = arith.constant 0 : i32
    return %c0_i32, %c0_i32_0 : i32, i32
  }
  func.func @transform_15(%arg0: i32) -> (i32, i32) {
    %c0_i32 = arith.constant 0 : i32
    %c0_i32_0 = arith.constant 0 : i32
    %c0_i32_1 = arith.constant 0 : i32
    return %c0_i32, %c0_i32_0 : i32, i32
  }
  func.func @transform_16(%arg0: i32) -> (i32, i32) {
    %c0_i32 = arith.constant 0 : i32
    %c0_i32_0 = arith.constant 0 : i32
    %c0_i32_1 = arith.constant 0 : i32
    return %c0_i32, %c0_i32_0 : i32, i32
  }
  func.func @transform_17(%arg0: i32) -> (i32, i32) {
    %c0_i32 = arith.constant 0 : i32
    %c0_i32_0 = arith.constant 0 : i32
    %c0_i32_1 = arith.constant 0 : i32
    return %c0_i32, %c0_i32_0 : i32, i32
  }
  func.func @transform_18(%arg0: i32) -> (i32, i32, i32) {
    %c0_i32 = arith.constant 0 : i32
    %c0_i32_0 = arith.constant 0 : i32
    %c0_i32_1 = arith.constant 0 : i32
    return %arg0, %c0_i32, %c0_i32_0 : i32, i32, i32
  }
}

</mosaic_0001>

<bundles_post_ra>
// kernel: transformer_model_forward.2
= control target key start
LH: loop header
LB: loop body
LE: loop exit
PB: predicated region body
PF: predicated region fallthrough
CT: control target
= control target key end

     0   :  { %s1776_s27 = smov 0   ;;  %s1990_s0 = inlined_call_operand.vmem [shape: f32[2,1,8], index: 0, kind: input, shape index: {}]   ;;  %s1991_s1 = inlined_call_operand.vmem [shape: f32[2,8,32], index: 1, kind: input, shape index: {}]   ;;  %s1992_s2 = inlined_call_operand.vmem [shape: bf16[2,32,32], index: 2, kind: input, shape index: {}]   ;;  %s1993_s3 = inlined_call_operand.vmem [shape: f32[2,1,32], index: 3, kind: input, shape index: {}]   ;;  %s1994_s4 = inlined_call_operand.vmem [shape: bf16[2,32,32], index: 4, kind: input, shape index: {}]   ;;  %s1995_s5 = inlined_call_operand.vmem [shape: f32[2,1,32], index: 5, kind: input, shape index: {}]   ;;  %s1996_s6 = inlined_call_operand.vmem [shape: bf16[2,32,32], index: 6, kind: input, shape index: {}]   ;;  %s1997_s7 = inlined_call_operand.vmem [shape: f32[2,1,32], index: 7, kind: input, shape index: {}]   ;;  %s1998_s8 = inlined_call_operand.vmem [shape: bf16[2,32,32], index: 8, kind: input, shape index: {}]   ;;  %s1999_s9 = inlined_call_operand.vmem [shape: f32[2,1,32], index: 9, kind: input, shape index: {}]   ;;  %s2000_s10 = inlined_call_operand.vmem [shape: f32[2,1,32], index: 10, kind: input, shape index: {}]   ;;  %s2001_s11 = inlined_call_operand.vmem [shape: f32[2,1,32], index: 11, kind: input, shape index: {}]   ;;  %s2002_s12 = inlined_call_operand.vmem [shape: bf16[2,32,128], index: 12, kind: input, shape index: {}]   ;;  %s2003_s13 = inlined_call_operand.vmem [shape: f32[2,1,128], index: 13, kind: input, shape index: {}]   ;;  %s2004_s14 = inlined_call_operand.vmem [shape: bf16[2,128,32], index: 14, kind: input, shape index: {}]   ;;  %s2005_s15 = inlined_call_operand.vmem [shape: f32[2,1,32], index: 15, kind: input, shape index: {}]   ;;  %s2006_s16 = inlined_call_operand.vmem [shape: f32[2,1,32], index: 16, kind: input, shape index: {}]   ;;  %s2007_s17 = inlined_call_operand.vmem [shape: f32[2,1,32], index: 17, kind: input, shape index: {}]   ;;  %s2008_s18 = inlined_call_operand.vmem [shape: f32[2,8,32], index: 18, kind: output, shape index: {}]  }
   0x1   :  { %2015 = sst [smem:[#allocation6_spill]] %s1990_s0 }
   0x2   :  { %2016 = sst [smem:[#allocation7_spill]] %s1991_s1 }
   0x3   :  { %2017 = sst [smem:[#allocation8_spill]] %s1992_s2 }
   0x4   :  { %2018 = sst [smem:[#allocation9_spill]] %s1994_s4 }
   0x5   :  { %2019 = sst [smem:[#allocation10_spill]] %s1996_s6 }
   0x6   :  { %2020 = sst [smem:[#allocation11_spill]] %s1998_s8 }
   0x7   :  { %2021 = sst [smem:[#allocation12_spill]] %s2001_s11 }
   0x8   :  { %2022 = sst [smem:[#allocation13_spill]] %s2002_s12 }
   0x9   :  { %2023 = sst [smem:[#allocation14_spill]] %s2006_s16 }
   0xa   :  { %2024 = sst [smem:[#allocation15_spill]] %s2007_s17 }
   0xb   :  { %2025 = sst [smem:[#allocation16_spill]] %s2008_s18 }
   0xc LB: > { %2026 = sst [smem:[#allocation3_spill]] %s1678_s27  ;;  %s1782_s28 = sadd.s32 4294967295, %s1678_s27   ;;  %s1678_s27 = sphi %s1776_s27, %s28_s27  }
   0xd   : > { %2027 = sst [smem:[#allocation4_spill]] %s1782_s28  ;;  %p1511_p0 = scmp.ge.s32.totalorder %s1678_s27, 1 }
   0xe   : > { %p637_p1 = scmp.lt.s32.totalorder %s1678_s27, 3 }
  0x10   : > { %p638_p2 = pnand %p1511_p0, %p637_p1 }
  0x12   : > { %641 = sbr.rel (%p638_p2) target bundleno = 1690 (0x69a), region = 92 }
  0x17   : > { %p741_p3 = scmp.lt.s32.totalorder %s1782_s28, 1  ;;  %s2028_s22 = sld [smem:[#allocation8_spill]] }
  0x18   : > { %s2029_s4 = sld [smem:[#allocation9_spill]] }
  0x19   : > { %s1788_s29 = scalar_select %p741_p3, %s1782_s28, 1 }
  0x1a   : > { %s2030_s6 = sld [smem:[#allocation10_spill]] }
  0x1b   : > { %s1609_s30 = sshll.u32 %s1788_s29, 4  ;;  %s2032_s8 = sld [smem:[#allocation11_spill]] }
  0x1c   : > { %s2034_s12 = sld [smem:[#allocation13_spill]]  ;;  %s794_s17 = scalar_lea.vmem %s2005_s15, %s1788_s29 }
  0x1d   : > { %s745_s2 = scalar_lea.vmem %s2028_s22, %s1609_s30  ;;  %s2035_s18 = sld [smem:[#allocation14_spill]] }
  0x1e   : > { %s753_s25 = scalar_lea.vmem %s2029_s4, %s1609_s30  ;;  %s2037_s20 = sld [smem:[#allocation4_spill]] }
  0x20   : > { %s1808_s16 = scalar_lea.vmem %s2030_s6, %s1609_s30 }
  0x21   : > { %2031 = sst [smem:[#allocation5_spill]] %s1808_s16  ;;  %s1817_s22 = scalar_lea.vmem %s2032_s8, %s1609_s30 }
  0x22   : > { %s1834_s19 = scalar_lea.vmem %s2034_s12, %s1609_s30  ;;  %s1614_s8 = sshll.u32 %s1788_s29, 6 }
  0x23   : > { %s1844_s4 = scalar_lea.vmem %s2004_s14, %s1614_s8  ;;  %s797_s16 = scalar_lea.vmem %s2035_s18, %s1788_s29 }
  0x24   : > { %s2036_s12 = sld [smem:[#allocation15_spill]]  ;;  %p1524_p4 = scmp.ne.s32.totalorder %s2037_s20, 0 }
  0x25   : > { %s2038_s23 = sld [smem:[#allocation7_spill]] (!%p1524_p4) }
  0x26   : > { %805 = sbr.rel (%p1524_p4) target bundleno = 46 (0x2e), region = 96 }
  0x2a   : > { %s800_s11 = scalar_lea.vmem %s2036_s12, %s1788_s29 }
  0x2b   : > { %v806_v0 = vld [vmem:[%s2038_s23] sm:$0xff]  ;;  %vm808_vm0 = vcmask 261120   ;;  %v807_v1 = vld [vmem:[%s2038_s23 + $0x8] sm:$0xff] }
  0x2c   : > { %809 = vst.msk [vmem:[#allocation2] sm:$0xff] %vm808_vm0, %v806_v0 }
  0x2d   : > { %810 = vst.msk [vmem:[#allocation2 + $0x8] sm:$0xff] %vm808_vm0, %v807_v1 }
  0x2e PF: > { %v1618_v2 = vld [vmem:[%s753_s25 + $0x8] sm:$0xff]  ;;  %v1617_v3 = vld [vmem:[%s753_s25] sm:$0xff]  ;;  %vm834_vm1 = vcmask 261120   ;;  %s2039_s18 = scalar_lea.vmem %s1995_s5, %s1788_s29  ;;  %s2041_s27 = sld [smem:[#allocation5_spill]]  ;;  %vm974_vm2 = vcmask 64512   ;;  %vm1002_vm3 = vcmask 1043456  }
  0x2f   : > { %v1616_v6 = vld [vmem:[%s745_s2 + $0x8] sm:$0xff]  ;;  %880 = vmatpush.bf16.msra.mxu2 %v1618_v2  ;;  %v1615_v7 = vld [vmem:[%s745_s2] sm:$0xff]  ;;  %s2040_s2 = scalar_lea.vmem %s1993_s3, %s1788_s29  ;;  %s2042_s30 = sld [smem:[#allocation6_spill]] }
  0x30   : > { %844 = vmatpush.bf16.msra.mxu0 %v1616_v6  ;;  %v1642_v9 = vld [vmem:[%s2039_s18] ss:$0 sm:$0xff]  ;;  %s2043_s24 = scalar_lea.vmem %s1997_s7, %s1788_s29  ;;  %v1622_v58 = vld [vmem:[%s1817_s22 + $0x8] sm:$0xff]  ;;  %s2044_s18 = scalar_lea.vmem %s1999_s9, %s1788_s29 }
  0x31   : > { %v1643_v10 = vld [vmem:[%s2040_s2] ss:$0 sm:$0xff]  ;;  %s2045_s1 = scalar_lea.vmem %s2000_s10, %s1788_s29  ;;  %s2048_s20 = scalar_lea.vmem %s2003_s13, %s1788_s29 }
  0x32   : > { %v1646_v39 = vld [vmem:[%s2043_s24] ss:$0 sm:$0xff] }
  0x33   : > { %v1865_v4 = vld [vmem:[#allocation2] sm:$0xff]  ;;  %881 = vmatpush.bf16.msra.mxu2 %v1617_v3 }
  0x34   : > { %v1867_v5 = vld [vmem:[#allocation2 + $0x8] sm:$0xff]  ;;  %845 = vmatpush.bf16.msra.mxu0 %v1615_v7  ;;  %v1619_v28 = vld [vmem:[%s2041_s27] sm:$0xff] }
  0x35   : > { %v813_v8 = vpack.c.bf16 %v1867_v5, %v1865_v4  ;;  %v1620_v27 = vld [vmem:[%s2041_s27 + $0x8] sm:$0xff]  ;;  %v1645_v29 = vld [vmem:[%s2042_s30 + $0x1] ss:$0 sm:$0xff]  ;;  %v1644_v33 = vld [vmem:[%s2042_s30] ss:$0 sm:$0xff]  ;;  %s2046_s27 = sld [smem:[#allocation12_spill]] }
  0x36   : > { %v1621_v3 = vld [vmem:[%s1817_s22] sm:$0xff] }
  0x37   : > { %1542 = vmatmul.msk.bf16.vlgmr.msra.gmra.mxu2 %vm834_vm1, %v813_v8  ;;  %1533 = vmatmul.msk.bf16.vlgmr.msra.gmra.mxu0 %vm834_vm1, %v813_v8 }
  0x38   : > { %914 = vmatpush.bf16.msrb.mxu2 %v1620_v27 }
  0x3b   : > { %s2047_s26 = scalar_lea.vmem %s2046_s27, %s1788_s29 }
  0x3c   : > { %915 = vmatpush.bf16.msrb.mxu2 %v1619_v28 }
  0x47   : > { %1551 = vmatmul.msk.bf16.vlgmr.msrb.gmra.mxu2 %vm834_vm1, %v813_v8 }
  0xb4   : > { %v847_v11 = vpop.f32.mrf.mxu0 }
  0xb5   : > { %v848_v14 = vadd.f32 %v1643_v10, %v847_v11  ;;  %v1647_v11 = vld [vmem:[%s2044_s18] ss:$0 sm:$0xff] }
  0xb7   : > { %v852_v16 = vmul.f32 0.17677669, %v848_v14 }
  0xb9   : > { %v922_v20 = vpack.c.bf16 %v852_v16, %v852_v16 }
  0xba   : > { %v883_v12 = vpop.f32.mrf.mxu2 }
  0xbb   : > { %v884_v13 = vadd.f32 %v1642_v9, %v883_v12 }
  0xbc   : > { %v849_v19 = vpop.f32.mrf.mxu0 }
  0xbd   : > { %v924_v15 = vpack.c.bf16 %v884_v13, %v884_v13  ;;  %v850_v23 = vadd.f32 %v1643_v10, %v849_v19 }
  0xbf   : > { %v940_v17 = vsel %vm834_vm1, %v924_v15, 0  ;;  %v853_v25 = vmul.f32 0.17677669, %v850_v23 }
  0xc0   : > { %949 = vmatpush.bf16.xpose.msra.mxu3 %v940_v17 }
  0xc1   : > { %v923_v26 = vpack.c.bf16 %v853_v25, %v853_v25 }
  0xc2   : > { %v885_v18 = vpop.f32.mrf.mxu2 }
  0xc3   : > { %v886_v21 = vadd.f32 %v1642_v9, %v885_v18 }
  0xc5   : > { %v925_v22 = vpack.c.bf16 %v886_v21, %v886_v21 }
  0xc7   : > { %1552 = vmatmul.msk.bf16.vlgmr.msra.gmra.mxu3 %vm834_vm1, %v922_v20  ;;  %v959_v24 = vsel %vm834_vm1, %v925_v22, 0  ;;  %v1680_v20 = vmov 32.0  }
  0xc8   : > { %968 = vmatpush.bf16.xpose.msrb.mxu0 %v959_v24  ;;  %1068 = vmatpush.bf16.msrb.mxu3 %v1622_v58 }
  0xca   : > { %v917_v42 = vpop.f32.mrf.mxu2 }
  0xcb   : > { %v918_v43 = vadd.f32 %v1646_v39, %v917_v42 }
  0xcc   : > { %1069 = vmatpush.bf16.msrb.mxu3 %v1621_v3 }
  0xcd   : > { %v926_v45 = vpack.c.bf16 %v918_v43, %v918_v43  ;;  %v1631_v43 = vld [vmem:[%s1844_s4 + $0x30] sm:$0xff] }
  0xcf   : > { %1553 = vmatmul.msk.bf16.vlgmr.msrb.gmra.mxu0 %vm834_vm1, %v923_v26  ;;  %v1004_v46 = vsel %vm1002_vm3, %v926_v45, 0 }
  0xd0   : > { %1013 = vmatpush.bf16.msra.mxu1 %v1004_v46 }
  0xd2   : > { %v919_v49 = vpop.f32.mrf.mxu2 }
  0xd3   : > { %v920_v50 = vadd.f32 %v1646_v39, %v919_v49 }
  0xd5   : > { %v927_v54 = vpack.c.bf16 %v920_v50, %v920_v50  ;;  %v1629_v50 = vld [vmem:[%s1844_s4 + $0x20] sm:$0xff] }
  0xd7   : > { %v1023_v55 = vsel %vm1002_vm3, %v927_v54, 0 }
  0xd8   : > { %1032 = vmatpush.bf16.msra.mxu2 %v1023_v55 }
 0x14a   : > { %v951_v30 = vpop.f32.mrf.mxu3 }
 0x14b   : > { %v952_v36 = vadd.f32 %v1644_v33, %v951_v30 }
 0x14c   : > { %v970_v31 = vpop.f32.mrf.mxu0 }
 0x14d   : > { %v971_v32 = vadd.f32 %v1645_v29, %v970_v31  ;;  %v975_v38 = vsel %vm974_vm2, %v952_v36, -inf }
 0x14f   : > { %v978_v34 = vsel %vm974_vm2, %v971_v32, -inf }
 0x150   : > { %979 = vmax.xlane.f32.xlu0 %v978_v34 }
 0x152   : > { %v953_v35 = vpop.f32.mrf.mxu3 }
 0x153   : > { %v1624_v35 = vld [vmem:[%s1834_s19 + $0x8] sm:$0xff] }
 0x154   : > { %v972_v37 = vpop.f32.mrf.mxu0  ;;  %1171 = vmatpush.bf16.msra.mxu0 %v1624_v35 }
 0x158   : > { %976 = vmax.xlane.f32.xlu0 %v975_v38  ;;  %v1623_v38 = vld [vmem:[%s1834_s19] sm:$0xff] }
 0x159   : > { %1172 = vmatpush.bf16.msra.mxu0 %v1623_v38 }
 0x1c3   : > { %v980_v40 = vpop.xlane.xlu0 %979 }
 0x1c4   : > { %v982_v41 = vsub.f32 %v971_v32, %v980_v40  ;;  %v1632_v40 = vld [vmem:[%s1844_s4 + $0x38] sm:$0xff] }
 0x1c5   : > { %1250 = vmatpush.bf16.msrb.mxu1 %v1632_v40 }
 0x1c6   : > { %v985_v44 = vmul.f32 1.442695, %v982_v41 }
 0x1c8   : > { %1654 = vpow2.f32 %v985_v44 }
 0x1c9   : > { %1251 = vmatpush.bf16.msrb.mxu1 %v1631_v43 }
 0x1cb   : > { %v977_v47 = vpop.xlane.xlu0 %976 }
 0x1cc   : > { %v981_v48 = vsub.f32 %v952_v36, %v977_v47  ;;  %v1630_v47 = vld [vmem:[%s1844_s4 + $0x28] sm:$0xff] }
 0x1cd   : > { %1252 = vmatpush.bf16.msrb.mxu1 %v1630_v47 }
 0x1ce   : > { %v1655_v51 = vpop.eup %1654  ;;  %v983_v52 = vmul.f32 1.442695, %v981_v48 }
 0x1cf   : > { %v990_v53 = vsel %vm974_vm2, %v1655_v51, 0.0 }
 0x1d0   : > { %1656 = vpow2.f32 %v983_v52  ;;  %991 = vadd.xlane.f32.xlu1 %v990_v53 }
 0x1d1   : > { %1253 = vmatpush.bf16.msrb.mxu1 %v1629_v50 }
 0x1d6   : > { %v1657_v56 = vpop.eup %1656 }
 0x1d7   : > { %v987_v57 = vsel %vm974_vm2, %v1657_v56, 0.0 }
 0x1d8   : > { %988 = vadd.xlane.f32.xlu1 %v987_v57 }
 0x243   : > { %v992_v59 = vpop.xlane.xlu1 %991 }
 0x244   : > { %1658 = vrcp.f32 %v992_v59  ;;  %v1648_v59 = vld [vmem:[%s2045_s1] ss:$0 sm:$0xff] }
 0x24a   : > { %v1659_v60 = vpop.eup %1658 }
 0x24b   : > { %v996_v61 = vmul.f32 %v1659_v60, %v1655_v51  ;;  %v989_v62 = vpop.xlane.xlu1 %988 }
 0x24c   : > { %1660 = vrcp.f32 %v989_v62 }
 0x24d   : > { %v998_v63 = vpack.c.bf16 %v996_v61, %v996_v61  ;;  %1662 = vrcp.f32 %v1680_v20  ;;  %v1651_v20 = vld [vmem:[%s794_s17] ss:$0 sm:$0xff] }
 0x24f   : > { %1555 = vmatmul.msk.bf16.vlgmr.msra.gmra.mxu2 %vm974_vm2, %v998_v63  ;;  %v1649_v63 = vld [vmem:[%s2047_s26] ss:$0 sm:$0xff] }
 0x252   : > { %v1661_v0 = vpop.eup %1660 }
 0x253   : > { %v995_v1 = vmul.f32 %v1661_v0, %v1657_v56  ;;  %v1663_v21 = vpop.eup %1662 }
 0x254   : > { %v1087_v22 = vmul.f32 32.0, %v1663_v21  ;;  %vm1091_vm4 = vweird.f32 %v1663_v21 }
 0x255   : > { %v997_v2 = vpack.c.bf16 %v995_v1, %v995_v1 }
 0x256   : > { %v1088_v23 = vsub.f32 1.0, %v1087_v22 }
 0x257   : > { %1554 = vmatmul.msk.bf16.vlgmr.msra.gmra.mxu1 %vm974_vm2, %v997_v2 }
 0x258   : > { %v1089_v24 = vmul.f32 %v1663_v21, %v1088_v23 }
 0x25a   : > { %v1090_v25 = vadd.f32 %v1663_v21, %v1089_v24 }
 0x2d2   : > { %v1034_v6 = vpop.f32.mrf.mxu2 }
 0x2d4   : > { %v1015_v7 = vpop.f32.mrf.mxu1 }
 0x2d5   : > { %v1038_v8 = vpack.c.bf16 %v1034_v6, %v1015_v7 }
 0x2d7   : > { %1564 = vmatmul.msk.bf16.vlgmr.msrb.gmra.mxu3 %vm834_vm1, %v1038_v8  ;;  %v1628_v8 = vld [vmem:[%s1844_s4 + $0x18] sm:$0xff] }
 0x2d8   : > { %1254 = vmatpush.bf16.msrb.mxu1 %v1628_v8 }
 0x2da   : > { %v1036_v9 = vpop.f32.mrf.mxu2 }
 0x2db   : > { %v1627_v9 = vld [vmem:[%s1844_s4 + $0x10] sm:$0xff] }
 0x2dc   : > { %v1017_v10 = vpop.f32.mrf.mxu1  ;;  %1255 = vmatpush.bf16.msrb.mxu1 %v1627_v9 }
 0x2dd   : > { %v1626_v10 = vld [vmem:[%s1844_s4 + $0x8] sm:$0xff] }
 0x2e0   : > { %1256 = vmatpush.bf16.msrb.mxu1 %v1626_v10 }
 0x35a   : > { %v1071_v12 = vpop.f32.mrf.mxu3 }
 0x35b   : > { %v1072_v13 = vadd.f32 %v1647_v11, %v1071_v12 }
 0x35d   : > { %v1076_v14 = vadd.f32 %v1072_v13, %v1865_v4  ;;  %v1919_v4 = vsel %vm1091_vm4, %v1663_v21, %v1090_v25  ;;  %v1650_v13 = vld [vmem:[%s2048_s20] ss:$0 sm:$0xff] }
 0x35f   : > { %v1080_v15 = vsel %vm834_vm1, %v1076_v14, 0.0 }
 0x360   : > { %1081 = vadd.xlane.f32.xlu2 %v1080_v15 }
 0x362   : > { %v1073_v16 = vpop.f32.mrf.mxu3 }
 0x363   : > { %v1074_v17 = vadd.f32 %v1647_v11, %v1073_v16  ;;  %v1625_v11 = vld [vmem:[%s1844_s4] sm:$0xff] }
 0x364   : > { %1257 = vmatpush.bf16.msrb.mxu1 %v1625_v11 }
 0x365   : > { %v1077_v18 = vadd.f32 %v1074_v17, %v1867_v5 }
 0x367   : > { %v1083_v19 = vsel %vm834_vm1, %v1077_v18, 0.0 }
 0x368   : > { %1084 = vadd.xlane.f32.xlu2 %v1083_v19 }
 0x3d3   : > { %v1082_v26 = vpop.xlane.xlu2 %1081 }
 0x3d4   : > { %v1093_v27 = vmul.f32 %v1919_v4, %v1082_v26 }
 0x3d6   : > { %v1095_v28 = vsub.f32 %v1076_v14, %v1093_v27 }
 0x3d8   : > { %v1097_v5 = vmul.f32 %v1095_v28, %v1095_v28 }
 0x3da   : > { %v1099_v29 = vsel %vm834_vm1, %v1097_v5, 0.0 }
 0x3db   : > { %1100 = vadd.xlane.f32.xlu0 %v1099_v29  ;;  %v1085_v30 = vpop.xlane.xlu2 %1084 }
 0x3dc   : > { %v1094_v31 = vmul.f32 %v1919_v4, %v1085_v30 }
 0x3de   : > { %v1096_v32 = vsub.f32 %v1077_v18, %v1094_v31 }
 0x3e0   : > { %v1098_v33 = vmul.f32 %v1096_v32, %v1096_v32 }
 0x3e2   : > { %v1102_v34 = vsel %vm834_vm1, %v1098_v33, 0.0 }
 0x3e3   : > { %1103 = vadd.xlane.f32.xlu1 %v1102_v34 }
 0x44e   : > { %v1101_v36 = vpop.xlane.xlu0 %1100 }
 0x44f   : > { %v1105_v37 = vmul.f32 %v1101_v36, %v1919_v4 }
 0x451   : > { %v1107_v39 = vadd.f32 1e-05, %v1105_v37 }
 0x453   : > { %1664 = vrsqrt.f32 %v1107_v39  ;;  %vm1115_vm6 = vweird.f32 %v1107_v39 }
 0x456   : > { %v1104_v41 = vpop.xlane.xlu1 %1103 }
 0x457   : > { %v1106_v42 = vmul.f32 %v1104_v41, %v1919_v4 }
 0x459   : > { %v1665_v44 = vpop.eup %1664  ;;  %v1108_v45 = vadd.f32 1e-05, %v1106_v42 }
 0x45a   : > { %v1110_v46 = vmul.f32 %v1665_v44, %v1107_v39  ;;  %vm1116_vm5 = vweird.f32 %v1665_v44 }
 0x45b   : > { %1666 = vrsqrt.f32 %v1108_v45  ;;  %vm1117_vm7 = vmor %vm1115_vm6, %vm1116_vm5  ;;  %vm1125_vm9 = vweird.f32 %v1108_v45 }
 0x45c   : > { %v1111_v48 = vmul.f32 %v1665_v44, %v1110_v46 }
 0x45e   : > { %v1112_v49 = vmul.f32 0.5, %v1111_v48 }
 0x460   : > { %v1113_v51 = vsub.f32 1.5, %v1112_v49 }
 0x461   : > { %v1667_v52 = vpop.eup %1666 }
 0x462   : > { %v1114_v53 = vmul.f32 %v1665_v44, %v1113_v51  ;;  %v1120_v54 = vmul.f32 %v1667_v52, %v1108_v45  ;;  %vm1126_vm8 = vweird.f32 %v1667_v52 }
 0x463   : > { %vm1127_vm10 = vmor %vm1125_vm9, %vm1126_vm8 }
 0x464   : > { %v1121_v55 = vmul.f32 %v1667_v52, %v1120_v54  ;;  %v1118_v56 = vsel %vm1117_vm7, %v1665_v44, %v1114_v53  ;;  %v1653_v54 = vld [vmem:[%s800_s11] ss:$0 sm:$0xff] }
 0x465   : > { %v1129_v60 = vmul.f32 %v1118_v56, %v1095_v28 }
 0x466   : > { %v1122_v57 = vmul.f32 0.5, %v1121_v55 }
 0x467   : > { %v1134_v0 = vmul.f32 %v1648_v59, %v1129_v60 }
 0x468   : > { %v1123_v58 = vsub.f32 1.5, %v1122_v57 }
 0x469   : > { %v1139_v3 = vadd.f32 %v1649_v63, %v1134_v0 }
 0x46a   : > { %v1124_v61 = vmul.f32 %v1667_v52, %v1123_v58 }
 0x46c   : > { %v1128_v62 = vsel %vm1127_vm10, %v1667_v52, %v1124_v61  ;;  %v1652_v52 = vld [vmem:[%s797_s16] ss:$0 sm:$0xff]  ;;  %s2051_s16 = sld [smem:[#allocation4_spill]] }
 0x46d   : > { %v1130_v1 = vmul.f32 %v1128_v62, %v1096_v32 }
 0x46f   : > { %v1135_v2 = vmul.f32 %v1648_v59, %v1130_v1 }
 0x471   : > { %v1140_v6 = vadd.f32 %v1649_v63, %v1135_v2 }
 0x472   : > { %p1606_p5 = scmp.ne.s32.totalorder %s2051_s16, 1 }
 0x473   : > { %v1141_v7 = vpack.c.bf16 %v1140_v6, %v1139_v3  ;;  %s2052_s22 = sld [smem:[#allocation16_spill]] (!%p1606_p5) }
 0x475   : > { %1573 = vmatmul.msk.bf16.vlgmr.msra.gmra.mxu0 %vm834_vm1, %v1141_v7 }
 0x4f2   : > { %v1174_v12 = vpop.f32.mrf.mxu0 }
 0x4f3   : > { %v1175_v14 = vadd.f32 %v1650_v13, %v1174_v12 }
 0x4f5   : > { %v1179_v17 = vmax.f32 %v1175_v14, 0.0 }
 0x4fa   : > { %v1176_v15 = vpop.f32.mrf.mxu0 }
 0x4fb   : > { %v1177_v16 = vadd.f32 %v1650_v13, %v1176_v15 }
 0x4fd   : > { %v1180_v18 = vmax.f32 %v1177_v16, 0.0 }
 0x4ff   : > { %v1181_v19 = vpack.c.bf16 %v1180_v18, %v1179_v17 }
 0x501   : > { %1258 = vmatmul.bf16.vlgmr.msrb.gmra.mxu1 %v1181_v19 }
 0x57e   : > { %v1259_v21 = vpop.f32.mrf.mxu1 }
 0x57f   : > { %v1260_v22 = vadd.f32 %v1651_v20, %v1259_v21 }
 0x581   : > { %v1264_v23 = vadd.f32 %v1260_v22, %v1139_v3 }
 0x583   : > { %v1268_v24 = vsel %vm834_vm1, %v1264_v23, 0.0 }
 0x584   : > { %1269 = vadd.xlane.f32.xlu2 %v1268_v24 }
 0x586   : > { %v1261_v25 = vpop.f32.mrf.mxu1 }
 0x587   : > { %v1262_v26 = vadd.f32 %v1651_v20, %v1261_v25 }
 0x589   : > { %v1265_v27 = vadd.f32 %v1262_v26, %v1140_v6 }
 0x58b   : > { %v1271_v28 = vsel %vm834_vm1, %v1265_v27, 0.0 }
 0x58c   : > { %1272 = vadd.xlane.f32.xlu0 %v1271_v28 }
 0x5f7   : > { %v1270_v5 = vpop.xlane.xlu2 %1269 }
 0x5f8   : > { %v1274_v29 = vmul.f32 %v1270_v5, %v1919_v4 }
 0x5fa   : > { %v1276_v30 = vsub.f32 %v1264_v23, %v1274_v29 }
 0x5fc   : > { %v1278_v31 = vmul.f32 %v1276_v30, %v1276_v30 }
 0x5fe   : > { %v1280_v32 = vsel %vm834_vm1, %v1278_v31, 0.0 }
 0x5ff   : > { %v1273_v33 = vpop.xlane.xlu0 %1272  ;;  %1281 = vadd.xlane.f32.xlu1 %v1280_v32 }
 0x600   : > { %v1275_v34 = vmul.f32 %v1273_v33, %v1919_v4 }
 0x602   : > { %v1277_v35 = vsub.f32 %v1265_v27, %v1275_v34 }
 0x604   : > { %v1279_v36 = vmul.f32 %v1277_v35, %v1277_v35 }
 0x606   : > { %v1283_v37 = vsel %vm834_vm1, %v1279_v36, 0.0 }
 0x607   : > { %1284 = vadd.xlane.f32.xlu2 %v1283_v37 }
 0x672   : > { %v1282_v38 = vpop.xlane.xlu1 %1281 }
 0x673   : > { %v1286_v39 = vmul.f32 %v1282_v38, %v1919_v4 }
 0x675   : > { %v1288_v40 = vadd.f32 1e-05, %v1286_v39 }
 0x677   : > { %1668 = vrsqrt.f32 %v1288_v40  ;;  %vm1296_vm12 = vweird.f32 %v1288_v40 }
 0x67a   : > { %v1285_v41 = vpop.xlane.xlu2 %1284 }
 0x67b   : > { %v1287_v42 = vmul.f32 %v1285_v41, %v1919_v4 }
 0x67d   : > { %v1669_v43 = vpop.eup %1668  ;;  %v1289_v44 = vadd.f32 1e-05, %v1287_v42 }
 0x67e   : > { %v1291_v45 = vmul.f32 %v1669_v43, %v1288_v40  ;;  %vm1297_vm11 = vweird.f32 %v1669_v43 }
 0x67f   : > { %1670 = vrsqrt.f32 %v1289_v44  ;;  %vm1298_vm13 = vmor %vm1296_vm12, %vm1297_vm11  ;;  %vm1306_vm15 = vweird.f32 %v1289_v44 }
 0x680   : > { %v1292_v46 = vmul.f32 %v1669_v43, %v1291_v45 }
 0x682   : > { %v1293_v47 = vmul.f32 0.5, %v1292_v46 }
 0x684   : > { %v1294_v48 = vsub.f32 1.5, %v1293_v47 }
 0x685   : > { %v1671_v49 = vpop.eup %1670 }
 0x686   : > { %v1295_v50 = vmul.f32 %v1669_v43, %v1294_v48  ;;  %v1301_v51 = vmul.f32 %v1671_v49, %v1289_v44  ;;  %vm1307_vm14 = vweird.f32 %v1671_v49 }
 0x687   : > { %vm1308_vm0 = vmor %vm1306_vm15, %vm1307_vm14 }
 0x688   : > { %v1299_v4 = vsel %vm1298_vm13, %v1669_v43, %v1295_v50  ;;  %v1302_v53 = vmul.f32 %v1671_v49, %v1301_v51 }
 0x689   : > { %v1310_v55 = vmul.f32 %v1299_v4, %v1276_v30 }
 0x68a   : > { %v1303_v56 = vmul.f32 0.5, %v1302_v53 }
 0x68b   : > { %v1315_v57 = vmul.f32 %v1652_v52, %v1310_v55 }
 0x68c   : > { %v1304_v58 = vsub.f32 1.5, %v1303_v56 }
 0x68d   : > { %v1320_v59 = vadd.f32 %v1653_v54, %v1315_v57 }
 0x68e   : > { %v1305_v60 = vmul.f32 %v1671_v49, %v1304_v58 }
 0x68f   : > { %1322 = vst.msk [vmem:[#allocation2] sm:$0xff] %vm834_vm1, %v1320_v59 }
 0x690   : > { %v1309_v61 = vsel %vm1308_vm0, %v1671_v49, %v1305_v60 }
 0x691   : > { %v1311_v62 = vmul.f32 %v1309_v61, %v1277_v35 }
 0x693   : > { %v1316_v63 = vmul.f32 %v1652_v52, %v1311_v62  ;;  %1327 = sbr.rel (%p1606_p5) target bundleno = 1690 (0x69a), region = 100 }
 0x695   : > { %v1321_v0 = vadd.f32 %v1653_v54, %v1316_v63 }
 0x697   : > { %1323 = vst.msk [vmem:[#allocation2 + $0x8] sm:$0xff] %vm834_vm1, %v1321_v0 }
 0x698   : > { %1328 = vst.msk [vmem:[%s2052_s22] sm:$0xff] %vm834_vm1, %v1320_v59 }
 0x699   : > { %1329 = vst.msk [vmem:[%s2052_s22 + $0x8] sm:$0xff] %vm834_vm1, %v1321_v0 }
 0x69a PF: > { %s2053_s25 = sld [smem:[#allocation3_spill]] }
 0x6a0   : > { %s28_s27 = sadd.s32 1, %s2053_s25  }
 0x6a1   : > { %p25_p6 = scmp.ge.s32.totalorder %s28_s27, 4  }
 0x6a3   :  { %27 = sbr.rel (!%p25_p6) target bundleno = 12 (0xc), region = 171 }

// kernel: transformer_model_forward.3
= control target key start
LH: loop header
LB: loop body
LE: loop exit
PB: predicated region body
PF: predicated region fallthrough
CT: control target
= control target key end

     0   :  { %s3275_s0 = inlined_call_operand.vmem [shape: f32[2,8,32], index: 0, kind: input, shape index: {}]   ;;  %s3276_s1 = inlined_call_operand.vmem [shape: bf16[32,16], index: 1, kind: input, shape index: {}]   ;;  %s3277_s2 = inlined_call_operand.vmem [shape: f32[1,16], index: 2, kind: input, shape index: {}]   ;;  %s3278_s3 = inlined_call_operand.vmem [shape: bf16[16,64], index: 3, kind: input, shape index: {}]   ;;  %s3279_s4 = inlined_call_operand.vmem [shape: bf16[16,64], index: 4, kind: input, shape index: {}]   ;;  %s3280_s5 = inlined_call_operand.vmem [shape: f32[1,64], index: 5, kind: input, shape index: {}]   ;;  %s3281_s6 = inlined_call_operand.vmem [shape: bf16[32,64], index: 6, kind: input, shape index: {}]   ;;  %s3282_s7 = inlined_call_operand.vmem [shape: f32[1,64], index: 7, kind: input, shape index: {}]   ;;  %s3283_s8 = inlined_call_operand.vmem [shape: f32[1,16], index: 8, kind: input, shape index: {}]   ;;  %s3284_s9 = inlined_call_operand.vmem [shape: f32[1,16], index: 9, kind: input, shape index: {}]   ;;  %s3285_s10 = inlined_call_operand.vmem [shape: bf16[16,128], index: 10, kind: input, shape index: {}]   ;;  %s3286_s11 = inlined_call_operand.vmem [shape: f32[1,128], index: 11, kind: input, shape index: {}]   ;;  %s3287_s12 = inlined_call_operand.vmem [shape: bf16[128,32], index: 12, kind: input, shape index: {}]   ;;  %s3288_s13 = inlined_call_operand.vmem [shape: f32[1,32], index: 13, kind: input, shape index: {}]   ;;  %s3289_s14 = inlined_call_operand.vmem [shape: f32[1,32], index: 14, kind: input, shape index: {}]   ;;  %s3290_s15 = inlined_call_operand.vmem [shape: f32[1,32], index: 15, kind: input, shape index: {}]   ;;  %s3291_s16 = inlined_call_operand.vmem [shape: bf16[32,128], index: 16, kind: input, shape index: {}]   ;;  %s3292_s17 = inlined_call_operand.vmem [shape: f32[1,128], index: 17, kind: input, shape index: {}]   ;;  %s3293_s18 = inlined_call_operand.hbm [shape: f32[2,8,128], index: 18, kind: output, shape index: {}]  }
   0x1   :  { %3301 = sst [smem:[#allocation12_spill]] %s3275_s0 }
   0x2   :  { %3302 = sst [smem:[#allocation13_spill]] %s3276_s1 }
   0x3   :  { %3303 = sst [smem:[#allocation14_spill]] %s3277_s2 }
   0x4   :  { %3304 = sst [smem:[#allocation15_spill]] %s3278_s3 }
   0x5   :  { %3305 = sst [smem:[#allocation16_spill]] %s3279_s4 }
   0x6   :  { %23 = vsyncpa [#allocation4], 0 }
   0x7   :  { %25 = vsyncpa [#allocation4 + $0x1], 0  ;;  %s2814_s27 = smov 0   ;;  %s2816_s28 = smov 0  }
   0x8   :  { %s2818_s29 = smov 0   ;;  %s2820_s30 = smov 0  }
   0x9 LB: > { %3306 = sst [smem:[#allocation6_spill]] %s2698_s27  ;;  %s2835_s0 = sadd.s32 4294967295, %s2710_s30   ;;  %s2710_s30 = sphi %s2820_s30, %s3322_s30   ;;  %s2706_s29 = sphi %s2818_s29, %s3324_s29   ;;  %s2702_s28 = sphi %s2816_s28, %s3326_s28   ;;  %s2698_s27 = sphi %s2814_s27, %s3325_s27  }
   0xa   : > { %3307 = sst [smem:[#allocation7_spill]] %s2706_s29  ;;  %s2221_s19 = sadd.s32 4294967294, %s2710_s30  }
   0xb   : > { %3308 = sst [smem:[#allocation8_spill]] %s2710_s30  ;;  %s2839_s1 = sadd.s32 1, %s2710_s30  }
   0xc   : > { %3309 = sst [smem:[#allocation9_spill]] %s2839_s1  ;;  %s421_s20 = sadd.s32 1, %s2706_s29 }
   0xd   : > { %s418_s21 = ssub.s32 %s2710_s30, %s2839_s1  ;;  %p431_p0 = scmp.ne.s32.totalorder %s2706_s29, %s2702_s28 }
   0xe   : > { %p419_p1 = scmp.eq.s32.totalorder %s418_s21, 0  ;;  %p432_p2 = scmp.eq.s32.totalorder %s2835_s0, 1 }
   0xf   : > { %p437_p3 = scmp.ne.s32.totalorder %s2702_s28, %s2698_s27  ;;  %p438_p4 = scmp.eq.s32.totalorder %s2221_s19, 1 }
  0x10   : > { %s2850_s22 = scalar_select %p419_p1, %s2706_s29, %s421_s20  }
  0x11   : > { %p2852_p5 = por %p432_p2, %p431_p0  ;;  %p2856_p6 = por %p438_p4, %p437_p3 }
  0x12   : > { %3310 = sst [smem:[#allocation10_spill]] %s2850_s22  ;;  %p2224_p7 = scmp.ge.s32.totalorder %s2710_s30, 1 }
  0x13   : > { %s3312_s23 = scalar_select %p2856_p6, 1, 0 }
  0x14   : > { %p514_p8 = scmp.lt.s32.totalorder %s2710_s30, 3 }
  0x15   : > { %3313 = sst [smem:[#allocation11_spill]] %s3312_s23 }
  0x16   : > { %p515_p9 = pnand %p2224_p7, %p514_p8 }
  0x17   : > { %s3314_s26 = sld [smem:[#allocation13_spill]] (!%p515_p9)  ;;  %p567_p10 = scmp.lt.s32.totalorder (!%p515_p9), %s2835_s0, 1 }
  0x18   : > { %518 = sbr.rel (%p515_p9) target bundleno = 6481 (0x1951), region = 92  ;;  %s3315_s4 = sld [smem:[#allocation16_spill]] (!%p515_p9) }
  0x19   : > { %s3316_s30 = sld [smem:[#allocation12_spill]] (!%p515_p9)  ;;  %s2714_s23 = smov (!%p515_p9), 16  }
  0x1a   : > { %s3317_s3 = sld [smem:[#allocation15_spill]] (!%p515_p9)  ;;  %s2715_s21 = smov (!%p515_p9), 32  }
  0x1b   : > { %s3318_s20 = sld [smem:[#allocation14_spill]] (!%p515_p9)  ;;  %s2415_s19 = sshll.u32 (!%p515_p9), %s2835_s0, 3 }
  0x1c   : > { %s2668_s27 = scalar_lea.hbm (!%p515_p9), %s3293_s18, 16 }
  0x1d   : > { %v2419_v0 = vld [vmem:[%s3314_s26 + $0x8] sm:$0xff]  ;;  %v2418_v2 = vld [vmem:[%s3314_s26] sm:$0xff]  ;;  %s568_s29 = scalar_select %p567_p10, %s2835_s0, 1  ;;  %v2712_v3 = vmov 0   ;;  %vm594_vm0 = vcmask 261120   ;;  %vm624_vm1 = vcmask 130048  }
  0x1e   : > { %v2421_v1 = vld [vmem:[%s3315_s4] sm:$0xff]  ;;  %604 = vmatpush.bf16.msra.mxu0 %v2419_v0  ;;  %v2423_v43 = vld [vmem:[%s3281_s6 + $0x8] sm:$0xff] }
  0x1f   : > { %659 = vmatpush.bf16.msra.mxu2 %v2421_v1  ;;  %s2226_s1 = sshll.u32 %s568_s29, 3  ;;  %v2503_v14 = vld [vmem:[%s3280_s5] ss:$0 sm:$0xff]  ;;  %s2716_s29 = smov 80  }
  0x20   : > { %s2876_s24 = scalar_lea.vmem %s3316_s30, %s2226_s1  ;;  %v2420_v6 = vld [vmem:[%s3317_s3] sm:$0xff]  ;;  %s2713_s1 = smov 96  }
  0x21   : > { %v572_v4 = vld [vmem:[%s2876_s24] sm:$0xff]  ;;  %635 = vmatpush.bf16.msra.mxu1 %v2420_v6  ;;  %s2157_s30 = scalar_lea.hbm %s3293_s18, %s2415_s19 }
  0x22   : > { %660 = vmatmul.bf16.vlgmr.msra.gmra.mxu2 %v2712_v3  ;;  %605 = vmatpush.bf16.msra.mxu0 %v2418_v2  ;;  %v573_v5 = vpack.c.bf16 %v572_v4, %v572_v4  ;;  %v2502_v7 = vld [vmem:[%s3318_s20] ss:$0 sm:$0xff] }
  0x23   : > { %v2424_v39 = vld [vmem:[%s3315_s4] sm:$0xff]  ;;  %735 = vmatpush.bf16.msrb.mxu2 %v2423_v43  ;;  %v2426_v43 = vld [vmem:[%s3281_s6 + $0x8] sm:$0xff] }
  0x24   : > { %v2422_v44 = vld [vmem:[%s3281_s6] sm:$0xff] }
  0x25   : > { %2235 = vmatmul.msk.bf16.vlgmr.msra.gmra.mxu0 %vm594_vm0, %v573_v5  ;;  %807 = vmatpush.bf16.msrb.mxu1 %v2424_v39  ;;  %v713_v54 = vld [vmem:[%s3282_s7] sm:$0x1] }
  0x27   : > { %736 = vmatpush.bf16.msrb.mxu2 %v2422_v44  ;;  %v2425_v44 = vld [vmem:[%s3281_s6] sm:$0xff] }
  0x2b   : > { %896 = vmatpush.bf16.msra.mxu2 %v2426_v43 }
  0x2f   : > { %897 = vmatpush.bf16.msra.mxu2 %v2425_v44 }
  0xa2   : > { %v607_v8 = vpop.f32.mrf.mxu0 }
  0xa3   : > { %v608_v9 = vadd.f32 %v2502_v7, %v607_v8 }
  0xa5   : > { %v661_v10 = vpop.f32.mrf.mxu2  ;;  %v611_v11 = vpack.c.bf16 %v608_v9, %v608_v9 }
  0xa7   : > { %2240 = vmatmul.msk.bf16.vlgmr.msra.gmra.mxu1 %vm624_vm1, %v611_v11 }
  0xaa   : > { %v609_v12 = vpop.f32.mrf.mxu0 }
  0xad   : > { %v663_v13 = vpop.f32.mrf.mxu2 }
 0x124   : > { %v637_v15 = vpop.f32.mrf.mxu1 }
 0x125   : > { %v2890_v16 = vadd.f32 %v2503_v14, %v637_v15 }
 0x127   : > { %v665_v17 = vadd.f32 %v661_v10, %v2890_v16 }
 0x129   : > { %2511 = vtanh.f32 %v665_v17  ;;  %v2245_v20 = vmul.f32 -1.442695, %v665_v17 }
 0x12b   : > { %2513 = vpow2.f32 %v2245_v20 }
 0x12c   : > { %v639_v18 = vpop.f32.mrf.mxu1 }
 0x12f   : > { %v2512_v19 = vpop.eup %2511 }
 0x130   : > { %688 = vrot.lane.b32.xlu0 %v2512_v19, %s2713_s1 }
 0x131   : > { %v2514_v21 = vpop.eup %2513 }
 0x132   : > { %v669_v22 = vadd.f32 1.0, %v2514_v21 }
 0x134   : > { %2515 = vrcp.f32 %v669_v22  ;;  %v681_v28 = vand.u32 2147483648, %v669_v22  ;;  %vm675_vm3 = vweird.f32 %v669_v22  ;;  %v679_v29 = vand.u32 2147483647, %v669_v22 }
 0x136   : > { %v682_v31 = vor.u32 1.1754944e-38, %v681_v28  ;;  %vm680_vm5 = vcmp.eq.f32.partialorder %v679_v29, 8.507059e+37 }
 0x13a   : > { %v2516_v23 = vpop.eup %2515 }
 0x13b   : > { %v671_v24 = vmul.f32 %v2516_v23, %v669_v22  ;;  %vm676_vm2 = vweird.f32 %v2516_v23 }
 0x13c   : > { %vm677_vm4 = vmor %vm675_vm3, %vm676_vm2 }
 0x13d   : > { %v672_v25 = vsub.f32 1.0, %v671_v24 }
 0x13f   : > { %v673_v26 = vmul.f32 %v2516_v23, %v672_v25 }
 0x141   : > { %v674_v27 = vadd.f32 %v2516_v23, %v673_v26 }
 0x143   : > { %v678_v30 = vsel %vm677_vm4, %v2516_v23, %v674_v27 }
 0x144   : > { %v683_v33 = vsel %vm680_vm5, %v682_v31, %v678_v30 }
 0x145   : > { %v686_v35 = vmul.f32 0.0, %v683_v33 }
 0x1a2   : > { %v689_v32 = vpop.permute.xlu0 %688 }
 0x1a3   : > { %v691_v34 = vmul.f32 %v689_v32, %v683_v33 }
 0x1a5   : > { %693 = vrot.lane.b32.xlu0 %v691_v34, %s2714_s23 }
 0x217   : > { %v694_v36 = vpop.permute.xlu0 %693 }
 0x218   : > { %v2895_v37 = vadd.f32 %v694_v36, %v686_v35 }
 0x21a   : > { %2517 = vtanh.f32 %v2895_v37  ;;  %v838_v26 = vrot.slane %v2895_v37, 7 }
 0x220   : > { %v2518_v38 = vpop.eup %2517 }
 0x221   : > { %699 = vrot.lane.b32.xlu1 %v2518_v38, %s2715_s21 }
 0x293   : > { %v700_v40 = vpop.permute.xlu1 %699 }
 0x294   : > { %v702_v41 = vmul.f32 %v700_v40, %v683_v33 }
 0x296   : > { %704 = vrot.lane.b32.xlu1 %v702_v41, %s2716_s29  ;;  %v785_v42 = vpack.c.bf16 %v702_v41, %v702_v41 }
 0x298   : > { %789 = vrot.lane.b32.xlu2 %v785_v42, %s2716_s29  ;;  %v2427_v42 = vld [vmem:[%s3315_s4] sm:$0xff] }
 0x299   : > { %969 = vmatpush.bf16.msrb.mxu0 %v2427_v42 }
 0x2f2   : > { %v790_v45 = vpop.permute.xlu2 %789 }
 0x2f3   : > { %2260 = vmatmul.msk.bf16.vlgmr.msrb.gmra.mxu1 %vm624_vm1, %v790_v45 }
 0x308   : > { %v705_v46 = vpop.permute.xlu1 %704 }
 0x309   : > { %v707_v47 = vsel %vm624_vm1, %v705_v46, 0.0 }
 0x30a   : > { %v708_v48 = vpack.c.bf16 %v707_v47, %v707_v47 }
 0x30c   : > { %2254 = vmatmul.msk.bf16.vlgmr.msrb.gmra.mxu2 %vm594_vm0, %v708_v48 }
 0x370   : > { %v809_v49 = vpop.f32.mrf.mxu1 }
 0x371   : > { %v814_v50 = vrot.slane %v809_v49, 7 }
 0x373   : > { %v816_v51 = vadd.f32 %v814_v50, %v2890_v16 }
 0x375   : > { %2519 = vtanh.f32 %v816_v51  ;;  %v2261_v59 = vmul.f32 -1.442695, %v816_v51 }
 0x378   : > { %v811_v52 = vpop.f32.mrf.mxu1 }
 0x37b   : > { %v2520_v53 = vpop.eup %2519 }
 0x37c   : > { %842 = vrot.lane.b32.xlu0 %v2520_v53, %s2713_s1 }
 0x38f   : > { %v738_v55 = vpop.f32.mrf.mxu2 }
 0x390   : > { %v739_v56 = vadd.f32 %v738_v55, %v713_v54 }
 0x392   : > { %2521 = vtanh.f32 %v739_v56  ;;  %v2255_v60 = vmul.f32 -1.442695, %v739_v56  ;;  %v871_v56 = vld [vmem:[%s3282_s7] sm:$0x1] }
 0x393   : > { %2523 = vpow2.f32 %v2261_v59 }
 0x394   : > { %2525 = vpow2.f32 %v2255_v60 }
 0x397   : > { %v740_v57 = vpop.f32.mrf.mxu2 }
 0x398   : > { %v2522_v58 = vpop.eup %2521 }
 0x399   : > { %764 = vrot.lane.b32.xlu2 %v2522_v58, %s2713_s1  ;;  %v2524_v61 = vpop.eup %2523 }
 0x39a   : > { %v820_v62 = vadd.f32 1.0, %v2524_v61  ;;  %v2526_v63 = vpop.eup %2525 }
 0x39b   : > { %v745_v0 = vadd.f32 1.0, %v2526_v63 }
 0x39c   : > { %2527 = vrcp.f32 %v820_v62  ;;  %v832_v9 = vand.u32 2147483648, %v820_v62  ;;  %vm826_vm7 = vweird.f32 %v820_v62  ;;  %v830_v11 = vand.u32 2147483647, %v820_v62 }
 0x39d   : > { %2529 = vrcp.f32 %v745_v0  ;;  %v757_v15 = vand.u32 2147483648, %v745_v0  ;;  %vm751_vm11 = vweird.f32 %v745_v0  ;;  %v755_v19 = vand.u32 2147483647, %v745_v0 }
 0x39e   : > { %v833_v13 = vor.u32 1.1754944e-38, %v832_v9  ;;  %vm831_vm10 = vcmp.eq.f32.partialorder %v830_v11, 8.507059e+37 }
 0x39f   : > { %v758_v22 = vor.u32 1.1754944e-38, %v757_v15  ;;  %vm756_vm13 = vcmp.eq.f32.partialorder %v755_v19, 8.507059e+37 }
 0x3a2   : > { %v2528_v1 = vpop.eup %2527 }
 0x3a3   : > { %v822_v2 = vmul.f32 %v2528_v1, %v820_v62  ;;  %v2530_v3 = vpop.eup %2529  ;;  %vm827_vm6 = vweird.f32 %v2528_v1 }
 0x3a4   : > { %v747_v5 = vmul.f32 %v2530_v3, %v745_v0  ;;  %vm828_vm8 = vmor %vm826_vm7, %vm827_vm6  ;;  %vm752_vm9 = vweird.f32 %v2530_v3 }
 0x3a5   : > { %v823_v4 = vsub.f32 1.0, %v822_v2  ;;  %vm753_vm12 = vmor %vm751_vm11, %vm752_vm9 }
 0x3a6   : > { %v748_v7 = vsub.f32 1.0, %v747_v5 }
 0x3a7   : > { %v824_v6 = vmul.f32 %v2528_v1, %v823_v4 }
 0x3a8   : > { %v749_v10 = vmul.f32 %v2530_v3, %v748_v7 }
 0x3a9   : > { %v825_v8 = vadd.f32 %v2528_v1, %v824_v6 }
 0x3aa   : > { %v750_v14 = vadd.f32 %v2530_v3, %v749_v10 }
 0x3ab   : > { %v829_v12 = vsel %vm828_vm8, %v2528_v1, %v825_v8 }
 0x3ac   : > { %v834_v18 = vsel %vm831_vm10, %v833_v13, %v829_v12  ;;  %v754_v21 = vsel %vm753_vm12, %v2530_v3, %v750_v14 }
 0x3ad   : > { %v759_v23 = vsel %vm756_vm13, %v758_v22, %v754_v21  ;;  %v840_v27 = vmul.f32 %v838_v26, %v834_v18 }
 0x3ae   : > { %v762_v31 = vmul.f32 0.0, %v759_v23 }
 0x3ee   : > { %v843_v17 = vpop.permute.xlu0 %842 }
 0x3ef   : > { %v845_v20 = vmul.f32 %v843_v17, %v834_v18 }
 0x3f1   : > { %847 = vrot.lane.b32.xlu2 %v845_v20, %s2714_s23 }
 0x3f3   : > { %v765_v24 = vpop.permute.xlu2 %764 }
 0x3f4   : > { %v767_v25 = vmul.f32 %v765_v24, %v759_v23 }
 0x3f6   : > { %769 = vrot.lane.b32.xlu1 %v767_v25, %s2714_s23 }
 0x44b   : > { %v848_v28 = vpop.permute.xlu2 %847 }
 0x44c   : > { %v2922_v29 = vadd.f32 %v848_v28, %v840_v27 }
 0x44e   : > { %2531 = vtanh.f32 %v2922_v29  ;;  %v1000_v28 = vrot.slane %v2922_v29, 7 }
 0x454   : > { %v2532_v30 = vpop.eup %2531 }
 0x455   : > { %853 = vrot.lane.b32.xlu1 %v2532_v30, %s2715_s21 }
 0x468   : > { %v770_v32 = vpop.permute.xlu1 %769 }
 0x469   : > { %v2926_v33 = vadd.f32 %v770_v32, %v762_v31 }
 0x46b   : > { %2533 = vtanh.f32 %v2926_v33 }
 0x471   : > { %v2534_v34 = vpop.eup %2533 }
 0x472   : > { %775 = vrot.lane.b32.xlu0 %v2534_v34, %s2715_s21 }
 0x4c7   : > { %v854_v35 = vpop.permute.xlu1 %853 }
 0x4c8   : > { %v856_v36 = vmul.f32 %v854_v35, %v834_v18 }
 0x4ca   : > { %v945_v37 = vpack.c.bf16 %v856_v36, %v856_v36  ;;  %858 = vrot.lane.b32.xlu2 %v856_v36, %s2716_s29 }
 0x4cc   : > { %v949_v38 = vshrl.u32 %v945_v37, 16 }
 0x4ce   : > { %951 = vrot.lane.b32.xlu1 %v949_v38, %s2716_s29 }
 0x4e4   : > { %v776_v39 = vpop.permute.xlu0 %775 }
 0x4e5   : > { %v2932_v40 = vmul.f32 %v776_v39, %v759_v23 }
 0x4e7   : > { %v861_v41 = vrot.slane %v2932_v40, 7 }
 0x4e9   : > { %862 = vrot.lane.b32.xlu0 %v861_v41, %s2713_s1 }
 0x524   : > { %v859_v46 = vpop.permute.xlu2 %858 }
 0x540   : > { %v952_v45 = vpop.permute.xlu1 %951 }
 0x541   : > { %2276 = vmatmul.msk.bf16.vlgmr.msrb.gmra.mxu0 %vm624_vm1, %v952_v45  ;;  %v2430_v45 = vld [vmem:[%s3315_s4] sm:$0xff] }
 0x542   : > { %1129 = vmatpush.bf16.msra.mxu1 %v2430_v45 }
 0x55b   : > { %v863_v47 = vpop.permute.xlu0 %862 }
 0x55c   : > { %v865_v48 = vsel %vm624_vm1, %v859_v46, %v863_v47  ;;  %v2429_v46 = vld [vmem:[%s3281_s6 + $0x8] sm:$0xff] }
 0x55d   : > { %v866_v49 = vpack.c.bf16 %v865_v48, %v865_v48  ;;  %1057 = vmatpush.bf16.msra.mxu3 %v2429_v46  ;;  %v2428_v48 = vld [vmem:[%s3281_s6] sm:$0xff] }
 0x55f   : > { %v873_v50 = vshrl.u32 %v866_v49, 16 }
 0x561   : > { %2270 = vmatmul.msk.bf16.vlgmr.msra.gmra.mxu2 %vm594_vm0, %v873_v50  ;;  %1058 = vmatpush.bf16.msra.mxu3 %v2428_v48 }
 0x5be   : > { %v971_v51 = vpop.f32.mrf.mxu0 }
 0x5bf   : > { %v976_v52 = vrot.slane %v971_v51, 6 }
 0x5c1   : > { %v978_v53 = vadd.f32 %v976_v52, %v2890_v16 }
 0x5c3   : > { %2535 = vtanh.f32 %v978_v53  ;;  %v2277_v61 = vmul.f32 -1.442695, %v978_v53 }
 0x5c6   : > { %v973_v54 = vpop.f32.mrf.mxu0 }
 0x5c9   : > { %v2536_v55 = vpop.eup %2535 }
 0x5ca   : > { %1004 = vrot.lane.b32.xlu0 %v2536_v55, %s2713_s1 }
 0x5e4   : > { %v899_v57 = vpop.f32.mrf.mxu2 }
 0x5e5   : > { %v900_v58 = vadd.f32 %v899_v57, %v871_v56 }
 0x5e7   : > { %2537 = vtanh.f32 %v900_v58  ;;  %v2271_v63 = vmul.f32 -1.442695, %v900_v58 }
 0x5e8   : > { %2539 = vpow2.f32 %v2277_v61 }
 0x5e9   : > { %2541 = vpow2.f32 %v2271_v63 }
 0x5ec   : > { %v901_v59 = vpop.f32.mrf.mxu2 }
 0x5ed   : > { %v2538_v60 = vpop.eup %2537  ;;  %v1033_v59 = vld [vmem:[%s3282_s7] sm:$0x1] }
 0x5ee   : > { %925 = vrot.lane.b32.xlu2 %v2538_v60, %s2713_s1  ;;  %v2540_v62 = vpop.eup %2539 }
 0x5ef   : > { %v982_v0 = vadd.f32 1.0, %v2540_v62  ;;  %v2542_v1 = vpop.eup %2541 }
 0x5f0   : > { %v906_v3 = vadd.f32 1.0, %v2542_v1 }
 0x5f1   : > { %2543 = vrcp.f32 %v982_v0  ;;  %v994_v10 = vand.u32 2147483648, %v982_v0  ;;  %vm988_vm15 = vweird.f32 %v982_v0  ;;  %v992_v11 = vand.u32 2147483647, %v982_v0 }
 0x5f2   : > { %2545 = vrcp.f32 %v906_v3  ;;  %v918_v21 = vand.u32 2147483648, %v906_v3  ;;  %vm912_vm5 = vweird.f32 %v906_v3  ;;  %v916_v22 = vand.u32 2147483647, %v906_v3 }
 0x5f3   : > { %v995_v14 = vor.u32 1.1754944e-38, %v994_v10  ;;  %vm993_vm3 = vcmp.eq.f32.partialorder %v992_v11, 8.507059e+37 }
 0x5f4   : > { %v919_v24 = vor.u32 1.1754944e-38, %v918_v21  ;;  %vm917_vm7 = vcmp.eq.f32.partialorder %v916_v22, 8.507059e+37 }
 0x5f7   : > { %v2544_v2 = vpop.eup %2543 }
 0x5f8   : > { %v984_v4 = vmul.f32 %v2544_v2, %v982_v0  ;;  %v2546_v7 = vpop.eup %2545  ;;  %vm989_vm14 = vweird.f32 %v2544_v2 }
 0x5f9   : > { %v908_v9 = vmul.f32 %v2546_v7, %v906_v3  ;;  %vm990_vm2 = vmor %vm988_vm15, %vm989_vm14  ;;  %vm913_vm4 = vweird.f32 %v2546_v7 }
 0x5fa   : > { %v985_v5 = vsub.f32 1.0, %v984_v4  ;;  %vm914_vm6 = vmor %vm912_vm5, %vm913_vm4 }
 0x5fb   : > { %v909_v13 = vsub.f32 1.0, %v908_v9 }
 0x5fc   : > { %v986_v6 = vmul.f32 %v2544_v2, %v985_v5 }
 0x5fd   : > { %v910_v19 = vmul.f32 %v2546_v7, %v909_v13 }
 0x5fe   : > { %v987_v8 = vadd.f32 %v2544_v2, %v986_v6 }
 0x5ff   : > { %v911_v20 = vadd.f32 %v2546_v7, %v910_v19 }
 0x600   : > { %v991_v12 = vsel %vm990_vm2, %v2544_v2, %v987_v8 }
 0x601   : > { %v996_v17 = vsel %vm993_vm3, %v995_v14, %v991_v12  ;;  %v915_v23 = vsel %vm914_vm6, %v2546_v7, %v911_v20 }
 0x602   : > { %v920_v26 = vsel %vm917_vm7, %v919_v24, %v915_v23  ;;  %v1002_v30 = vmul.f32 %v1000_v28, %v996_v17 }
 0x603   : > { %v923_v35 = vmul.f32 %v920_v26, %v2926_v33 }
 0x63c   : > { %v1005_v15 = vpop.permute.xlu0 %1004 }
 0x63d   : > { %v1007_v18 = vmul.f32 %v1005_v15, %v996_v17 }
 0x63f   : > { %1009 = vrot.lane.b32.xlu2 %v1007_v18, %s2714_s23 }
 0x648   : > { %v926_v25 = vpop.permute.xlu2 %925 }
 0x649   : > { %v928_v27 = vmul.f32 %v926_v25, %v920_v26 }
 0x64b   : > { %930 = vrot.lane.b32.xlu1 %v928_v27, %s2714_s23 }
 0x699   : > { %v1010_v31 = vpop.permute.xlu2 %1009 }
 0x69a   : > { %v2957_v32 = vadd.f32 %v1010_v31, %v1002_v30 }
 0x69c   : > { %2547 = vtanh.f32 %v2957_v32 }
 0x6a2   : > { %v2548_v34 = vpop.eup %2547 }
 0x6a3   : > { %1015 = vrot.lane.b32.xlu1 %v2548_v34, %s2715_s21  ;;  %v1160_v34 = vrot.slane %v2957_v32, 7 }
 0x6bd   : > { %v931_v36 = vpop.permute.xlu1 %930 }
 0x6be   : > { %v2962_v37 = vadd.f32 %v931_v36, %v923_v35 }
 0x6c0   : > { %2549 = vtanh.f32 %v2962_v37 }
 0x6c6   : > { %v2550_v38 = vpop.eup %2549 }
 0x6c7   : > { %936 = vrot.lane.b32.xlu0 %v2550_v38, %s2715_s21 }
 0x715   : > { %v1016_v29 = vpop.permute.xlu1 %1015 }
 0x716   : > { %v1018_v39 = vmul.f32 %v1016_v29, %v996_v17 }
 0x718   : > { %v1106_v41 = vpack.c.bf16 %v1018_v39, %v1018_v39  ;;  %1020 = vrot.lane.b32.xlu2 %v1018_v39, %s2716_s29 }
 0x71a   : > { %v1110_v42 = vrot.slane %v1106_v41, 1 }
 0x71c   : > { %1111 = vrot.lane.b32.xlu1 %v1110_v42, %s2716_s29 }
 0x739   : > { %v937_v43 = vpop.permute.xlu0 %936 }
 0x73a   : > { %v2968_v44 = vmul.f32 %v937_v43, %v920_v26 }
 0x73c   : > { %v1023_v33 = vrot.slane %v2968_v44, 6 }
 0x73e   : > { %1024 = vrot.lane.b32.xlu0 %v1023_v33, %s2713_s1 }
 0x772   : > { %v1021_v49 = vpop.permute.xlu2 %1020 }
 0x78e   : > { %v1112_v47 = vpop.permute.xlu1 %1111 }
 0x78f   : > { %2292 = vmatmul.msk.bf16.vlgmr.msra.gmra.mxu1 %vm624_vm1, %v1112_v47 }
 0x7b0   : > { %v1025_v50 = vpop.permute.xlu0 %1024 }
 0x7b1   : > { %v1027_v51 = vsel %vm624_vm1, %v1021_v49, %v1025_v50  ;;  %v2433_v50 = vld [vmem:[%s3315_s4] sm:$0xff] }
 0x7b2   : > { %v1028_v52 = vpack.c.bf16 %v1027_v51, %v1027_v51  ;;  %1293 = vmatpush.bf16.msra.mxu0 %v2433_v50  ;;  %v2432_v51 = vld [vmem:[%s3281_s6 + $0x8] sm:$0xff] }
 0x7b3   : > { %1219 = vmatpush.bf16.msrb.mxu2 %v2432_v51 }
 0x7b4   : > { %v1035_v53 = vrot.slane %v1028_v52, 1  ;;  %v2431_v52 = vld [vmem:[%s3281_s6] sm:$0xff] }
 0x7b6   : > { %2286 = vmatmul.msk.bf16.vlgmr.msra.gmra.mxu3 %vm594_vm0, %v1035_v53 }
 0x7b7   : > { %1220 = vmatpush.bf16.msrb.mxu2 %v2431_v52 }
 0x80c   : > { %v1131_v54 = vpop.f32.mrf.mxu1 }
 0x80d   : > { %v1136_v55 = vrot.slane %v1131_v54, 5 }
 0x80f   : > { %v1138_v56 = vadd.f32 %v1136_v55, %v2890_v16 }
 0x811   : > { %2551 = vtanh.f32 %v1138_v56  ;;  %v2293_v0 = vmul.f32 -1.442695, %v1138_v56 }
 0x814   : > { %v1133_v57 = vpop.f32.mrf.mxu1 }
 0x817   : > { %v2552_v58 = vpop.eup %2551 }
 0x818   : > { %1164 = vrot.lane.b32.xlu0 %v2552_v58, %s2713_s1 }
 0x839   : > { %v1060_v60 = vpop.f32.mrf.mxu3 }
 0x83a   : > { %v1061_v61 = vadd.f32 %v1060_v60, %v1033_v59 }
 0x83c   : > { %2553 = vtanh.f32 %v1061_v61  ;;  %v2287_v3 = vmul.f32 -1.442695, %v1061_v61 }
 0x83d   : > { %2555 = vpow2.f32 %v2293_v0 }
 0x841   : > { %v1062_v62 = vpop.f32.mrf.mxu3 }
 0x842   : > { %v2554_v63 = vpop.eup %2553 }
 0x843   : > { %1086 = vrot.lane.b32.xlu2 %v2554_v63, %s2713_s1  ;;  %v2556_v1 = vpop.eup %2555 }
 0x844   : > { %v1142_v2 = vadd.f32 1.0, %v2556_v1  ;;  %v1193_v1 = vld [vmem:[%s3282_s7] sm:$0x1] }
 0x846   : > { %2557 = vrcp.f32 %v1142_v2  ;;  %v1154_v11 = vand.u32 2147483648, %v1142_v2  ;;  %vm1148_vm9 = vweird.f32 %v1142_v2  ;;  %v1152_v12 = vand.u32 2147483647, %v1142_v2 }
 0x847   : > { %2559 = vpow2.f32 %v2287_v3 }
 0x848   : > { %v1155_v15 = vor.u32 1.1754944e-38, %v1154_v11  ;;  %vm1153_vm11 = vcmp.eq.f32.partialorder %v1152_v12, 8.507059e+37 }
 0x84c   : > { %v2558_v4 = vpop.eup %2557 }
 0x84d   : > { %v1144_v5 = vmul.f32 %v2558_v4, %v1142_v2  ;;  %v2560_v6 = vpop.eup %2559  ;;  %vm1149_vm8 = vweird.f32 %v2558_v4 }
 0x84e   : > { %v1067_v8 = vadd.f32 1.0, %v2560_v6  ;;  %vm1150_vm10 = vmor %vm1148_vm9, %vm1149_vm8 }
 0x84f   : > { %v1145_v7 = vsub.f32 1.0, %v1144_v5 }
 0x850   : > { %2561 = vrcp.f32 %v1067_v8  ;;  %v1079_v24 = vand.u32 2147483648, %v1067_v8  ;;  %vm1073_vm13 = vweird.f32 %v1067_v8  ;;  %v1077_v25 = vand.u32 2147483647, %v1067_v8 }
 0x851   : > { %v1146_v9 = vmul.f32 %v2558_v4, %v1145_v7 }
 0x852   : > { %v1080_v27 = vor.u32 1.1754944e-38, %v1079_v24  ;;  %vm1078_vm15 = vcmp.eq.f32.partialorder %v1077_v25, 8.507059e+37 }
 0x853   : > { %v1147_v10 = vadd.f32 %v2558_v4, %v1146_v9 }
 0x855   : > { %v1151_v14 = vsel %vm1150_vm10, %v2558_v4, %v1147_v10 }
 0x856   : > { %v2562_v13 = vpop.eup %2561  ;;  %v1156_v18 = vsel %vm1153_vm11, %v1155_v15, %v1151_v14 }
 0x857   : > { %v1069_v19 = vmul.f32 %v2562_v13, %v1067_v8  ;;  %vm1074_vm12 = vweird.f32 %v2562_v13  ;;  %v1162_v35 = vmul.f32 %v1160_v34, %v1156_v18 }
 0x858   : > { %vm1075_vm14 = vmor %vm1073_vm13, %vm1074_vm12 }
 0x859   : > { %v1070_v21 = vsub.f32 1.0, %v1069_v19 }
 0x85b   : > { %v1071_v22 = vmul.f32 %v2562_v13, %v1070_v21 }
 0x85d   : > { %v1072_v23 = vadd.f32 %v2562_v13, %v1071_v22 }
 0x85f   : > { %v1076_v26 = vsel %vm1075_vm14, %v2562_v13, %v1072_v23 }
 0x860   : > { %v1081_v30 = vsel %vm1078_vm15, %v1080_v27, %v1076_v26 }
 0x861   : > { %v1084_v39 = vmul.f32 %v1081_v30, %v2962_v37 }
 0x88a   : > { %v1165_v17 = vpop.permute.xlu0 %1164 }
 0x88b   : > { %v1167_v20 = vmul.f32 %v1165_v17, %v1156_v18 }
 0x88d   : > { %1169 = vrot.lane.b32.xlu2 %v1167_v20, %s2714_s23 }
 0x89d   : > { %v1087_v28 = vpop.permute.xlu2 %1086 }
 0x89e   : > { %v1089_v31 = vmul.f32 %v1087_v28, %v1081_v30 }
 0x8a0   : > { %1091 = vrot.lane.b32.xlu1 %v1089_v31, %s2714_s23 }
 0x8e7   : > { %v1170_v36 = vpop.permute.xlu2 %1169 }
 0x8e8   : > { %v2993_v38 = vadd.f32 %v1170_v36, %v1162_v35 }
 0x8ea   : > { %2563 = vtanh.f32 %v2993_v38 }
 0x8f0   : > { %v2564_v29 = vpop.eup %2563 }
 0x8f1   : > { %1175 = vrot.lane.b32.xlu1 %v2564_v29, %s2715_s21 }
 0x912   : > { %v1092_v41 = vpop.permute.xlu1 %1091 }
 0x913   : > { %v2998_v42 = vadd.f32 %v1092_v41, %v1084_v39 }
 0x915   : > { %2565 = vtanh.f32 %v2998_v42 }
 0x91b   : > { %v2566_v43 = vpop.eup %2565 }
 0x91c   : > { %1097 = vrot.lane.b32.xlu0 %v2566_v43, %s2715_s21  ;;  %v1324_v43 = vrot.slane %v2993_v38, 7 }
 0x963   : > { %v1176_v32 = vpop.permute.xlu1 %1175 }
 0x964   : > { %v1178_v33 = vmul.f32 %v1176_v32, %v1156_v18 }
 0x966   : > { %v1268_v45 = vpack.c.bf16 %v1178_v33, %v1178_v33  ;;  %1180 = vrot.lane.b32.xlu2 %v1178_v33, %s2716_s29 }
 0x968   : > { %v1272_v46 = vshrl.u32 %v1268_v45, 16 }
 0x96a   : > { %v1274_v47 = vrot.slane %v1272_v46, 1 }
 0x96c   : > { %1275 = vrot.lane.b32.xlu1 %v1274_v47, %s2716_s29 }
 0x98e   : > { %v1098_v48 = vpop.permute.xlu0 %1097 }
 0x98f   : > { %v3004_v49 = vmul.f32 %v1098_v48, %v1081_v30 }
 0x991   : > { %v1183_v37 = vrot.slane %v3004_v49, 5 }
 0x993   : > { %1184 = vrot.lane.b32.xlu0 %v1183_v37, %s2713_s1 }
 0x9c0   : > { %v1181_v54 = vpop.permute.xlu2 %1180 }
 0x9de   : > { %v1276_v53 = vpop.permute.xlu1 %1275 }
 0x9df   : > { %2308 = vmatmul.msk.bf16.vlgmr.msra.gmra.mxu0 %vm624_vm1, %v1276_v53 }
 0xa05   : > { %v1185_v55 = vpop.permute.xlu0 %1184 }
 0xa06   : > { %v1187_v56 = vsel %vm624_vm1, %v1181_v54, %v1185_v55 }
 0xa07   : > { %v1188_v57 = vpack.c.bf16 %v1187_v56, %v1187_v56  ;;  %v2436_v56 = vld [vmem:[%s3315_s4] sm:$0xff] }
 0xa08   : > { %1453 = vmatpush.bf16.msrb.mxu1 %v2436_v56 }
 0xa09   : > { %v1195_v58 = vshrl.u32 %v1188_v57, 16  ;;  %v2435_v57 = vld [vmem:[%s3281_s6 + $0x8] sm:$0xff] }
 0xa0a   : > { %1381 = vmatpush.bf16.msrb.mxu3 %v2435_v57 }
 0xa0b   : > { %v1197_v59 = vrot.slane %v1195_v58, 1  ;;  %v2434_v58 = vld [vmem:[%s3281_s6] sm:$0xff] }
 0xa0d   : > { %2302 = vmatmul.msk.bf16.vlgmr.msrb.gmra.mxu2 %vm594_vm0, %v1197_v59 }
 0xa0e   : > { %1382 = vmatpush.bf16.msrb.mxu3 %v2434_v58 }
 0xa5c   : > { %v1295_v60 = vpop.f32.mrf.mxu0 }
 0xa5d   : > { %v1300_v61 = vrot.slane %v1295_v60, 4 }
 0xa5f   : > { %v1302_v62 = vadd.f32 %v1300_v61, %v2890_v16 }
 0xa61   : > { %2567 = vtanh.f32 %v1302_v62  ;;  %v2309_v6 = vmul.f32 -1.442695, %v1302_v62 }
 0xa64   : > { %v1297_v63 = vpop.f32.mrf.mxu0 }
 0xa67   : > { %v2568_v0 = vpop.eup %2567 }
 0xa68   : > { %1328 = vrot.lane.b32.xlu0 %v2568_v0, %s2713_s1 }
 0xa90   : > { %v1222_v2 = vpop.f32.mrf.mxu2 }
 0xa91   : > { %v1223_v3 = vadd.f32 %v1222_v2, %v1193_v1 }
 0xa93   : > { %2569 = vtanh.f32 %v1223_v3  ;;  %v2303_v10 = vmul.f32 -1.442695, %v1223_v3 }
 0xa94   : > { %2571 = vpow2.f32 %v2309_v6  ;;  %v1357_v6 = vld [vmem:[%s3282_s7] sm:$0x1] }
 0xa98   : > { %v1224_v4 = vpop.f32.mrf.mxu2 }
 0xa99   : > { %v2570_v5 = vpop.eup %2569 }
 0xa9a   : > { %1248 = vrot.lane.b32.xlu2 %v2570_v5, %s2713_s1  ;;  %v2572_v7 = vpop.eup %2571 }
 0xa9b   : > { %v1306_v8 = vadd.f32 1.0, %v2572_v7 }
 0xa9d   : > { %2573 = vrcp.f32 %v1306_v8  ;;  %v1318_v18 = vand.u32 2147483648, %v1306_v8  ;;  %vm1312_vm3 = vweird.f32 %v1306_v8  ;;  %v1316_v19 = vand.u32 2147483647, %v1306_v8 }
 0xa9e   : > { %2575 = vpow2.f32 %v2303_v10 }
 0xa9f   : > { %v1319_v21 = vor.u32 1.1754944e-38, %v1318_v18  ;;  %vm1317_vm5 = vcmp.eq.f32.partialorder %v1316_v19, 8.507059e+37 }
 0xaa3   : > { %v2574_v9 = vpop.eup %2573 }
 0xaa4   : > { %v1308_v11 = vmul.f32 %v2574_v9, %v1306_v8  ;;  %v2576_v14 = vpop.eup %2575  ;;  %vm1313_vm2 = vweird.f32 %v2574_v9 }
 0xaa5   : > { %v1229_v17 = vadd.f32 1.0, %v2576_v14  ;;  %vm1314_vm4 = vmor %vm1312_vm3, %vm1313_vm2 }
 0xaa6   : > { %v1309_v12 = vsub.f32 1.0, %v1308_v11 }
 0xaa7   : > { %2577 = vrcp.f32 %v1229_v17  ;;  %v1241_v31 = vand.u32 2147483648, %v1229_v17  ;;  %vm1235_vm7 = vweird.f32 %v1229_v17  ;;  %v1239_v34 = vand.u32 2147483647, %v1229_v17 }
 0xaa8   : > { %v1310_v13 = vmul.f32 %v2574_v9, %v1309_v12 }
 0xaa9   : > { %v1242_v36 = vor.u32 1.1754944e-38, %v1241_v31  ;;  %vm1240_vm9 = vcmp.eq.f32.partialorder %v1239_v34, 8.507059e+37 }
 0xaaa   : > { %v1311_v15 = vadd.f32 %v2574_v9, %v1310_v13 }
 0xaac   : > { %v1315_v20 = vsel %vm1314_vm4, %v2574_v9, %v1311_v15 }
 0xaad   : > { %v1320_v23 = vsel %vm1317_vm5, %v1319_v21, %v1315_v20  ;;  %v2578_v25 = vpop.eup %2577 }
 0xaae   : > { %v1231_v26 = vmul.f32 %v2578_v25, %v1229_v17  ;;  %vm1236_vm6 = vweird.f32 %v2578_v25  ;;  %v1326_v32 = vmul.f32 %v1324_v43, %v1320_v23 }
 0xaaf   : > { %vm1237_vm8 = vmor %vm1235_vm7, %vm1236_vm6 }
 0xab0   : > { %v1232_v27 = vsub.f32 1.0, %v1231_v26 }
 0xab2   : > { %v1233_v28 = vmul.f32 %v2578_v25, %v1232_v27 }
 0xab4   : > { %v1234_v30 = vadd.f32 %v2578_v25, %v1233_v28 }
 0xab6   : > { %v1238_v35 = vsel %vm1237_vm8, %v2578_v25, %v1234_v30 }
 0xab7   : > { %v1243_v39 = vsel %vm1240_vm9, %v1242_v36, %v1238_v35 }
 0xab8   : > { %v1246_v47 = vmul.f32 %v1243_v39, %v2998_v42 }
 0xada   : > { %v1329_v22 = vpop.permute.xlu0 %1328 }
 0xadb   : > { %v1331_v24 = vmul.f32 %v1329_v22, %v1320_v23 }
 0xadd   : > { %1333 = vrot.lane.b32.xlu2 %v1331_v24, %s2714_s23 }
 0xaf4   : > { %v1249_v29 = vpop.permute.xlu2 %1248 }
 0xaf5   : > { %v1251_v41 = vmul.f32 %v1249_v29, %v1243_v39 }
 0xaf7   : > { %1253 = vrot.lane.b32.xlu1 %v1251_v41, %s2714_s23 }
 0xb37   : > { %v1334_v33 = vpop.permute.xlu2 %1333 }
 0xb38   : > { %v3029_v45 = vadd.f32 %v1334_v33, %v1326_v32 }
 0xb3a   : > { %2579 = vtanh.f32 %v3029_v45 }
 0xb40   : > { %v2580_v46 = vpop.eup %2579 }
 0xb41   : > { %1339 = vrot.lane.b32.xlu1 %v2580_v46, %s2715_s21 }
 0xb69   : > { %v1254_v48 = vpop.permute.xlu1 %1253 }
 0xb6a   : > { %v3034_v37 = vadd.f32 %v1254_v48, %v1246_v47  ;;  %v1484_v48 = vrot.slane %v3029_v45, 7 }
 0xb6c   : > { %2581 = vtanh.f32 %v3034_v37 }
 0xb72   : > { %v2582_v50 = vpop.eup %2581 }
 0xb73   : > { %1259 = vrot.lane.b32.xlu0 %v2582_v50, %s2715_s21 }
 0xbb3   : > { %v1340_v38 = vpop.permute.xlu1 %1339 }
 0xbb4   : > { %v1342_v51 = vmul.f32 %v1340_v38, %v1320_v23 }
 0xbb6   : > { %v1430_v52 = vpack.c.bf16 %v1342_v51, %v1342_v51  ;;  %1344 = vrot.lane.b32.xlu2 %v1342_v51, %s2716_s29 }
 0xbb8   : > { %v1434_v53 = vrot.slane %v1430_v52, 2 }
 0xbba   : > { %1435 = vrot.lane.b32.xlu1 %v1434_v53, %s2716_s29 }
 0xbe5   : > { %v1260_v54 = vpop.permute.xlu0 %1259 }
 0xbe6   : > { %v3040_v55 = vmul.f32 %v1260_v54, %v1243_v39 }
 0xbe8   : > { %v1347_v42 = vrot.slane %v3040_v55, 4 }
 0xbea   : > { %1348 = vrot.lane.b32.xlu0 %v1347_v42, %s2713_s1 }
 0xc10   : > { %v1345_v60 = vpop.permute.xlu2 %1344 }
 0xc2c   : > { %v1436_v59 = vpop.permute.xlu1 %1435 }
 0xc2d   : > { %2324 = vmatmul.msk.bf16.vlgmr.msrb.gmra.mxu1 %vm624_vm1, %v1436_v59 }
 0xc5c   : > { %v1349_v61 = vpop.permute.xlu0 %1348 }
 0xc5d   : > { %v1351_v62 = vsel %vm624_vm1, %v1345_v60, %v1349_v61 }
 0xc5e   : > { %v1352_v63 = vpack.c.bf16 %v1351_v62, %v1351_v62 }
 0xc60   : > { %v1359_v0 = vrot.slane %v1352_v63, 2  ;;  %v2439_v63 = vld [vmem:[%s3315_s4] sm:$0xff] }
 0xc61   : > { %1617 = vmatpush.bf16.msrb.mxu0 %v2439_v63 }
 0xc62   : > { %2318 = vmatmul.msk.bf16.vlgmr.msrb.gmra.mxu3 %vm594_vm0, %v1359_v0  ;;  %v2438_v0 = vld [vmem:[%s3281_s6 + $0x8] sm:$0xff] }
 0xc63   : > { %1543 = vmatpush.bf16.msra.mxu2 %v2438_v0 }
 0xcaa   : > { %v1455_v1 = vpop.f32.mrf.mxu1 }
 0xcab   : > { %v1460_v2 = vrot.slane %v1455_v1, 3  ;;  %v2437_v1 = vld [vmem:[%s3281_s6] sm:$0xff] }
 0xcac   : > { %1544 = vmatpush.bf16.msra.mxu2 %v2437_v1 }
 0xcad   : > { %v1462_v3 = vadd.f32 %v1460_v2, %v2890_v16 }
 0xcaf   : > { %2583 = vtanh.f32 %v1462_v3  ;;  %v2325_v11 = vmul.f32 -1.442695, %v1462_v3 }
 0xcb2   : > { %v1457_v4 = vpop.f32.mrf.mxu1 }
 0xcb5   : > { %v2584_v5 = vpop.eup %2583 }
 0xcb6   : > { %1488 = vrot.lane.b32.xlu0 %v2584_v5, %s2713_s1 }
 0xce5   : > { %v1384_v7 = vpop.f32.mrf.mxu3 }
 0xce6   : > { %v1385_v8 = vadd.f32 %v1384_v7, %v1357_v6 }
 0xce8   : > { %2585 = vtanh.f32 %v1385_v8  ;;  %v2319_v18 = vmul.f32 -1.442695, %v1385_v8 }
 0xce9   : > { %2587 = vpow2.f32 %v2325_v11 }
 0xced   : > { %v1386_v9 = vpop.f32.mrf.mxu3 }
 0xcee   : > { %v2586_v10 = vpop.eup %2585 }
 0xcef   : > { %1410 = vrot.lane.b32.xlu2 %v2586_v10, %s2713_s1  ;;  %v2588_v12 = vpop.eup %2587 }
 0xcf0   : > { %v1466_v13 = vadd.f32 1.0, %v2588_v12 }
 0xcf2   : > { %2589 = vrcp.f32 %v1466_v13  ;;  %v1478_v21 = vand.u32 2147483648, %v1466_v13  ;;  %vm1472_vm11 = vweird.f32 %v1466_v13  ;;  %v1476_v22 = vand.u32 2147483647, %v1466_v13 }
 0xcf3   : > { %2591 = vpow2.f32 %v2319_v18 }
 0xcf4   : > { %v1479_v25 = vor.u32 1.1754944e-38, %v1478_v21  ;;  %vm1477_vm13 = vcmp.eq.f32.partialorder %v1476_v22, 8.507059e+37 }
 0xcf8   : > { %v2590_v14 = vpop.eup %2589 }
 0xcf9   : > { %v1468_v15 = vmul.f32 %v2590_v14, %v1466_v13  ;;  %vm1473_vm10 = vweird.f32 %v2590_v14  ;;  %v2592_v24 = vpop.eup %2591 }
 0xcfa   : > { %vm1474_vm12 = vmor %vm1472_vm11, %vm1473_vm10  ;;  %v1391_v28 = vadd.f32 1.0, %v2592_v24 }
 0xcfb   : > { %v1469_v17 = vsub.f32 1.0, %v1468_v15 }
 0xcfc   : > { %2593 = vrcp.f32 %v1391_v28  ;;  %v1403_v39 = vand.u32 2147483648, %v1391_v28  ;;  %vm1397_vm15 = vweird.f32 %v1391_v28  ;;  %v1401_v41 = vand.u32 2147483647, %v1391_v28 }
 0xcfd   : > { %v1470_v19 = vmul.f32 %v2590_v14, %v1469_v17 }
 0xcfe   : > { %v1404_v32 = vor.u32 1.1754944e-38, %v1403_v39  ;;  %vm1402_vm3 = vcmp.eq.f32.partialorder %v1401_v41, 8.507059e+37 }
 0xcff   : > { %v1471_v20 = vadd.f32 %v2590_v14, %v1470_v19 }
 0xd01   : > { %v1475_v23 = vsel %vm1474_vm12, %v2590_v14, %v1471_v20  ;;  %v1517_v14 = vld [vmem:[%s3282_s7] sm:$0x1] }
 0xd02   : > { %v1480_v27 = vsel %vm1477_vm13, %v1479_v25, %v1475_v23  ;;  %v2594_v31 = vpop.eup %2593 }
 0xd03   : > { %v1393_v34 = vmul.f32 %v2594_v31, %v1391_v28  ;;  %vm1398_vm14 = vweird.f32 %v2594_v31  ;;  %v1486_v50 = vmul.f32 %v1484_v48, %v1480_v27 }
 0xd04   : > { %vm1399_vm2 = vmor %vm1397_vm15, %vm1398_vm14 }
 0xd05   : > { %v1394_v35 = vsub.f32 1.0, %v1393_v34 }
 0xd07   : > { %v1395_v36 = vmul.f32 %v2594_v31, %v1394_v35 }
 0xd09   : > { %v1396_v29 = vadd.f32 %v2594_v31, %v1395_v36 }
 0xd0b   : > { %v1400_v43 = vsel %vm1399_vm2, %v2594_v31, %v1396_v29 }
 0xd0c   : > { %v1405_v46 = vsel %vm1402_vm3, %v1404_v32, %v1400_v43 }
 0xd0d   : > { %v1408_v53 = vmul.f32 %v1405_v46, %v3034_v37 }
 0xd28   : > { %v1489_v26 = vpop.permute.xlu0 %1488 }
 0xd29   : > { %v1491_v30 = vmul.f32 %v1489_v26, %v1480_v27 }
 0xd2b   : > { %1493 = vrot.lane.b32.xlu2 %v1491_v30, %s2714_s23 }
 0xd49   : > { %v1411_v33 = vpop.permute.xlu2 %1410 }
 0xd4a   : > { %v1413_v47 = vmul.f32 %v1411_v33, %v1405_v46 }
 0xd4c   : > { %1415 = vrot.lane.b32.xlu1 %v1413_v47, %s2714_s23 }
 0xd85   : > { %v1494_v38 = vpop.permute.xlu2 %1493 }
 0xd86   : > { %v3065_v51 = vadd.f32 %v1494_v38, %v1486_v50 }
 0xd88   : > { %2595 = vtanh.f32 %v3065_v51 }
 0xd8e   : > { %v2596_v52 = vpop.eup %2595 }
 0xd8f   : > { %1499 = vrot.lane.b32.xlu1 %v2596_v52, %s2715_s21 }
 0xdbe   : > { %v1416_v54 = vpop.permute.xlu1 %1415 }
 0xdbf   : > { %v3070_v42 = vadd.f32 %v1416_v54, %v1408_v53 }
 0xdc1   : > { %2597 = vtanh.f32 %v3070_v42 }
 0xdc7   : > { %v2598_v56 = vpop.eup %2597 }
 0xdc8   : > { %1421 = vrot.lane.b32.xlu0 %v2598_v56, %s2715_s21 }
 0xe01   : > { %v1500_v45 = vpop.permute.xlu1 %1499 }
 0xe02   : > { %v1502_v57 = vmul.f32 %v1500_v45, %v1480_v27 }
 0xe04   : > { %v1592_v58 = vpack.c.bf16 %v1502_v57, %v1502_v57  ;;  %1504 = vrot.lane.b32.xlu2 %v1502_v57, %s2716_s29  ;;  %v1648_v57 = vrot.slane %v3065_v51, 7 }
 0xe06   : > { %v1596_v59 = vshrl.u32 %v1592_v58, 16 }
 0xe08   : > { %v1598_v60 = vrot.slane %v1596_v59, 2 }
 0xe0a   : > { %1599 = vrot.lane.b32.xlu1 %v1598_v60, %s2716_s29 }
 0xe3a   : > { %v1422_v61 = vpop.permute.xlu0 %1421 }
 0xe3b   : > { %v3076_v62 = vmul.f32 %v1422_v61, %v1405_v46 }
 0xe3d   : > { %v1507_v37 = vrot.slane %v3076_v62, 3 }
 0xe3f   : > { %1508 = vrot.lane.b32.xlu0 %v1507_v37, %s2713_s1 }
 0xe5e   : > { %v1505_v3 = vpop.permute.xlu2 %1504 }
 0xe7c   : > { %v1600_v2 = vpop.permute.xlu1 %1599 }
 0xe7d   : > { %2340 = vmatmul.msk.bf16.vlgmr.msrb.gmra.mxu0 %vm624_vm1, %v1600_v2 }
 0xeb1   : > { %v1509_v4 = vpop.permute.xlu0 %1508 }
 0xeb2   : > { %v1511_v5 = vsel %vm624_vm1, %v1505_v3, %v1509_v4 }
 0xeb3   : > { %v1512_v6 = vpack.c.bf16 %v1511_v5, %v1511_v5 }
 0xeb5   : > { %v1519_v7 = vshrl.u32 %v1512_v6, 16 }
 0xeb7   : > { %v1521_v8 = vrot.slane %v1519_v7, 2 }
 0xeb9   : > { %2334 = vmatmul.msk.bf16.vlgmr.msra.gmra.mxu2 %vm594_vm0, %v1521_v8  ;;  %v2441_v8 = vld [vmem:[%s3281_s6 + $0x8] sm:$0xff] }
 0xeba   : > { %1705 = vmatpush.bf16.msra.mxu3 %v2441_v8 }
 0xefa   : > { %v1619_v9 = vpop.f32.mrf.mxu0 }
 0xefb   : > { %v1624_v10 = vrot.slane %v1619_v9, 2  ;;  %v2440_v9 = vld [vmem:[%s3281_s6] sm:$0xff] }
 0xefc   : > { %1706 = vmatpush.bf16.msra.mxu3 %v2440_v9 }
 0xefd   : > { %v1626_v11 = vadd.f32 %v1624_v10, %v2890_v16 }
 0xeff   : > { %2599 = vtanh.f32 %v1626_v11  ;;  %v2341_v20 = vmul.f32 -1.442695, %v1626_v11 }
 0xf02   : > { %v1621_v12 = vpop.f32.mrf.mxu0 }
 0xf05   : > { %v2600_v13 = vpop.eup %2599 }
 0xf06   : > { %1652 = vrot.lane.b32.xlu0 %v2600_v13, %s2713_s1 }
 0xf3c   : > { %v1546_v15 = vpop.f32.mrf.mxu2 }
 0xf3d   : > { %v1547_v17 = vadd.f32 %v1546_v15, %v1517_v14 }
 0xf3f   : > { %2601 = vtanh.f32 %v1547_v17  ;;  %v2335_v30 = vmul.f32 -1.442695, %v1547_v17 }
 0xf40   : > { %2603 = vpow2.f32 %v2341_v20 }
 0xf44   : > { %v1548_v18 = vpop.f32.mrf.mxu2 }
 0xf45   : > { %v2602_v19 = vpop.eup %2601 }
 0xf46   : > { %1572 = vrot.lane.b32.xlu2 %v2602_v19, %s2713_s1  ;;  %v2604_v21 = vpop.eup %2603 }
 0xf47   : > { %v1630_v22 = vadd.f32 1.0, %v2604_v21 }
 0xf49   : > { %2605 = vrcp.f32 %v1630_v22  ;;  %v1642_v28 = vand.u32 2147483648, %v1630_v22  ;;  %vm1636_vm5 = vweird.f32 %v1630_v22  ;;  %v1640_v31 = vand.u32 2147483647, %v1630_v22 }
 0xf4a   : > { %2607 = vpow2.f32 %v2335_v30 }
 0xf4b   : > { %v1643_v35 = vor.u32 1.1754944e-38, %v1642_v28  ;;  %vm1641_vm7 = vcmp.eq.f32.partialorder %v1640_v31, 8.507059e+37 }
 0xf4f   : > { %v2606_v23 = vpop.eup %2605 }
 0xf50   : > { %v1632_v24 = vmul.f32 %v2606_v23, %v1630_v22  ;;  %vm1637_vm4 = vweird.f32 %v2606_v23  ;;  %v2608_v41 = vpop.eup %2607  ;;  %v1681_v22 = vld [vmem:[%s3282_s7] sm:$0x1] }
 0xf51   : > { %vm1638_vm6 = vmor %vm1636_vm5, %vm1637_vm4  ;;  %v1553_v43 = vadd.f32 1.0, %v2608_v41 }
 0xf52   : > { %v1633_v25 = vsub.f32 1.0, %v1632_v24 }
 0xf53   : > { %2609 = vrcp.f32 %v1553_v43  ;;  %v1565_v50 = vand.u32 2147483648, %v1553_v43  ;;  %vm1559_vm9 = vweird.f32 %v1553_v43  ;;  %v1563_v38 = vand.u32 2147483647, %v1553_v43 }
 0xf54   : > { %v1634_v26 = vmul.f32 %v2606_v23, %v1633_v25 }
 0xf55   : > { %v1566_v53 = vor.u32 1.1754944e-38, %v1565_v50  ;;  %vm1564_vm11 = vcmp.eq.f32.partialorder %v1563_v38, 8.507059e+37 }
 0xf56   : > { %v1635_v27 = vadd.f32 %v2606_v23, %v1634_v26 }
 0xf58   : > { %v1639_v34 = vsel %vm1638_vm6, %v2606_v23, %v1635_v27 }
 0xf59   : > { %v1644_v29 = vsel %vm1641_vm7, %v1643_v35, %v1639_v34  ;;  %v2610_v32 = vpop.eup %2609 }
 0xf5a   : > { %v1555_v33 = vmul.f32 %v2610_v32, %v1553_v43  ;;  %vm1560_vm8 = vweird.f32 %v2610_v32  ;;  %v1650_v58 = vmul.f32 %v1648_v57, %v1644_v29 }
 0xf5b   : > { %vm1561_vm10 = vmor %vm1559_vm9, %vm1560_vm8 }
 0xf5c   : > { %v1556_v46 = vsub.f32 1.0, %v1555_v33 }
 0xf5e   : > { %v1557_v47 = vmul.f32 %v2610_v32, %v1556_v46 }
 0xf60   : > { %v1558_v48 = vadd.f32 %v2610_v32, %v1557_v47 }
 0xf62   : > { %v1562_v52 = vsel %vm1561_vm10, %v2610_v32, %v1558_v48  ;;  %vm783_vm10 = vcmask 122880  }
 0xf63   : > { %v1567_v56 = vsel %vm1564_vm11, %v1566_v53, %v1562_v52 }
 0xf64   : > { %v1570_v37 = vmul.f32 %v1567_v56, %v3070_v42  ;;  %v2442_v42 = vld [vmem:[%s3315_s4] sm:$0xff] }
 0xf65   : > { %1777 = vmatpush.bf16.msra.mxu1 %v2442_v42 }
 0xf78   : > { %v1653_v36 = vpop.permute.xlu0 %1652 }
 0xf79   : > { %v1655_v39 = vmul.f32 %v1653_v36, %v1644_v29 }
 0xf7b   : > { %1657 = vrot.lane.b32.xlu2 %v1655_v39, %s2714_s23 }
 0xfa0   : > { %v1573_v54 = vpop.permute.xlu2 %1572 }
 0xfa1   : > { %v1575_v45 = vmul.f32 %v1573_v54, %v1567_v56 }
 0xfa3   : > { %1577 = vrot.lane.b32.xlu1 %v1575_v45, %s2714_s23 }
 0xfd5   : > { %v1658_v59 = vpop.permute.xlu2 %1657 }
 0xfd6   : > { %v3101_v60 = vadd.f32 %v1658_v59, %v1650_v58 }
 0xfd8   : > { %2611 = vtanh.f32 %v3101_v60 }
 0xfde   : > { %v2612_v61 = vpop.eup %2611 }
 0xfdf   : > { %1663 = vrot.lane.b32.xlu1 %v2612_v61, %s2715_s21 }
0x1015   : > { %v1578_v63 = vpop.permute.xlu1 %1577 }
0x1016   : > { %v3106_v0 = vadd.f32 %v1578_v63, %v1570_v37 }
0x1018   : > { %2613 = vtanh.f32 %v3106_v0 }
0x101e   : > { %v2614_v1 = vpop.eup %2613 }
0x101f   : > { %1583 = vrot.lane.b32.xlu0 %v2614_v1, %s2715_s21  ;;  %v1808_v1 = vrot.slane %v3101_v60, 7  ;;  %v2444_v60 = vld [vmem:[%s3281_s6 + $0x8] sm:$0xff] }
0x1020   : > { %1867 = vmatpush.bf16.msrb.mxu2 %v2444_v60 }
0x1051   : > { %v1664_v51 = vpop.permute.xlu1 %1663 }
0x1052   : > { %v1666_v2 = vmul.f32 %v1664_v51, %v1644_v29 }
0x1054   : > { %v1754_v3 = vpack.c.bf16 %v1666_v2, %v1666_v2  ;;  %1668 = vrot.lane.b32.xlu2 %v1666_v2, %s2716_s29 }
0x1056   : > { %v1758_v4 = vrot.slane %v1754_v3, 3 }
0x1058   : > { %1759 = vrot.lane.b32.xlu1 %v1758_v4, %s2716_s29 }
0x1091   : > { %v1584_v5 = vpop.permute.xlu0 %1583 }
0x1092   : > { %v3115_v6 = vmul.f32 %v1584_v5, %v1567_v56 }
0x1094   : > { %v1671_v7 = vrot.slane %v3115_v6, 2 }
0x1096   : > { %1672 = vrot.lane.b32.xlu0 %v1671_v7, %s2713_s1 }
0x10ae   : > { %v1669_v11 = vpop.permute.xlu2 %1668 }
0x10ca   : > { %v1760_v10 = vpop.permute.xlu1 %1759 }
0x10cb   : > { %2356 = vmatmul.msk.bf16.vlgmr.msra.gmra.mxu1 %vm624_vm1, %v1760_v10 }
0x1108   : > { %v1673_v12 = vpop.permute.xlu0 %1672 }
0x1109   : > { %v1675_v13 = vsel %vm624_vm1, %v1669_v11, %v1673_v12 }
0x110a   : > { %v1676_v14 = vpack.c.bf16 %v1675_v13, %v1675_v13 }
0x110c   : > { %v1683_v15 = vrot.slane %v1676_v14, 3 }
0x110e   : > { %2350 = vmatmul.msk.bf16.vlgmr.msra.gmra.mxu3 %vm594_vm0, %v1683_v15 }
0x1148   : > { %v1779_v17 = vpop.f32.mrf.mxu1 }
0x1149   : > { %v1784_v18 = vrot.slane %v1779_v17, 1 }
0x114b   : > { %v1786_v19 = vadd.f32 %v1784_v18, %v2890_v16 }
0x114d   : > { %2615 = vtanh.f32 %v1786_v19  ;;  %v2357_v25 = vmul.f32 -1.442695, %v1786_v19 }
0x1150   : > { %v1781_v20 = vpop.f32.mrf.mxu1 }
0x1153   : > { %v2616_v21 = vpop.eup %2615 }
0x1154   : > { %1812 = vrot.lane.b32.xlu0 %v2616_v21, %s2713_s1  ;;  %v1841_v21 = vld [vmem:[%s3282_s7] sm:$0x1] }
0x1191   : > { %v1708_v23 = vpop.f32.mrf.mxu3 }
0x1192   : > { %v1709_v24 = vadd.f32 %v1708_v23, %v1681_v22 }
0x1194   : > { %2617 = vtanh.f32 %v1709_v24  ;;  %v2351_v47 = vmul.f32 -1.442695, %v1709_v24 }
0x1195   : > { %2619 = vpow2.f32 %v2357_v25 }
0x1199   : > { %v1710_v26 = vpop.f32.mrf.mxu3 }
0x119a   : > { %v2618_v27 = vpop.eup %2617 }
0x119b   : > { %1734 = vrot.lane.b32.xlu2 %v2618_v27, %s2713_s1  ;;  %v2620_v28 = vpop.eup %2619 }
0x119c   : > { %v1790_v16 = vadd.f32 1.0, %v2620_v28 }
0x119e   : > { %2621 = vrcp.f32 %v1790_v16  ;;  %v1802_v29 = vand.u32 2147483648, %v1790_v16  ;;  %vm1796_vm13 = vweird.f32 %v1790_v16  ;;  %v1800_v39 = vand.u32 2147483647, %v1790_v16 }
0x119f   : > { %2623 = vpow2.f32 %v2351_v47 }
0x11a0   : > { %v1803_v43 = vor.u32 1.1754944e-38, %v1802_v29  ;;  %vm1801_vm15 = vcmp.eq.f32.partialorder %v1800_v39, 8.507059e+37 }
0x11a4   : > { %v2622_v30 = vpop.eup %2621 }
0x11a5   : > { %v1792_v31 = vmul.f32 %v2622_v30, %v1790_v16  ;;  %vm1797_vm12 = vweird.f32 %v2622_v30  ;;  %v2624_v48 = vpop.eup %2623 }
0x11a6   : > { %vm1798_vm14 = vmor %vm1796_vm13, %vm1797_vm12  ;;  %v1715_v50 = vadd.f32 1.0, %v2624_v48 }
0x11a7   : > { %v1793_v34 = vsub.f32 1.0, %v1792_v31 }
0x11a8   : > { %2625 = vrcp.f32 %v1715_v50  ;;  %v1727_v45 = vand.u32 2147483648, %v1715_v50  ;;  %vm1721_vm3 = vweird.f32 %v1715_v50  ;;  %v1725_v57 = vand.u32 2147483647, %v1715_v50 }
0x11a9   : > { %v1794_v35 = vmul.f32 %v2622_v30, %v1793_v34 }
0x11aa   : > { %v1728_v59 = vor.u32 1.1754944e-38, %v1727_v45  ;;  %vm1726_vm5 = vcmp.eq.f32.partialorder %v1725_v57, 8.507059e+37 }
0x11ab   : > { %v1795_v36 = vadd.f32 %v2622_v30, %v1794_v35 }
0x11ad   : > { %v1799_v41 = vsel %vm1798_vm14, %v2622_v30, %v1795_v36 }
0x11ae   : > { %v1804_v33 = vsel %vm1801_vm15, %v1803_v43, %v1799_v41  ;;  %v2626_v38 = vpop.eup %2625 }
0x11af   : > { %v1717_v52 = vmul.f32 %v2626_v38, %v1715_v50  ;;  %vm1722_vm2 = vweird.f32 %v2626_v38  ;;  %v1810_v51 = vmul.f32 %v1808_v1, %v1804_v33 }
0x11b0   : > { %vm1723_vm4 = vmor %vm1721_vm3, %vm1722_vm2 }
0x11b1   : > { %v1718_v53 = vsub.f32 1.0, %v1717_v52 }
0x11b3   : > { %v1719_v54 = vmul.f32 %v2626_v38, %v1718_v53 }
0x11b5   : > { %v1720_v56 = vadd.f32 %v2626_v38, %v1719_v54 }
0x11b7   : > { %v1724_v58 = vsel %vm1723_vm4, %v2626_v38, %v1720_v56 }
0x11b8   : > { %v1729_v37 = vsel %vm1726_vm5, %v1728_v59, %v1724_v58 }
0x11b9   : > { %v1732_v42 = vmul.f32 %v1729_v37, %v3106_v0  ;;  %v2443_v0 = vld [vmem:[%s3281_s6] sm:$0xff] }
0x11ba   : > { %1868 = vmatpush.bf16.msrb.mxu2 %v2443_v0  ;;  %v2451_v0 = vld [vmem:[%s3287_s12 + $0x28] sm:$0xff] }
0x11c6   : > { %v1813_v32 = vpop.permute.xlu0 %1812 }
0x11c7   : > { %v1815_v46 = vmul.f32 %v1813_v32, %v1804_v33 }
0x11c9   : > { %1817 = vrot.lane.b32.xlu2 %v1815_v46, %s2714_s23 }
0x11f5   : > { %v1735_v61 = vpop.permute.xlu2 %1734 }
0x11f6   : > { %v1737_v63 = vmul.f32 %v1735_v61, %v1729_v37 }
0x11f8   : > { %1739 = vrot.lane.b32.xlu1 %v1737_v63, %s2714_s23 }
0x1223   : > { %v1818_v2 = vpop.permute.xlu2 %1817 }
0x1224   : > { %v1820_v3 = vadd.f32 %v1818_v2, %v1810_v51 }
0x1226   : > { %2627 = vtanh.f32 %v1820_v3 }
0x122c   : > { %v2628_v4 = vpop.eup %2627 }
0x122d   : > { %1823 = vrot.lane.b32.xlu1 %v2628_v4, %s2715_s21 }
0x126a   : > { %v1740_v5 = vpop.permute.xlu1 %1739 }
0x126b   : > { %v3139_v7 = vadd.f32 %v1740_v5, %v1732_v42  ;;  %v2445_v5 = vld [vmem:[%s3285_s10] sm:$0xff] }
0x126c   : > { %1979 = vmatpush.bf16.msra.mxu0 %v2445_v5  ;;  %v2509_v5 = vld [vmem:[%s3290_s15] ss:$0 sm:$0xff] }
0x126d   : > { %2629 = vtanh.f32 %v3139_v7 }
0x1273   : > { %v2630_v8 = vpop.eup %2629 }
0x1274   : > { %1745 = vrot.lane.b32.xlu0 %v2630_v8, %s2715_s21 }
0x129f   : > { %v1824_v9 = vpop.permute.xlu1 %1823 }
0x12a0   : > { %v1826_v10 = vmul.f32 %v1824_v9, %v1804_v33 }
0x12a2   : > { %1828 = vrot.lane.b32.xlu2 %v1826_v10, %s2716_s29  ;;  %v2452_v10 = vld [vmem:[%s3287_s12 + $0x30] sm:$0xff] }
0x12e6   : > { %v1746_v11 = vpop.permute.xlu0 %1745 }
0x12e7   : > { %v1748_v12 = vmul.f32 %v1746_v11, %v1729_v37  ;;  %v2450_v11 = vld [vmem:[%s3287_s12 + $0x20] sm:$0xff] }
0x12e9   : > { %v1831_v13 = vrot.slane %v1748_v12, 1 }
0x12eb   : > { %1832 = vrot.lane.b32.xlu0 %v1831_v13, %s2713_s1 }
0x12fc   : > { %v1829_v14 = vpop.permute.xlu2 %1828 }
0x135d   : > { %v1833_v15 = vpop.permute.xlu0 %1832 }
0x135e   : > { %v1835_v17 = vsel %vm624_vm1, %v1829_v14, %v1833_v15  ;;  %v2449_v14 = vld [vmem:[%s3287_s12 + $0x18] sm:$0xff] }
0x135f   : > { %v1836_v18 = vpack.c.bf16 %v1835_v17, %v1835_v17 }
0x1361   : > { %v1843_v19 = vshrl.u32 %v1836_v18, 16  ;;  %v2448_v18 = vld [vmem:[%s3287_s12 + $0x10] sm:$0xff] }
0x1363   : > { %v1845_v20 = vrot.slane %v1843_v19, 3 }
0x1365   : > { %2366 = vmatmul.msk.bf16.vlgmr.msrb.gmra.mxu2 %vm594_vm0, %v1845_v20 }
0x13e8   : > { %v1870_v22 = vpop.f32.mrf.mxu2 }
0x13e9   : > { %v1871_v23 = vadd.f32 %v1870_v22, %v1841_v21  ;;  %v2504_v21 = vld [vmem:[%s3283_s8] ss:$0 sm:$0xff] }
0x13eb   : > { %2631 = vtanh.f32 %v1871_v23  ;;  %v2367_v26 = vmul.f32 -1.442695, %v1871_v23 }
0x13ed   : > { %2633 = vpow2.f32 %v2367_v26 }
0x13f0   : > { %v1872_v24 = vpop.f32.mrf.mxu2 }
0x13f1   : > { %v2632_v25 = vpop.eup %2631  ;;  %v2505_v24 = vld [vmem:[%s3284_s9] ss:$0 sm:$0xff] }
0x13f2   : > { %1896 = vrot.lane.b32.xlu1 %v2632_v25, %s2713_s1 }
0x13f3   : > { %v2634_v27 = vpop.eup %2633 }
0x13f4   : > { %v1877_v28 = vadd.f32 1.0, %v2634_v27 }
0x13f6   : > { %2635 = vrcp.f32 %v1877_v28  ;;  %v1889_v36 = vand.u32 2147483648, %v1877_v28  ;;  %vm1883_vm7 = vweird.f32 %v1877_v28  ;;  %v1887_v29 = vand.u32 2147483647, %v1877_v28 }
0x13f8   : > { %v1890_v39 = vor.u32 1.1754944e-38, %v1889_v36  ;;  %vm1888_vm9 = vcmp.eq.f32.partialorder %v1887_v29, 8.507059e+37 }
0x13fa   : > { %780 = vrot.lane.b32.xlu1 %v2932_v40, %s2716_s29 }
0x13fc   : > { %v2636_v16 = vpop.eup %2635 }
0x13fd   : > { %v1879_v30 = vmul.f32 %v2636_v16, %v1877_v28  ;;  %vm1884_vm6 = vweird.f32 %v2636_v16  ;;  %v2447_v28 = vld [vmem:[%s3287_s12 + $0x8] sm:$0xff] }
0x13fe   : > { %vm1885_vm8 = vmor %vm1883_vm7, %vm1884_vm6 }
0x13ff   : > { %v1880_v31 = vsub.f32 1.0, %v1879_v30  ;;  %v2506_v30 = vld [vmem:[%s3286_s11] ss:$0 sm:$0xff] }
0x1401   : > { %v1881_v34 = vmul.f32 %v2636_v16, %v1880_v31 }
0x1402   : > { %1264 = vrot.lane.b32.xlu1 %v3040_v55, %s2716_s29 }
0x1403   : > { %v1882_v35 = vadd.f32 %v2636_v16, %v1881_v34 }
0x1405   : > { %v1886_v40 = vsel %vm1885_vm8, %v2636_v16, %v1882_v35  ;;  %v2446_v16 = vld [vmem:[%s3287_s12] sm:$0xff] }
0x1406   : > { %v1891_v41 = vsel %vm1888_vm9, %v1890_v39, %v1886_v40  ;;  %v2507_v40 = vld [vmem:[%s3288_s13] ss:$0 sm:$0xff] }
0x1407   : > { %v1894_v47 = vmul.f32 %v1891_v41, %v3139_v7  ;;  %v2453_v7 = vld [vmem:[%s3287_s12 + $0x38] sm:$0xff] }
0x1408   : > { %2055 = vmatpush.bf16.msrb.mxu3 %v2453_v7 }
0x140a   : > { %1750 = vrot.lane.b32.xlu1 %v1748_v12, %s2716_s29 }
0x140c   : > { %2056 = vmatpush.bf16.msrb.mxu3 %v2452_v10  ;;  %v2510_v10 = vld [vmem:[%s3292_s17] ss:$0 sm:$0xff] }
0x1410   : > { %2057 = vmatpush.bf16.msrb.mxu3 %v2451_v0 }
0x1414   : > { %2058 = vmatpush.bf16.msrb.mxu3 %v2450_v11 }
0x1418   : > { %2059 = vmatpush.bf16.msrb.mxu3 %v2449_v14 }
0x141c   : > { %2060 = vmatpush.bf16.msrb.mxu3 %v2448_v18 }
0x1420   : > { %2061 = vmatpush.bf16.msrb.mxu3 %v2447_v28 }
0x1424   : > { %2062 = vmatpush.bf16.msrb.mxu3 %v2446_v16 }
0x1464   : > { %v1897_v55 = vpop.permute.xlu1 %1896 }
0x1465   : > { %v1899_v43 = vmul.f32 %v1897_v55, %v1891_v41 }
0x1467   : > { %1901 = vrot.lane.b32.xlu2 %v1899_v43, %s2714_s23 }
0x146c   : > { %v781_v32 = vpop.permute.xlu1 %780 }
0x146d   : > { %784 = vst.msk [vmem:[#allocation2] sm:$0x1] %vm783_vm10, %v781_v32 }
0x146f   : > { %941 = vrot.lane.b32.xlu2 %v2968_v44, %s2716_s29 }
0x1474   : > { %v1265_v33 = vpop.permute.xlu1 %1264 }
0x1475   : > { %1267 = vst.msk [vmem:[#allocation2 + $0x3] sm:$0x1] %vm783_vm10, %v1265_v33 }
0x1477   : > { %1426 = vrot.lane.b32.xlu2 %v3076_v62, %s2716_s29 }
0x147c   : > { %v1751_v46 = vpop.permute.xlu1 %1750 }
0x147d   : > { %1753 = vst.msk [vmem:[#allocation2 + $0x6] sm:$0x1] %vm783_vm10, %v1751_v46  ;;  %v2718_v46 = vmov 32.0  }
0x14c1   : > { %v1902_v48 = vpop.permute.xlu2 %1901 }
0x14c2   : > { %v1904_v50 = vadd.f32 %v1902_v48, %v1894_v47 }
0x14c4   : > { %2637 = vtanh.f32 %v1904_v50 }
0x14c9   : > { %v942_v38 = vpop.permute.xlu2 %941 }
0x14ca   : > { %v2638_v52 = vpop.eup %2637  ;;  %944 = vst.msk [vmem:[#allocation2 + $0x1] sm:$0x1] %vm783_vm10, %v942_v38 }
0x14cb   : > { %1907 = vrot.lane.b32.xlu0 %v2638_v52, %s2715_s21  ;;  %s2161_s21 = sshll.u32 %s2157_s30, 4  ;;  %s2162_s21 = int_to_ptr.hbm [resolvable:$true] %s2161_s21 }
0x14cc   : > { %s2662_s0 = sshra.s32 %s2162_s21, 4  ;;  %s2663_s0 = int_to_ptr.hbm [resolvable:$true] %s2662_s0 }
0x14cd   : > { %s2664_s4 = scalar_lea.hbm %s2663_s0, 8  ;;  %p2669_p0 = scmp.lt.s32.totalorder %s2663_s0, %s3293_s18 }
0x14ce   : > { %p2665_p11 = scmp.ne.s32.totalorder %s2663_s0, %s2664_s4  ;;  %p2670_p1 = scmp.lt.s32.totalorder %s2668_s27, %s2664_s4 }
0x14d0   : > { %p2666_p12 = pnand %p2665_p11, %p2852_p5  ;;  %p2671_p2 = por %p2670_p1, %p2669_p0 }
0x14d1   : > { %v1427_v44 = vpop.permute.xlu2 %1426 }
0x14d2   : > { %1429 = vst.msk [vmem:[#allocation2 + $0x4] sm:$0x1] %vm783_vm10, %v1427_v44  ;;  %p2667_p13 = pneg %p2666_p12 }
0x14d3   : > { %1102 = vrot.lane.b32.xlu0 %v3004_v49, %s2716_s29  ;;  %v2717_v49 = vmov 16.0  }
0x14d4   : > { %2639 = vrcp.f32 %v2717_v49  ;;  %p2672_p3 = pnand %p2671_p2, %p2667_p13 }
0x14db   : > { %1588 = vrot.lane.b32.xlu0 %v3115_v6, %s2716_s29  ;;  %v2640_v6 = vpop.eup %2639 }
0x14dc   : > { %v1923_v59 = vmul.f32 16.0, %v2640_v6  ;;  %vm1927_vm11 = vweird.f32 %v2640_v6 }
0x14de   : > { %v1924_v61 = vsub.f32 1.0, %v1923_v59 }
0x14e0   : > { %v1925_v37 = vmul.f32 %v2640_v6, %v1924_v61 }
0x14e2   : > { %v1926_v63 = vadd.f32 %v2640_v6, %v1925_v37 }
0x14e4   : > { %v1928_v1 = vsel %vm1927_vm11, %v2640_v6, %v1926_v63 }
0x153d   : > { %v1908_v62 = vpop.permute.xlu0 %1907 }
0x153e   : > { %v1910_v53 = vmul.f32 %v1908_v62, %v1891_v41  ;;  %v2647_v41 = vld [vmem:[%s2876_s24] sm:$0xff] }
0x1540   : > { %1912 = vrot.lane.b32.xlu2 %v1910_v53, %s2716_s29  ;;  %s564_s29 = sand.u32 1, %s2702_s28  }
0x1541   : > { %s2225_s20 = sshll.u32 %s564_s29, 3  ;;  %s2147_s3 = scalar_lea.sflag [#allocation4], %s564_s29 }
0x1542   : > { %s566_s1 = scalar_lea.vmem [#allocation3], %s2225_s20 }
0x1543   : > { %s2159_s23 = sshll.u32 %s566_s1, 4  ;;  %s2160_s23 = int_to_ptr.vmem [resolvable:$true] %s2159_s23 }
0x1545   : > { %v1103_v54 = vpop.permute.xlu0 %1102 }
0x1546   : > { %1105 = vst.msk [vmem:[#allocation2 + $0x2] sm:$0x1] %vm783_vm10, %v1103_v54 }
0x154d   : > { %v1589_v56 = vpop.permute.xlu0 %1588 }
0x154e   : > { %1591 = vst.msk [vmem:[#allocation2 + $0x5] sm:$0x1] %vm783_vm10, %v1589_v56 }
0x159a   : > { %v1913_v45 = vpop.permute.xlu2 %1912 }
0x159b   : > { %1915 = vst.msk [vmem:[#allocation2 + $0x7] sm:$0x1] %vm783_vm10, %v1913_v45 }
0x15a2   : > { %v1916_v57 = vld [vmem:[#allocation2] sm:$0xff] }
0x15a3   : > { %v1919_v58 = vsel %vm624_vm1, %v1916_v57, 0.0 }
0x15a4   : > { %1920 = vadd.xlane.f32.xlu0 %v1919_v58  ;;  %v2454_v58 = vld [vmem:[%s3291_s16] sm:$0xff] }
0x1617   : > { %v1921_v51 = vpop.xlane.xlu0 %1920 }
0x1618   : > { %v1929_v2 = vmul.f32 %v1928_v1, %v1921_v51 }
0x161a   : > { %v1930_v3 = vsub.f32 %v1916_v57, %v1929_v2  ;;  %v2455_v57 = vld [vmem:[%s3291_s16 + $0x8] sm:$0xff] }
0x161b   : > { %2138 = vmatpush.bf16.msrb.mxu1 %v2455_v57 }
0x161c   : > { %v1931_v4 = vmul.f32 %v1930_v3, %v1930_v3 }
0x161e   : > { %v1932_v42 = vsel %vm624_vm1, %v1931_v4, 0.0 }
0x161f   : > { %1933 = vadd.xlane.f32.xlu1 %v1932_v42  ;;  %2139 = vmatpush.bf16.msrb.mxu1 %v2454_v58 }
0x1692   : > { %v1934_v8 = vpop.xlane.xlu1 %1933 }
0x1693   : > { %v1935_v9 = vmul.f32 %v1934_v8, %v1928_v1 }
0x1695   : > { %v1936_v60 = vadd.f32 1e-05, %v1935_v9 }
0x1697   : > { %2641 = vrsqrt.f32 %v1936_v60  ;;  %vm1943_vm13 = vweird.f32 %v1936_v60 }
0x1698   : > { %2643 = vrcp.f32 %v2718_v46 }
0x169d   : > { %v2642_v12 = vpop.eup %2641 }
0x169e   : > { %v1938_v13 = vmul.f32 %v2642_v12, %v1936_v60  ;;  %vm1944_vm12 = vweird.f32 %v2642_v12  ;;  %v2644_v47 = vpop.eup %2643 }
0x169f   : > { %vm1945_vm14 = vmor %vm1943_vm13, %vm1944_vm12  ;;  %v2075_v48 = vmul.f32 32.0, %v2644_v47 }
0x16a0   : > { %v1939_v15 = vmul.f32 %v2642_v12, %v1938_v13 }
0x16a1   : > { %v2076_v50 = vsub.f32 1.0, %v2075_v48 }
0x16a2   : > { %v1940_v17 = vmul.f32 0.5, %v1939_v15 }
0x16a3   : > { %v2077_v38 = vmul.f32 %v2644_v47, %v2076_v50 }
0x16a4   : > { %v1941_v19 = vsub.f32 1.5, %v1940_v17 }
0x16a5   : > { %v2078_v52 = vadd.f32 %v2644_v47, %v2077_v38 }
0x16a6   : > { %v1942_v20 = vmul.f32 %v2642_v12, %v1941_v19 }
0x16a8   : > { %v1946_v22 = vsel %vm1945_vm14, %v2642_v12, %v1942_v20 }
0x16a9   : > { %v1947_v23 = vmul.f32 %v1946_v22, %v1930_v3  ;;  %v2508_v3 = vld [vmem:[%s3289_s14] ss:$0 sm:$0xff] }
0x16ab   : > { %v1951_v25 = vmul.f32 %v2504_v21, %v1947_v23 }
0x16ad   : > { %v1955_v26 = vadd.f32 %v2505_v24, %v1951_v25 }
0x16af   : > { %v1956_v27 = vpack.c.bf16 %v1955_v26, %v1955_v26 }
0x16b1   : > { %2372 = vmatmul.msk.bf16.vlgmr.msra.gmra.mxu0 %vm624_vm1, %v1956_v27  ;;  %vm2079_vm1 = vweird.f32 %v2644_v47 }
0x16b2   : > { %v2080_v44 = vsel %vm2079_vm1, %v2644_v47, %v2078_v52 }
0x172e   : > { %v1981_v31 = vpop.f32.mrf.mxu0 }
0x172f   : > { %v1982_v34 = vadd.f32 %v2506_v30, %v1981_v31 }
0x1731   : > { %v1985_v35 = vmax.f32 %v1982_v34, 0.0 }
0x1733   : > { %v1986_v36 = vpack.c.bf16 %v1985_v35, %v1985_v35 }
0x1735   : > { %2063 = vmatmul.bf16.vlgmr.msrb.gmra.mxu3 %v1986_v36 }
0x1736   : > { %v1983_v29 = vpop.f32.mrf.mxu0 }
0x17b8   : > { %v2064_v39 = vpop.f32.mrf.mxu3 }
0x17b9   : > { %v2065_v55 = vadd.f32 %v2507_v40, %v2064_v39 }
0x17bb   : > { %v2068_v43 = vadd.f32 %v2647_v41, %v2065_v55 }
0x17bd   : > { %v2071_v32 = vsel %vm594_vm0, %v2068_v43, 0.0 }
0x17be   : > { %2072 = vadd.xlane.f32.xlu2 %v2071_v32 }
0x17c0   : > { %v2066_v33 = vpop.f32.mrf.mxu3 }
0x1831   : > { %v2073_v62 = vpop.xlane.xlu2 %2072 }
0x1832   : > { %v2081_v53 = vmul.f32 %v2080_v44, %v2073_v62 }
0x1834   : > { %v2082_v54 = vsub.f32 %v2068_v43, %v2081_v53 }
0x1836   : > { %v2083_v56 = vmul.f32 %v2082_v54, %v2082_v54 }
0x1838   : > { %v2084_v45 = vsel %vm594_vm0, %v2083_v56, 0.0 }
0x1839   : > { %2085 = vadd.xlane.f32.xlu2 %v2084_v45 }
0x18ac   : > { %v2086_v49 = vpop.xlane.xlu2 %2085 }
0x18ad   : > { %v2087_v6 = vmul.f32 %v2086_v49, %v2080_v44 }
0x18af   : > { %v2088_v59 = vadd.f32 1e-05, %v2087_v6 }
0x18b1   : > { %2645 = vrsqrt.f32 %v2088_v59  ;;  %vm2095_vm2 = vweird.f32 %v2088_v59 }
0x18b7   : > { %v2646_v61 = vpop.eup %2645 }
0x18b8   : > { %v2090_v37 = vmul.f32 %v2646_v61, %v2088_v59  ;;  %vm2096_vm15 = vweird.f32 %v2646_v61 }
0x18b9   : > { %vm2097_vm3 = vmor %vm2095_vm2, %vm2096_vm15 }
0x18ba   : > { %v2091_v63 = vmul.f32 %v2646_v61, %v2090_v37 }
0x18bc   : > { %v2092_v1 = vmul.f32 0.5, %v2091_v63 }
0x18be   : > { %v2093_v51 = vsub.f32 1.5, %v2092_v1 }
0x18c0   : > { %v2094_v2 = vmul.f32 %v2646_v61, %v2093_v51 }
0x18c2   : > { %v2098_v4 = vsel %vm2097_vm3, %v2646_v61, %v2094_v2 }
0x18c3   : > { %v2099_v42 = vmul.f32 %v2098_v4, %v2082_v54 }
0x18c5   : > { %v2103_v7 = vmul.f32 %v2508_v3, %v2099_v42 }
0x18c7   : > { %v2107_v8 = vadd.f32 %v2509_v5, %v2103_v7 }
0x18c9   : > { %v2108_v9 = vpack.c.bf16 %v2107_v8, %v2107_v8 }
0x18cb   : > { %2413 = vmatmul.msk.bf16.vlgmr.msrb.gmra.mxu1 %vm594_vm0, %v2108_v9 }
0x1948   : > { %v2141_v60 = vpop.f32.mrf.mxu1 }
0x1949   : > { %v2142_v0 = vadd.f32 %v2510_v10, %v2141_v60 }
0x194b   : > { %2145 = vst [vmem:[%s566_s1] sm:$0xff] %v2142_v0 }
0x194c   : > { %2675 = shalt.err (!%p2672_p3)
}
0x194d   : > { %2456 = dma.vmem_to_hbm [thread:$0]  (%p2852_p5), %s2160_s23, 128, %s2162_s21, %s2147_s3  }
0x1950   : > { %v2143_v11 = vpop.f32.mrf.mxu1 }
0x1951 PF: > { %s3319_s29 = sld [smem:[#allocation8_spill]] }
0x1952   : > { %s3320_s30 = sld [smem:[#allocation6_spill]] }
0x1957   : > { %p2462_p4 = scmp.ge.s32.totalorder %s3319_s29, 2 }
0x1958   : > { %s2173_s1 = sand.u32 1, %s3320_s30  }
0x1959   : > { %p2459_p7 = pnand %p2462_p4, %p2856_p6  ;;  %s2174_s19 = scalar_lea.sflag [#allocation4], %s2173_s1 }
0x195b   : > { %p2460_p8 = pneg %p2459_p7 }
0x195d   : > { %2693 = dma.done.wait (%p2460_p8), %s2174_s19, 128  }
0x195e   : > { %2695 = vsyncadd (%p2460_p8), %s2174_s19, 4294967168  ;;  %s3322_s30 = sld [smem:[#allocation9_spill]]  ;;  %s3325_s27 = smov %s2702_s28 }
0x195f   : > { %s3323_s4 = sld [smem:[#allocation7_spill]] }
0x1960   : > { %s3324_s29 = sld [smem:[#allocation10_spill]] }
0x1964   : > { %p28_p9 = scmp.ge.s32.totalorder %s3322_s30, 4  }
0x1965   : > { %s3326_s28 = smov %s3323_s4 }
0x1966   :  { %30 = sbr.rel (!%p28_p9) target bundleno = 9 (0x9), region = 127 }
0x196b   :  { %2180 = vsyncpa [#allocation4], 1 }
0x196c   :  { %2182 = vsyncpa [#allocation4 + $0x1], 1 }

</bundles_post_ra>
